<compile_context>
chip_gen: v6e
topology: v6e:2x2x1
jax: 0.10.0
libtpu: 0.0.40
codegen_flags: <defaults>
</compile_context>

<pallas_src>
import functools

import jax
import jax.numpy as jnp
from jax import lax
from jax.experimental import pallas as pl
from jax.experimental.pallas import tpu as pltpu


def _mtl_kernel(face_ref, lm_ref, gz_ref, lab_ref, match_ref, tgt_ref, out_ref,
                *, n_box, n_lm, n_gz, num_gt, num_anchors, a_tile):
    t = pl.program_id(1)                               # anchor-tile index
    D = n_box + n_lm + n_gz
    f_dim = face_ref.shape[-1]                         # n_box + 1 (logit last)

    face = face_ref[0].astype(jnp.float32)             # (a_tile, f_dim)
    lmk = lm_ref[0].astype(jnp.float32)                # (a_tile, n_lm)
    gzp = gz_ref[0].astype(jnp.float32)                # (a_tile, n_gz)
    labels = lab_ref[0].astype(jnp.float32)            # (1, a_tile)
    matches = match_ref[0]                             # (1, a_tile) int32
    tgt = tgt_ref[0].astype(jnp.float32)               # (D, num_gt)

    # A @ B^T on the MXU; lhs is an exact 0/1 matrix -> HIGHEST keeps it exact.
    def nt_dot(a, b):
        return lax.dot_general(a, b, (((1,), (1,)), ((), ())),
                               precision=lax.Precision.HIGHEST,
                               preferred_element_type=jnp.float32)

    # ---- validity of anchors in this (possibly ragged / OOB) tile ----------
    lane = lax.broadcasted_iota(jnp.int32, (1, a_tile), 1)
    valid = (t * a_tile + lane) < num_anchors           # (1, a_tile) bool

    # ---- lane-dense logits via a one-hot selector row on the MXU -----------
    ksel = lax.broadcasted_iota(jnp.int32, (1, f_dim), 1)
    logits = nt_dot((ksel == n_box).astype(jnp.float32), face)   # (1, a_tile)

    # ---- face classification: BCE-with-logits, summed over valid anchors ---
    bce = (jnp.maximum(logits, 0.0) - logits * labels
           + jnp.log1p(jnp.exp(-jnp.abs(logits))))
    bce = jnp.where(valid, bce, 0.0)                    # NaN-safe tail masking
    bce_s = jnp.sum(bce, keepdims=True)                 # (1, 1)

    pos = (labels > 0.0) & valid                        # (1, a_tile)

    # ---- relayout preds: natural (a_tile, d) -> lane-dense (D, a_tile) -----
    # Done with tiny 0/1 placement matrices on the MXU (idle otherwise).
    def placed(x, width, offset, keep):
        f = lax.broadcasted_iota(jnp.int32, (D, width), 0)
        k = lax.broadcasted_iota(jnp.int32, (D, width), 1)
        sel = (f == k + offset) & (k < keep)
        return nt_dot(sel.astype(jnp.float32), x)        # (D, a_tile)

    preds = (placed(face, f_dim, 0, n_box)               # box rows 0..3
             + placed(lmk, n_lm, n_box, n_lm)            # landmark rows
             + placed(gzp, n_gz, n_box + n_lm, n_gz))    # gaze rows

    # ---- gather targets[matches] with a one-hot MXU matmul -----------------
    row = lax.broadcasted_iota(jnp.int32, (num_gt, a_tile), 0)
    onehot = (row == matches).astype(jnp.float32)        # (N, a_tile)
    gathered = lax.dot_general(tgt, onehot, (((1,), (0,)), ((), ())),
                               precision=lax.Precision.HIGHEST,
                               preferred_element_type=jnp.float32)  # (D, a_tile)

    # ---- fused smooth-L1 (beta = 1), masked by positive anchors ------------
    diff = preds - gathered
    ad = jnp.abs(diff)
    err = jnp.where(ad < 1.0, 0.5 * diff * diff, ad - 0.5)          # (D, a_tile)
    err = jnp.where(pos, err, 0.0)                                   # NaN-safe

    # ---- one lane reduce, then split the tiny (D, 1) column by group -------
    col = jnp.sum(err, axis=1, keepdims=True)            # (D, 1)
    fidx = lax.broadcasted_iota(jnp.int32, (D, 1), 0)
    box_s = jnp.sum(jnp.where(fidx < n_box, col, 0.0), keepdims=True)
    lm_s = jnp.sum(jnp.where((fidx >= n_box) & (fidx < n_box + n_lm), col, 0.0),
                   keepdims=True)
    gz_s = jnp.sum(jnp.where(fidx >= n_box + n_lm, col, 0.0), keepdims=True)

    # ---- pack [bce, box, lm, gaze] into one lane-dense (1, 128) store ------
    out_lane = lax.broadcasted_iota(jnp.int32, (1, 128), 1)
    packed = (jnp.where(out_lane == 0, bce_s, 0.0)
              + jnp.where(out_lane == 1, box_s, 0.0)
              + jnp.where(out_lane == 2, lm_s, 0.0)
              + jnp.where(out_lane == 3, gz_s, 0.0))
    out_ref[0, 0] = packed


def _round_up(x, m):
    return ((x + m - 1) // m) * m


def multi_task_loss(predictions, targets,
                    lambda_face=1.0, lambda_landmark=1.0, lambda_gaze=1.0,
                    anchor_tile=8192):
    face_preds = predictions['face_preds']            # (B, A, 5), [..., 4] = logit
    landmark_preds = predictions['landmark_preds']    # (B, A, L)
    gaze_preds = predictions['gaze_preds']            # (B, A, G)

    boxes = targets['boxes']                          # (B, N, 4)
    landmarks = targets['landmarks']                  # (B, N, L)
    gaze = targets['gaze']                            # (B, N, G)
    matches = targets['matches'].astype(jnp.int32)    # (B, A)
    labels = targets['labels'].astype(jnp.float32)    # (B, A)

    B, A, f_dim = face_preds.shape
    N = boxes.shape[1]
    n_box = 4
    n_lm = landmark_preds.shape[-1]
    n_gz = gaze_preds.shape[-1]
    D = n_box + n_lm + n_gz

    a_tile = max(128, (int(anchor_tile) // 128) * 128)
    a_tile = min(a_tile, _round_up(A, 128))
    n_tiles = int(pl.cdiv(A, a_tile))

    # Tiny fused + transposed ground-truth table (B, D, N): negligible traffic.
    tgt = jnp.transpose(jnp.concatenate([boxes, landmarks, gaze], axis=-1),
                        (0, 2, 1)).astype(jnp.float32)

    # Free (layout-compatible) reshapes so block last-two dims satisfy (8,128).
    labels3 = labels.reshape(B, 1, A)
    matches3 = matches.reshape(B, 1, A)

    kernel = functools.partial(_mtl_kernel, n_box=n_box, n_lm=n_lm, n_gz=n_gz,
                               num_gt=N, num_anchors=A, a_tile=a_tile)

    out = pl.pallas_call(
        kernel,
        out_shape=jax.ShapeDtypeStruct((B, n_tiles, 1, 128), jnp.float32),
        grid_spec=pltpu.PrefetchScalarGridSpec(
            num_scalar_prefetch=0,
            grid=(B, n_tiles),
            in_specs=[
                pl.BlockSpec((1, a_tile, f_dim), lambda b, t: (b, t, 0)),  # face
                pl.BlockSpec((1, a_tile, n_lm), lambda b, t: (b, t, 0)),   # lmk
                pl.BlockSpec((1, a_tile, n_gz), lambda b, t: (b, t, 0)),   # gaze
                pl.BlockSpec((1, 1, a_tile), lambda b, t: (b, 0, t)),      # labels
                pl.BlockSpec((1, 1, a_tile), lambda b, t: (b, 0, t)),      # matches
                pl.BlockSpec((1, D, N), lambda b, t: (b, 0, 0)),           # targets
            ],
            out_specs=pl.BlockSpec((1, 1, 1, 128), lambda b, t: (b, t, 0, 0)),
        ),
        compiler_params=pltpu.CompilerParams(
            dimension_semantics=("parallel", "parallel"),
            vmem_limit_bytes=32 * 1024 * 1024,
        ),
    )(face_preds, landmark_preds, gaze_preds, labels3, matches3, tgt)

    sums = out[:, :, 0, :4]                            # (B, n_tiles, 4)
    bce_s = jnp.sum(sums[..., 0])
    box_s = jnp.sum(sums[..., 1])
    lm_s = jnp.sum(sums[..., 2])
    gz_s = jnp.sum(sums[..., 3])

    face_loss = bce_s + box_s
    total = (lambda_face * face_loss + lambda_landmark * lm_s
             + lambda_gaze * gz_s)
    return {'total_loss': total, 'face_loss': face_loss,
            'landmark_loss': lm_s, 'gaze_loss': gz_s}


# ----------------------------- pure-JAX reference -----------------------------
def _reference(predictions, targets, lf=1.0, ll=1.0, lg=1.0):
    fp = predictions['face_preds'].astype(jnp.float32)
    lp = predictions['landmark_preds'].astype(jnp.float32)
    gp = predictions['gaze_preds'].astype(jnp.float32)
    labels = targets['labels'].astype(jnp.float32)
    matches = targets['matches']
    x = fp[:, :, 4]
    bce = jnp.sum(jnp.maximum(x, 0.) - x * labels + jnp.log1p(jnp.exp(-jnp.abs(x))))
    pos = (labels > 0).astype(jnp.float32)

    def gather(t):
        return jax.vmap(lambda tb, mb: tb[mb])(t, matches)

    def sl1(p, t):
        d = p - t
        ad = jnp.abs(d)
        e = jnp.where(ad < 1.0, 0.5 * d * d, ad - 0.5)
        return jnp.sum(jnp.sum(e, -1) * pos)

    box_l = sl1(fp[:, :, :4], gather(targets['boxes'].astype(jnp.float32)))
    lm_l = sl1(lp, gather(targets['landmarks'].astype(jnp.float32)))
    gz_l = sl1(gp, gather(targets['gaze'].astype(jnp.float32)))
    face_l = bce + box_l
    return {'total_loss': lf * face_l + ll * lm_l + lg * gz_l,
            'face_loss': face_l, 'landmark_loss': lm_l, 'gaze_loss': gz_l}


if __name__ == "__main__":
    # batch, anchors (not a multiple of 128/tile -> exercises the in-kernel
    # tail mask), gt boxes, landmark dim, gaze dim
    B, A, N, L, G = 2, 400, 8, 10, 2
    key = jax.random.PRNGKey(0)
    ks = jax.random.split(key, 8)

    predictions = {
        'face_preds': jax.random.normal(ks[0], (B, A, 5), jnp.float32),
        'landmark_preds': jax.random.normal(ks[1], (B, A, L), jnp.float32),
        'gaze_preds': jax.random.normal(ks[2], (B, A, G), jnp.float32),
    }
    targets = {
        'boxes': jax.random.uniform(ks[3], (B, N, 4), jnp.float32),
        'landmarks': jax.random.uniform(ks[4], (B, N, L), jnp.float32),
        'gaze': jax.random.normal(ks[5], (B, N, G), jnp.float32),
        'matches': jax.random.randint(ks[6], (B, A), 0, N, jnp.int32),
        'labels': (jax.random.uniform(ks[7], (B, A)) < 0.3).astype(jnp.float32),
    }

    # multi-tile grid with a ragged last tile
    out = multi_task_loss(predictions, targets, anchor_tile=256)
    out = jax.block_until_ready(out)
    # single (clamped) tile, default tile size
    out_big = multi_task_loss(predictions, targets)
    out_big = jax.block_until_ready(out_big)

    ref = _reference(predictions, targets)
    for k in ('total_loss', 'face_loss', 'landmark_loss', 'gaze_loss'):
        assert jnp.allclose(out[k], ref[k], rtol=1e-4, atol=1e-2), (
            k, out[k], ref[k])
        assert jnp.allclose(out_big[k], ref[k], rtol=1e-4, atol=1e-2), (
            k, out_big[k], ref[k])

    print("KERNEL_OK")
</pallas_src>

<mosaic_0001>
module attributes {stable_mosaic.version = 11 : i64} {
  func.func @_mtl_kernel(%arg0: i32, %arg1: i32, %arg2: memref<1x256x5xf32, #tpu.memory_space<vmem>>, %arg3: memref<1x256x10xf32, #tpu.memory_space<vmem>>, %arg4: memref<1x256x2xf32, #tpu.memory_space<vmem>>, %arg5: memref<1x1x256xf32, #tpu.memory_space<vmem>>, %arg6: memref<1x1x256xi32, #tpu.memory_space<vmem>>, %arg7: memref<1x16x8xf32, #tpu.memory_space<vmem>>, %arg8: memref<1x1x1x128xf32, #tpu.memory_space<vmem>>) attributes {dimension_semantics = [#tpu.dimension_semantics<parallel>, #tpu.dimension_semantics<parallel>], iteration_bounds = array<i64: 2, 2>, scalar_prefetch = 0 : i64, scratch_operands = 0 : i64, tpu.core_type = #tpu.core_type<tc>, window_params = [{transform_indices = @transform_0, window_bounds = array<i64: 1, 256, 5>}, {transform_indices = @transform_1, window_bounds = array<i64: 1, 256, 10>}, {transform_indices = @transform_2, window_bounds = array<i64: 1, 256, 2>}, {transform_indices = @transform_3, window_bounds = array<i64: 1, 1, 256>}, {transform_indices = @transform_4, window_bounds = array<i64: 1, 1, 256>}, {transform_indices = @transform_5, window_bounds = array<i64: 1, 16, 8>}, {transform_indices = @transform_6, window_bounds = array<i64: 1, 1, 1, 128>}]} {
    %c0 = arith.constant 0 : index
    %c0_0 = arith.constant 0 : index
    %c0_1 = arith.constant 0 : index
    %0 = vector.load %arg2[%c0, %c0_0, %c0_1] : memref<1x256x5xf32, #tpu.memory_space<vmem>>, vector<1x256x5xf32>
    %1 = vector.shape_cast %0 : vector<1x256x5xf32> to vector<256x5xf32>
    %c0_2 = arith.constant 0 : index
    %c0_3 = arith.constant 0 : index
    %c0_4 = arith.constant 0 : index
    %2 = vector.load %arg3[%c0_2, %c0_3, %c0_4] : memref<1x256x10xf32, #tpu.memory_space<vmem>>, vector<1x256x10xf32>
    %3 = vector.shape_cast %2 : vector<1x256x10xf32> to vector<256x10xf32>
    %c0_5 = arith.constant 0 : index
    %c0_6 = arith.constant 0 : index
    %c0_7 = arith.constant 0 : index
    %4 = vector.load %arg4[%c0_5, %c0_6, %c0_7] : memref<1x256x2xf32, #tpu.memory_space<vmem>>, vector<1x256x2xf32>
    %5 = vector.shape_cast %4 : vector<1x256x2xf32> to vector<256x2xf32>
    %c0_8 = arith.constant 0 : index
    %c0_9 = arith.constant 0 : index
    %c0_10 = arith.constant 0 : index
    %6 = vector.load %arg5[%c0_8, %c0_9, %c0_10] : memref<1x1x256xf32, #tpu.memory_space<vmem>>, vector<1x1x256xf32>
    %7 = vector.shape_cast %6 : vector<1x1x256xf32> to vector<1x256xf32>
    %c0_11 = arith.constant 0 : index
    %c0_12 = arith.constant 0 : index
    %c0_13 = arith.constant 0 : index
    %8 = vector.load %arg6[%c0_11, %c0_12, %c0_13] : memref<1x1x256xi32, #tpu.memory_space<vmem>>, vector<1x1x256xi32>
    %9 = vector.shape_cast %8 : vector<1x1x256xi32> to vector<1x256xi32>
    %c0_14 = arith.constant 0 : index
    %c0_15 = arith.constant 0 : index
    %c0_16 = arith.constant 0 : index
    %10 = vector.load %arg7[%c0_14, %c0_15, %c0_16] : memref<1x16x8xf32, #tpu.memory_space<vmem>>, vector<1x16x8xf32>
    %11 = vector.shape_cast %10 : vector<1x16x8xf32> to vector<16x8xf32>
    %12 = tpu.iota {dimensions = array<i32: 1>} : vector<1x256xi32>
    %c256_i32 = arith.constant 256 : i32
    %13 = arith.muli %arg1, %c256_i32 : i32
    %14 = vector.broadcast %13 : i32 to vector<1x256xi32>
    %15 = arith.addi %14, %12 : vector<1x256xi32>
    %c400_i32 = arith.constant 400 : i32
    %16 = vector.broadcast %c400_i32 : i32 to vector<1x256xi32>
    %17 = arith.cmpi slt, %15, %16 : vector<1x256xi32>
    %18 = tpu.iota {dimensions = array<i32: 1>} : vector<1x5xi32>
    %c4_i32 = arith.constant 4 : i32
    %19 = vector.broadcast %c4_i32 : i32 to vector<1x5xi32>
    %20 = arith.cmpi eq, %18, %19 : vector<1x5xi32>
    %21 = arith.extui %20 : vector<1x5xi1> to vector<1x5xi32>
    %22 = arith.sitofp %21 : vector<1x5xi32> to vector<1x5xf32>
    %cst = arith.constant dense<0.000000e+00> : vector<1x256xf32>
    %23 = tpu.matmul %22, %1, %cst {dimension_numbers = #tpu.dot_dimension_numbers<[1], [1], [0], [0], [0, 0, 1, 0], [], []>, precision = #tpu.contract_precision<fp32>} : vector<1x5xf32>, vector<256x5xf32>, vector<1x256xf32> -> vector<1x256xf32>
    %cst_17 = arith.constant 0.000000e+00 : f32
    %24 = vector.broadcast %cst_17 : f32 to vector<1x256xf32>
    %25 = arith.maximumf %23, %24 : vector<1x256xf32>
    %26 = arith.mulf %23, %7 : vector<1x256xf32>
    %27 = arith.subf %25, %26 : vector<1x256xf32>
    %28 = math.absf %23 : vector<1x256xf32>
    %cst_18 = arith.constant 0.000000e+00 : f32
    %29 = vector.broadcast %cst_18 : f32 to vector<1x256xf32>
    %30 = arith.subf %29, %28 : vector<1x256xf32>
    %31 = math.exp %30 : vector<1x256xf32>
    %32 = math.log1p %31 : vector<1x256xf32>
    %33 = arith.addf %27, %32 : vector<1x256xf32>
    %cst_19 = arith.constant 0.000000e+00 : f32
    %34 = vector.broadcast %cst_19 : f32 to vector<1x256xf32>
    %35 = arith.select %17, %33, %34 : vector<1x256xi1>, vector<1x256xf32>
    %36 = vector.shape_cast %35 : vector<1x256xf32> to vector<1x1x256xf32>
    %cst_20 = arith.constant dense<0.000000e+00> : vector<1xf32>
    %37 = vector.multi_reduction <add>, %36, %cst_20 [1, 2] : vector<1x1x256xf32> to vector<1xf32>
    %38 = vector.shape_cast %37 : vector<1xf32> to vector<1x1x1xf32>
    %39 = vector.extract %38[0, 0, 0] : f32 from vector<1x1x1xf32>
    %40 = vector.broadcast %39 : f32 to vector<1x1xf32>
    %cst_21 = arith.constant 0.000000e+00 : f32
    %41 = vector.broadcast %cst_21 : f32 to vector<1x256xf32>
    %42 = arith.cmpf ogt, %7, %41 : vector<1x256xf32>
    %43 = arith.andi %42, %17 : vector<1x256xi1>
    %44 = tpu.iota {dimensions = array<i32: 0>} : vector<16x5xi32>
    %45 = tpu.iota {dimensions = array<i32: 1>} : vector<16x5xi32>
    %c0_i32 = arith.constant 0 : i32
    %46 = vector.broadcast %c0_i32 : i32 to vector<16x5xi32>
    %47 = arith.addi %45, %46 : vector<16x5xi32>
    %48 = arith.cmpi eq, %44, %47 : vector<16x5xi32>
    %c4_i32_22 = arith.constant 4 : i32
    %49 = vector.broadcast %c4_i32_22 : i32 to vector<16x5xi32>
    %50 = arith.cmpi slt, %45, %49 : vector<16x5xi32>
    %51 = arith.andi %48, %50 : vector<16x5xi1>
    %52 = arith.extui %51 : vector<16x5xi1> to vector<16x5xi32>
    %53 = arith.sitofp %52 : vector<16x5xi32> to vector<16x5xf32>
    %cst_23 = arith.constant dense<0.000000e+00> : vector<16x256xf32>
    %54 = tpu.matmul %53, %1, %cst_23 {dimension_numbers = #tpu.dot_dimension_numbers<[1], [1], [0], [0], [0, 0, 1, 0], [], []>, precision = #tpu.contract_precision<fp32>} : vector<16x5xf32>, vector<256x5xf32>, vector<16x256xf32> -> vector<16x256xf32>
    %55 = tpu.iota {dimensions = array<i32: 0>} : vector<16x10xi32>
    %56 = tpu.iota {dimensions = array<i32: 1>} : vector<16x10xi32>
    %c4_i32_24 = arith.constant 4 : i32
    %57 = vector.broadcast %c4_i32_24 : i32 to vector<16x10xi32>
    %58 = arith.addi %56, %57 : vector<16x10xi32>
    %59 = arith.cmpi eq, %55, %58 : vector<16x10xi32>
    %c10_i32 = arith.constant 10 : i32
    %60 = vector.broadcast %c10_i32 : i32 to vector<16x10xi32>
    %61 = arith.cmpi slt, %56, %60 : vector<16x10xi32>
    %62 = arith.andi %59, %61 : vector<16x10xi1>
    %63 = arith.extui %62 : vector<16x10xi1> to vector<16x10xi32>
    %64 = arith.sitofp %63 : vector<16x10xi32> to vector<16x10xf32>
    %cst_25 = arith.constant dense<0.000000e+00> : vector<16x256xf32>
    %65 = tpu.matmul %64, %3, %cst_25 {dimension_numbers = #tpu.dot_dimension_numbers<[1], [1], [0], [0], [0, 0, 1, 0], [], []>, precision = #tpu.contract_precision<fp32>} : vector<16x10xf32>, vector<256x10xf32>, vector<16x256xf32> -> vector<16x256xf32>
    %66 = arith.addf %54, %65 : vector<16x256xf32>
    %67 = tpu.iota {dimensions = array<i32: 0>} : vector<16x2xi32>
    %68 = tpu.iota {dimensions = array<i32: 1>} : vector<16x2xi32>
    %c14_i32 = arith.constant 14 : i32
    %69 = vector.broadcast %c14_i32 : i32 to vector<16x2xi32>
    %70 = arith.addi %68, %69 : vector<16x2xi32>
    %71 = arith.cmpi eq, %67, %70 : vector<16x2xi32>
    %c2_i32 = arith.constant 2 : i32
    %72 = vector.broadcast %c2_i32 : i32 to vector<16x2xi32>
    %73 = arith.cmpi slt, %68, %72 : vector<16x2xi32>
    %74 = arith.andi %71, %73 : vector<16x2xi1>
    %75 = arith.extui %74 : vector<16x2xi1> to vector<16x2xi32>
    %76 = arith.sitofp %75 : vector<16x2xi32> to vector<16x2xf32>
    %cst_26 = arith.constant dense<0.000000e+00> : vector<16x256xf32>
    %77 = tpu.matmul %76, %5, %cst_26 {dimension_numbers = #tpu.dot_dimension_numbers<[1], [1], [0], [0], [0, 0, 1, 0], [], []>, precision = #tpu.contract_precision<fp32>} : vector<16x2xf32>, vector<256x2xf32>, vector<16x256xf32> -> vector<16x256xf32>
    %78 = arith.addf %66, %77 : vector<16x256xf32>
    %79 = tpu.iota {dimensions = array<i32: 0>} : vector<8x256xi32>
    %80 = vector.broadcast %9 : vector<1x256xi32> to vector<8x256xi32>
    %81 = arith.cmpi eq, %79, %80 : vector<8x256xi32>
    %82 = arith.extui %81 : vector<8x256xi1> to vector<8x256xi32>
    %83 = arith.sitofp %82 : vector<8x256xi32> to vector<8x256xf32>
    %cst_27 = arith.constant dense<0.000000e+00> : vector<16x256xf32>
    %84 = tpu.matmul %11, %83, %cst_27 {dimension_numbers = #tpu.dot_dimension_numbers<[1], [0], [0], [1], [0, 0, 1, 1], [], []>, precision = #tpu.contract_precision<fp32>} : vector<16x8xf32>, vector<8x256xf32>, vector<16x256xf32> -> vector<16x256xf32>
    %85 = arith.subf %78, %84 : vector<16x256xf32>
    %86 = math.absf %85 : vector<16x256xf32>
    %cst_28 = arith.constant 1.000000e+00 : f32
    %87 = vector.broadcast %cst_28 : f32 to vector<16x256xf32>
    %88 = arith.cmpf olt, %86, %87 : vector<16x256xf32>
    %cst_29 = arith.constant 5.000000e-01 : f32
    %89 = vector.broadcast %cst_29 : f32 to vector<16x256xf32>
    %90 = arith.mulf %89, %85 : vector<16x256xf32>
    %91 = arith.mulf %90, %85 : vector<16x256xf32>
    %cst_30 = arith.constant 5.000000e-01 : f32
    %92 = vector.broadcast %cst_30 : f32 to vector<16x256xf32>
    %93 = arith.subf %86, %92 : vector<16x256xf32>
    %94 = arith.select %88, %91, %93 : vector<16x256xi1>, vector<16x256xf32>
    %cst_31 = arith.constant 0.000000e+00 : f32
    %95 = vector.shape_cast %43 : vector<1x256xi1> to vector<1x256xi1>
    %96 = vector.broadcast %95 : vector<1x256xi1> to vector<16x256xi1>
    %97 = vector.broadcast %cst_31 : f32 to vector<16x256xf32>
    %98 = arith.select %96, %94, %97 : vector<16x256xi1>, vector<16x256xf32>
    %cst_32 = arith.constant dense<0.000000e+00> : vector<16xf32>
    %99 = vector.multi_reduction <add>, %98, %cst_32 [1] : vector<16x256xf32> to vector<16xf32>
    %100 = vector.shape_cast %99 : vector<16xf32> to vector<16x1xf32>
    %101 = tpu.iota {dimensions = array<i32: 0>} : vector<16x1xi32>
    %c4_i32_33 = arith.constant 4 : i32
    %102 = vector.broadcast %c4_i32_33 : i32 to vector<16x1xi32>
    %103 = arith.cmpi slt, %101, %102 : vector<16x1xi32>
    %cst_34 = arith.constant 0.000000e+00 : f32
    %104 = vector.broadcast %cst_34 : f32 to vector<16x1xf32>
    %105 = arith.select %103, %100, %104 : vector<16x1xi1>, vector<16x1xf32>
    %106 = vector.shape_cast %105 : vector<16x1xf32> to vector<1x16x1xf32>
    %cst_35 = arith.constant dense<0.000000e+00> : vector<1xf32>
    %107 = vector.multi_reduction <add>, %106, %cst_35 [1, 2] : vector<1x16x1xf32> to vector<1xf32>
    %108 = vector.shape_cast %107 : vector<1xf32> to vector<1x1x1xf32>
    %109 = vector.extract %108[0, 0, 0] : f32 from vector<1x1x1xf32>
    %110 = vector.broadcast %109 : f32 to vector<1x1xf32>
    %c4_i32_36 = arith.constant 4 : i32
    %111 = vector.broadcast %c4_i32_36 : i32 to vector<16x1xi32>
    %112 = arith.cmpi sge, %101, %111 : vector<16x1xi32>
    %c14_i32_37 = arith.constant 14 : i32
    %113 = vector.broadcast %c14_i32_37 : i32 to vector<16x1xi32>
    %114 = arith.cmpi slt, %101, %113 : vector<16x1xi32>
    %115 = arith.andi %112, %114 : vector<16x1xi1>
    %cst_38 = arith.constant 0.000000e+00 : f32
    %116 = vector.broadcast %cst_38 : f32 to vector<16x1xf32>
    %117 = arith.select %115, %100, %116 : vector<16x1xi1>, vector<16x1xf32>
    %118 = vector.shape_cast %117 : vector<16x1xf32> to vector<1x16x1xf32>
    %cst_39 = arith.constant dense<0.000000e+00> : vector<1xf32>
    %119 = vector.multi_reduction <add>, %118, %cst_39 [1, 2] : vector<1x16x1xf32> to vector<1xf32>
    %120 = vector.shape_cast %119 : vector<1xf32> to vector<1x1x1xf32>
    %121 = vector.extract %120[0, 0, 0] : f32 from vector<1x1x1xf32>
    %122 = vector.broadcast %121 : f32 to vector<1x1xf32>
    %c14_i32_40 = arith.constant 14 : i32
    %123 = vector.broadcast %c14_i32_40 : i32 to vector<16x1xi32>
    %124 = arith.cmpi sge, %101, %123 : vector<16x1xi32>
    %cst_41 = arith.constant 0.000000e+00 : f32
    %125 = vector.broadcast %cst_41 : f32 to vector<16x1xf32>
    %126 = arith.select %124, %100, %125 : vector<16x1xi1>, vector<16x1xf32>
    %127 = vector.shape_cast %126 : vector<16x1xf32> to vector<1x16x1xf32>
    %cst_42 = arith.constant dense<0.000000e+00> : vector<1xf32>
    %128 = vector.multi_reduction <add>, %127, %cst_42 [1, 2] : vector<1x16x1xf32> to vector<1xf32>
    %129 = vector.shape_cast %128 : vector<1xf32> to vector<1x1x1xf32>
    %130 = vector.extract %129[0, 0, 0] : f32 from vector<1x1x1xf32>
    %131 = vector.broadcast %130 : f32 to vector<1x1xf32>
    %132 = tpu.iota {dimensions = array<i32: 1>} : vector<1x128xi32>
    %c0_i32_43 = arith.constant 0 : i32
    %133 = vector.broadcast %c0_i32_43 : i32 to vector<1x128xi32>
    %134 = arith.cmpi eq, %132, %133 : vector<1x128xi32>
    %cst_44 = arith.constant 0.000000e+00 : f32
    %135 = vector.shape_cast %40 : vector<1x1xf32> to vector<1x1xf32>
    %136 = vector.broadcast %135 : vector<1x1xf32> to vector<1x128xf32>
    %137 = vector.broadcast %cst_44 : f32 to vector<1x128xf32>
    %138 = arith.select %134, %136, %137 : vector<1x128xi1>, vector<1x128xf32>
    %c1_i32 = arith.constant 1 : i32
    %139 = vector.broadcast %c1_i32 : i32 to vector<1x128xi32>
    %140 = arith.cmpi eq, %132, %139 : vector<1x128xi32>
    %cst_45 = arith.constant 0.000000e+00 : f32
    %141 = vector.shape_cast %110 : vector<1x1xf32> to vector<1x1xf32>
    %142 = vector.broadcast %141 : vector<1x1xf32> to vector<1x128xf32>
    %143 = vector.broadcast %cst_45 : f32 to vector<1x128xf32>
    %144 = arith.select %140, %142, %143 : vector<1x128xi1>, vector<1x128xf32>
    %145 = arith.addf %138, %144 : vector<1x128xf32>
    %c2_i32_46 = arith.constant 2 : i32
    %146 = vector.broadcast %c2_i32_46 : i32 to vector<1x128xi32>
    %147 = arith.cmpi eq, %132, %146 : vector<1x128xi32>
    %cst_47 = arith.constant 0.000000e+00 : f32
    %148 = vector.shape_cast %122 : vector<1x1xf32> to vector<1x1xf32>
    %149 = vector.broadcast %148 : vector<1x1xf32> to vector<1x128xf32>
    %150 = vector.broadcast %cst_47 : f32 to vector<1x128xf32>
    %151 = arith.select %147, %149, %150 : vector<1x128xi1>, vector<1x128xf32>
    %152 = arith.addf %145, %151 : vector<1x128xf32>
    %c3_i32 = arith.constant 3 : i32
    %153 = vector.broadcast %c3_i32 : i32 to vector<1x128xi32>
    %154 = arith.cmpi eq, %132, %153 : vector<1x128xi32>
    %cst_48 = arith.constant 0.000000e+00 : f32
    %155 = vector.shape_cast %131 : vector<1x1xf32> to vector<1x1xf32>
    %156 = vector.broadcast %155 : vector<1x1xf32> to vector<1x128xf32>
    %157 = vector.broadcast %cst_48 : f32 to vector<1x128xf32>
    %158 = arith.select %154, %156, %157 : vector<1x128xi1>, vector<1x128xf32>
    %159 = arith.addf %152, %158 : vector<1x128xf32>
    %c0_49 = arith.constant 0 : index
    %c0_50 = arith.constant 0 : index
    %c0_51 = arith.constant 0 : index
    %c0_52 = arith.constant 0 : index
    %160 = vector.load %arg8[%c0_49, %c0_50, %c0_51, %c0_52] : memref<1x1x1x128xf32, #tpu.memory_space<vmem>>, vector<1x1x1x128xf32>
    %161 = vector.shape_cast %160 : vector<1x1x1x128xf32> to vector<1x128xf32>
    %162 = vector.shape_cast %159 : vector<1x128xf32> to vector<1x1x1x128xf32>
    tpu.vector_store %arg8[%c0_49, %c0_50, %c0_51, %c0_52], %162 {strides = array<i32>} : memref<1x1x1x128xf32, #tpu.memory_space<vmem>>, vector<1x1x1x128xf32>,
    return
  }
  func.func @transform_0(%arg0: i32, %arg1: i32) -> (i32, i32, i32) {
    %c0_i32 = arith.constant 0 : i32
    %c0_i32_0 = arith.constant 0 : i32
    return %arg0, %arg1, %c0_i32 : i32, i32, i32
  }
  func.func @transform_1(%arg0: i32, %arg1: i32) -> (i32, i32, i32) {
    %c0_i32 = arith.constant 0 : i32
    %c0_i32_0 = arith.constant 0 : i32
    return %arg0, %arg1, %c0_i32 : i32, i32, i32
  }
  func.func @transform_2(%arg0: i32, %arg1: i32) -> (i32, i32, i32) {
    %c0_i32 = arith.constant 0 : i32
    %c0_i32_0 = arith.constant 0 : i32
    return %arg0, %arg1, %c0_i32 : i32, i32, i32
  }
  func.func @transform_3(%arg0: i32, %arg1: i32) -> (i32, i32, i32) {
    %c0_i32 = arith.constant 0 : i32
    %c0_i32_0 = arith.constant 0 : i32
    return %arg0, %c0_i32, %arg1 : i32, i32, i32
  }
  func.func @transform_4(%arg0: i32, %arg1: i32) -> (i32, i32, i32) {
    %c0_i32 = arith.constant 0 : i32
    %c0_i32_0 = arith.constant 0 : i32
    return %arg0, %c0_i32, %arg1 : i32, i32, i32
  }
  func.func @transform_5(%arg0: i32, %arg1: i32) -> (i32, i32, i32) {
    %c0_i32 = arith.constant 0 : i32
    %c0_i32_0 = arith.constant 0 : i32
    %c0_i32_1 = arith.constant 0 : i32
    return %arg0, %c0_i32, %c0_i32_0 : i32, i32, i32
  }
  func.func @transform_6(%arg0: i32, %arg1: i32) -> (i32, i32, i32, i32) {
    %c0_i32 = arith.constant 0 : i32
    %c0_i32_0 = arith.constant 0 : i32
    %c0_i32_1 = arith.constant 0 : i32
    return %arg0, %arg1, %c0_i32, %c0_i32_0 : i32, i32, i32, i32
  }
}

</mosaic_0001>

<bundles_post_ra>
// kernel: tpu_custom_call.1
= control target key start
LH: loop header
LB: loop body
LE: loop exit
PB: predicated region body
PF: predicated region fallthrough
CT: control target
= control target key end

     0   :  { %11 = vsyncpa [#allocation3], 0  ;;  %s9198_s0 = inlined_call_operand.vmem [shape: f32[2,400,5], index: 0, kind: input, shape index: {}]   ;;  %s9199_s1 = inlined_call_operand.vmem [shape: f32[2,400,10], index: 1, kind: input, shape index: {}]   ;;  %s9200_s2 = inlined_call_operand.vmem [shape: f32[2,400,2], index: 2, kind: input, shape index: {}]   ;;  %s9201_s3 = inlined_call_operand.vmem [shape: f32[2,1,400], index: 3, kind: input, shape index: {}]   ;;  %s9202_s4 = inlined_call_operand.vmem [shape: s32[2,1,400], index: 4, kind: input, shape index: {}]   ;;  %s9203_s5 = inlined_call_operand.vmem [shape: f32[2,16,8], index: 5, kind: input, shape index: {}]   ;;  %s9204_s6 = inlined_call_operand.hbm [shape: f32[2,2,1,128], index: 6, kind: output, shape index: {}]  }
   0x1   :  { %13 = vsyncpa [#allocation3 + $0x1], 0  ;;  %s6562_s21 = smov 0   ;;  %s6564_s22 = smov 0  }
   0x2   :  { %s6566_s23 = smov 0   ;;  %s6568_s24 = smov 0  }
   0x3   :  { %s6570_s25 = smov 0   ;;  %s6572_s26 = smov 0  }
   0x4   :  { %s6574_s27 = smov 0   ;;  %s6576_s28 = smov 0  }
   0x5 LB: > { %s5424_s29 = sadd.s32 4294967295, %s6520_s28   ;;  %s5425_s30 = sadd.s32 4294967294, %s6520_s28   ;;  %s6520_s28 = sphi %s6576_s28, %s19_s28   ;;  %s6516_s27 = sphi %s6574_s27, %s10124_s27   ;;  %s6512_s26 = sphi %s6572_s26, %s10123_s26   ;;  %s6508_s25 = sphi %s6570_s25, %s10122_s25   ;;  %s6504_s24 = sphi %s6568_s24, %s10121_s24   ;;  %s6500_s23 = sphi %s6566_s23, %s10120_s23   ;;  %s6496_s22 = sphi %s6564_s22, %s10119_s22   ;;  %s6492_s21 = sphi %s6562_s21, %s10118_s21  }
   0x6   : > { %s28_s7 = sadd.s32 1, %s6512_s26  ;;  %s31_s8 = sadd.s32 1, %s6516_s27 }
   0x7   : > { %p29_p0 = scmp.ge.s32.totalorder %s28_s7, 2  ;;  %p216_p1 = scmp.ne.s32.totalorder %s6500_s23, %s6496_s22 }
   0x8   : > { %p217_p2 = scmp.eq.s32.totalorder %s5424_s29, 3  ;;  %p222_p5 = scmp.ne.s32.totalorder %s6496_s22, %s6492_s21 }
   0x9   : > { %s10126_s7 = smov (%p29_p0, %s28_s7), 0  ;;  %s10128_s8 = smov (!%p29_p0, %s31_s8), %s6516_s27 }
   0xa   : > { %s202_s9 = ssub.s32 %s6512_s26, %s10126_s7  ;;  %p6613_p3 = por %p217_p2, %p216_p1 }
   0xb   : > { %p33_p4 = scmp.ge.s32.totalorder %s10128_s8, 2  ;;  %p223_p6 = scmp.eq.s32.totalorder %s5425_s30, 3 }
   0xc   : > { %p5428_p7 = scmp.ge.s32.totalorder %s6520_s28, 1  ;;  %p336_p9 = scmp.lt.s32.totalorder %s6520_s28, 5 }
   0xd   : > { %s10130_s8 = smov (%p33_p4, %s10128_s8), 0  ;;  %p6622_p8 = por %p223_p6, %p222_p5 }
   0xe   : > { %s201_s12 = ssub.s32 %s6516_s27, %s10130_s8  ;;  %s206_s13 = sadd.s32 1, %s6500_s23 }
   0xf   : > { %s203_s14 = sor.u32 %s202_s9, %s201_s12  ;;  %p337_p10 = pnand %p5428_p7, %p336_p9 }
  0x10   : > { %p204_p11 = scmp.eq.s32.totalorder %s203_s14, 0 }
  0x11   : > { %340 = sbr.rel (%p337_p10) target bundleno = 1409 (0x581), region = 44 }
  0x12   : > { %s6631_s15 = scalar_select %p204_p11, %s6500_s23, %s206_s13  }
  0x16   : > { %s5429_s16 = sshll.u32 %s6504_s24, 5  ;;  %p425_p12 = scmp.lt.s32.totalorder %s6508_s25, 1  ;;  %v9207_v0 = vlaneseq  ;;  %vm609_vm1 = vcmask 39936   ;;  %v9205_v2 = vmov 0.0   ;;  %vm1666_vm5 = vcmask 80896  }
  0x17   : > { %p427_p13 = scmp.lt.s32.totalorder %s5429_s16, 49  ;;  %s5441_s12 = sshll.u32 %s6504_s24, 8 }
  0x18   : > { %s6636_s17 = scalar_select %p425_p12, %s6508_s25, 1  ;;  %v6639_v1 = vand.u32 127, %v9207_v0 }
  0x19   : > { %s10132_s16 = smov (!%p427_p13, %s5429_s16), 49 }
  0x1a   : > { %9540 = vst [vmem:[#allocation5_spill] sm:$0xff] %v6639_v1  ;;  %s6335_s18 = smul.u32 50, %s6636_s17  ;;  %vm606_vm0 = vcmp.eq.s32.totalorder %v6639_v1, 4  ;;  %s5482_s30 = sshll.u32 %s6636_s17, 4 }
  0x1b   : > { %v6644_v3 = vsel %vm606_vm0, 1.0, %v9205_v2 }
  0x1c   : > { %s430_s19 = sadd.s32 %s6335_s18, %s10132_s16  ;;  %5549 = vmatprep.mubr.msk.f32.mxu1 %vm609_vm1, %v6644_v3  ;;  %s5435_s16 = sshll.u32 %s6504_s24, 1 }
  0x1d   : > { %s6648_s20 = sshll.u32 %s430_s19, 3  ;;  %p477_p0 = scmp.lt.s32.totalorder %s5435_s16, 3 }
  0x1e   : > { %s6654_s9 = scalar_lea.vmem %s9198_s0, %s6648_s20  ;;  %s7303_s14 = scalar_lea.vmem %s9199_s1, %s6648_s20 }
  0x1f   : > { %v528_v4 = vld [vmem:[%s6654_s9 + $0xf8] sm:$0xff]  ;;  %v527_v6 = vld [vmem:[%s6654_s9 + $0xf0] sm:$0xff]  ;;  %v526_v11 = vld [vmem:[%s6654_s9 + $0xe8] sm:$0xff]  ;;  %s10134_s16 = smov (!%p477_p0, %s5435_s16), 3  ;;  %s5436_s18 = sshll.u32 %s6636_s17, 2 }
  0x20   : > { %v512_v5 = vld [vmem:[%s6654_s9 + $0x78] sm:$0xff]  ;;  %v707_v7 = vsel %vm609_vm1, %v528_v4, 0  ;;  %v704_v9 = vsel %vm609_vm1, %v527_v6, 0  ;;  %v511_v10 = vld [vmem:[%s6654_s9 + $0x70] sm:$0xff]  ;;  %v510_v12 = vld [vmem:[%s6654_s9 + $0x68] sm:$0xff]  ;;  %v701_v20 = vsel %vm609_vm1, %v526_v11, 0  ;;  %s8013_s19 = sadd.s32 %s5436_s18, %s10134_s16  ;;  %s8240_s16 = scalar_lea.vmem %s9200_s2, %s6648_s20 }
  0x21   : > { %v659_v8 = vsel %vm609_vm1, %v512_v5, 0  ;;  %v6665_v13 = vand.u32 4294901760, %v707_v7  ;;  %v6669_v15 = vand.u32 4294901760, %v704_v9  ;;  %v656_v16 = vsel %vm609_vm1, %v511_v10, 0  ;;  %v525_v17 = vld [vmem:[%s6654_s9 + $0xe0] sm:$0xff]  ;;  %v524_v23 = vld [vmem:[%s6654_s9 + $0xd8] sm:$0xff]  ;;  %s490_s29 = scalar_lea.vmem %s9202_s4, %s8013_s19 }
  0x22   : > { %v6667_v14 = vand.u32 4294901760, %v659_v8  ;;  %v509_v18 = vld [vmem:[%s6654_s9 + $0x60] sm:$0xff]  ;;  %v6674_v19 = vand.u32 4294901760, %v656_v16  ;;  %v653_v21 = vsel %vm609_vm1, %v510_v12, 0  ;;  %v698_v22 = vsel %vm609_vm1, %v525_v17, 0  ;;  %v508_v31 = vld [vmem:[%s6654_s9 + $0x58] sm:$0xff] }
  0x23   : > { %9541 = vst [vmem:[#allocation6_spill] sm:$0xff] %v6665_v13  ;;  %9543 = vst [vmem:[#allocation8_spill] sm:$0xff] %v6669_v15  ;;  %5483 = vmatprep.subr.mxu0 %v6665_v13  ;;  %v6681_v24 = vand.u32 4294901760, %v701_v20  ;;  %v6684_v25 = vsub.f32 %v707_v7, %v6665_v13  ;;  %v6686_v26 = vand.u32 4294901760, %v653_v21  ;;  %v6693_v28 = vsub.f32 %v704_v9, %v6669_v15  ;;  %v523_v40 = vld [vmem:[%s6654_s9 + $0xd0] sm:$0xff]  ;;  %v522_v54 = vld [vmem:[%s6654_s9 + $0xc8] sm:$0xff] }
  0x24   : > { %9542 = vst [vmem:[#allocation7_spill] sm:$0xff] %v6667_v14  ;;  %9544 = vst [vmem:[#allocation9_spill] sm:$0xff] %v6674_v19  ;;  %v6689_v27 = vsub.f32 %v659_v8, %v6667_v14  ;;  %5484 = vmatpush3.xpose.msra.mxu0 %v6667_v14  ;;  %v650_v29 = vsel %vm609_vm1, %v509_v18, 0  ;;  %v6697_v30 = vsub.f32 %v656_v16, %v6674_v19  ;;  %v6707_v34 = vand.u32 4294901760, %v698_v22  ;;  %v507_v49 = vld [vmem:[%s6654_s9 + $0x50] sm:$0xff]  ;;  %v506_v62 = vld [vmem:[%s6654_s9 + $0x48] sm:$0xff] }
  0x25   : > { %9545 = vst [vmem:[#allocation10_spill] sm:$0xff] %v6681_v24  ;;  %9546 = vst [vmem:[#allocation11_spill] sm:$0xff] %v6684_v25  ;;  %5485 = vmatprep.subr.mxu0 %v6669_v15  ;;  %v6702_v32 = vand.u32 4294901760, %v6684_v25  ;;  %v695_v35 = vsel %vm609_vm1, %v524_v23, 0  ;;  %v6711_v36 = vand.u32 4294901760, %v6693_v28  ;;  %v6713_v37 = vand.u32 4294901760, %v650_v29 }
  0x26   : > { %9547 = vst [vmem:[#allocation12_spill] sm:$0xff] %v6686_v26  ;;  %9548 = vst [vmem:[#allocation13_spill] sm:$0xff] %v6689_v27  ;;  %v6705_v33 = vand.u32 4294901760, %v6689_v27  ;;  %v6716_v38 = vand.u32 4294901760, %v6697_v30  ;;  %v6719_v39 = vsub.f32 %v701_v20, %v6681_v24  ;;  %v647_v43 = vsel %vm609_vm1, %v508_v31, 0  ;;  %v521_v63 = vld [vmem:[%s6654_s9 + $0xc0] sm:$0xff] }
  0x27   : > { %9549 = vst [vmem:[#allocation14_spill] sm:$0xff] %v6693_v28  ;;  %9550 = vst [vmem:[#allocation15_spill] sm:$0xff] %v6697_v30  ;;  %v933_v41 = vsub.f32 %v6684_v25, %v6702_v32  ;;  %v6728_v44 = vsub.f32 %v653_v21, %v6686_v26  ;;  %v940_v45 = vsub.f32 %v6693_v28, %v6711_v36  ;;  %v6735_v47 = vand.u32 4294901760, %v695_v35  ;;  %v505_v20 = vld [vmem:[%s6654_s9 + $0x40] sm:$0xff]  ;;  %v520_v31 = vld [vmem:[%s6654_s9 + $0xb8] sm:$0xff] }
  0x28   : > { %9551 = vst [vmem:[#allocation16_spill] sm:$0xff] %v6702_v32  ;;  %9552 = vst [vmem:[#allocation17_spill] sm:$0xff] %v6705_v33  ;;  %v821_v42 = vsub.f32 %v6689_v27, %v6705_v33  ;;  %5486 = vmatpush3.xpose.msra.mxu0 %v6674_v19  ;;  %v828_v46 = vsub.f32 %v6697_v30, %v6716_v38  ;;  %v6738_v48 = vand.u32 4294901760, %v6719_v39  ;;  %v692_v53 = vsel %vm609_vm1, %v523_v40, 0  ;;  %v503_v0 = vld [vmem:[%s6654_s9 + $0x30] sm:$0xff]  ;;  %v500_v33 = vld [vmem:[%s6654_s9 + $0x18] sm:$0xff] }
  0x29   : > { %9553 = vst [vmem:[#allocation18_spill] sm:$0xff] %v6707_v34  ;;  %9554 = vst [vmem:[#allocation19_spill] sm:$0xff] %v6711_v36  ;;  %5487 = vmatprep.subr.mxu0 %v6681_v24  ;;  %v6742_v50 = vand.u32 4294901760, %v933_v41  ;;  %v6747_v52 = vand.u32 4294901760, %v6728_v44  ;;  %v6751_v55 = vand.u32 4294901760, %v940_v45  ;;  %v6755_v57 = vand.u32 4294901760, %v647_v43 }
  0x2a   : > { %9555 = vst [vmem:[#allocation20_spill] sm:$0xff] %v6713_v37  ;;  %9556 = vst [vmem:[#allocation21_spill] sm:$0xff] %v6716_v38  ;;  %v6744_v51 = vand.u32 4294901760, %v821_v42  ;;  %v947_v56 = vsub.f32 %v6719_v39, %v6738_v48  ;;  %v6761_v59 = vsub.f32 %v698_v22, %v6707_v34  ;;  %v644_v60 = vsel %vm609_vm1, %v507_v49, 0 }
  0x2b   : > { %9557 = vst [vmem:[#allocation22_spill] sm:$0xff] %v6719_v39  ;;  %9558 = vst [vmem:[#allocation23_spill] sm:$0xff] %v6728_v44  ;;  %5517 = vmatprep.subr.mxu1 %v6742_v50  ;;  %v835_v58 = vsub.f32 %v6728_v44, %v6747_v52  ;;  %v6765_v61 = vsub.f32 %v650_v29, %v6713_v37  ;;  %v6771_v4 = vand.u32 4294901760, %v828_v46  ;;  %v6773_v5 = vand.u32 4294901760, %v692_v53 }
  0x2c   : > { %9559 = vst [vmem:[#allocation24_spill] sm:$0xff] %v6735_v47  ;;  %9560 = vst [vmem:[#allocation25_spill] sm:$0xff] %v6738_v48  ;;  %5488 = vmatpush3.xpose.msra.mxu0 %v6686_v26  ;;  %5518 = vmatpush3.xpose.msra.mxu1 %v6744_v51  ;;  %v689_v6 = vsel %vm609_vm1, %v522_v54, 0  ;;  %v6777_v7 = vsub.f32 %v695_v35, %v6735_v47  ;;  %v6781_v8 = vand.u32 4294901760, %v947_v56  ;;  %v6784_v9 = vand.u32 4294901760, %v6761_v59  ;;  %v504_v56 = vld [vmem:[%s6654_s9 + $0x38] sm:$0xff] }
  0x2d   : > { %9561 = vst [vmem:[#allocation26_spill] sm:$0xff] %v6742_v50  ;;  %9562 = vst [vmem:[#allocation27_spill] sm:$0xff] %v6744_v51  ;;  %5489 = vmatprep.subr.mxu0 %v6707_v34  ;;  %5519 = vmatprep.subr.mxu1 %v6751_v55  ;;  %v6786_v10 = vand.u32 4294901760, %v644_v60  ;;  %v6789_v11 = vand.u32 4294901760, %v6765_v61  ;;  %v641_v16 = vsel %vm609_vm1, %v506_v62, 0  ;;  %v6796_v17 = vsub.f32 %v647_v43, %v6755_v57 }
  0x2e   : > { %9563 = vst [vmem:[#allocation28_spill] sm:$0xff] %v6747_v52  ;;  %9564 = vst [vmem:[#allocation29_spill] sm:$0xff] %v6751_v55  ;;  %v6792_v12 = vand.u32 4294901760, %v6777_v7  ;;  %v686_v18 = vsel %vm609_vm1, %v521_v63, 0  ;;  %v6800_v21 = vand.u32 4294901760, %v835_v58  ;;  %v954_v22 = vsub.f32 %v6761_v59, %v6784_v9 }
  0x2f   : > { %9565 = vst [vmem:[#allocation30_spill] sm:$0xff] %v6755_v57  ;;  %9566 = vst [vmem:[#allocation31_spill] sm:$0xff] %v6761_v59  ;;  %v842_v23 = vsub.f32 %v6765_v61, %v6789_v11  ;;  %v6806_v29 = vand.u32 4294901760, %v689_v6  ;;  %v6813_v40 = vand.u32 4294901760, %v641_v16  ;;  %v6816_v41 = vand.u32 4294901760, %v6796_v17 }
  0x30   : > { %9567 = vst [vmem:[#allocation32_spill] sm:$0xff] %v6765_v61  ;;  %9568 = vst [vmem:[#allocation33_spill] sm:$0xff] %v6771_v4  ;;  %5490 = vmatpush3.xpose.msra.mxu0 %v6713_v37  ;;  %5520 = vmatpush3.xpose.msra.mxu1 %v6771_v4  ;;  %v961_v35 = vsub.f32 %v6777_v7, %v6792_v12  ;;  %v6819_v42 = vsub.f32 %v692_v53, %v6773_v5  ;;  %v6823_v43 = vand.u32 4294901760, %v954_v22  ;;  %v518_v4 = vld [vmem:[%s6654_s9 + $0xa8] sm:$0xff] }
  0x31   : > { %9569 = vst [vmem:[#allocation34_spill] sm:$0xff] %v6773_v5  ;;  %9570 = vst [vmem:[#allocation35_spill] sm:$0xff] %v6777_v7  ;;  %5491 = vmatprep.subr.mxu0 %v6735_v47  ;;  %5521 = vmatprep.subr.mxu1 %v6781_v8  ;;  %v6825_v45 = vand.u32 4294901760, %v686_v18  ;;  %v638_v46 = vsel %vm609_vm1, %v505_v20, 0  ;;  %v6829_v49 = vsub.f32 %v644_v60, %v6786_v10  ;;  %v683_v53 = vsel %vm609_vm1, %v520_v31, 0  ;;  %v519_v60 = vld [vmem:[%s6654_s9 + $0xb0] sm:$0xff] }
  0x32   : > { %9571 = vst [vmem:[#allocation36_spill] sm:$0xff] %v6781_v8  ;;  %9572 = vst [vmem:[#allocation37_spill] sm:$0xff] %v6784_v9  ;;  %v6832_v54 = vand.u32 4294901760, %v6819_v42  ;;  %v6836_v58 = vand.u32 4294901760, %v842_v23  ;;  %v849_v62 = vsub.f32 %v6796_v17, %v6816_v41  ;;  %v6844_v20 = vsub.f32 %v689_v6, %v6806_v29  ;;  %v501_v9 = vld [vmem:[%s6654_s9 + $0x20] sm:$0xff] }
  0x33   : > { %9573 = vst [vmem:[#allocation38_spill] sm:$0xff] %v6786_v10  ;;  %9574 = vst [vmem:[#allocation39_spill] sm:$0xff] %v6789_v11  ;;  %v6841_v63 = vand.u32 4294901760, %v6829_v49  ;;  %v6849_v22 = vand.u32 4294901760, %v961_v35  ;;  %v6851_v31 = vand.u32 4294901760, %v638_v46  ;;  %v6853_v23 = vand.u32 4294901760, %v683_v53 }
  0x34   : > { %9575 = vst [vmem:[#allocation40_spill] sm:$0xff] %v6792_v12  ;;  %9576 = vst [vmem:[#allocation41_spill] sm:$0xff] %v6796_v17  ;;  %5492 = vmatpush3.xpose.msra.mxu0 %v6755_v57  ;;  %5522 = vmatpush3.xpose.msra.mxu1 %v6800_v21  ;;  %v6856_v2 = vsub.f32 %v641_v16, %v6813_v40  ;;  %v968_v6 = vsub.f32 %v6819_v42, %v6832_v54  ;;  %v6864_v8 = vand.u32 4294901760, %v6844_v20 }
  0x35   : > { %9577 = vst [vmem:[#allocation42_spill] sm:$0xff] %v6800_v21  ;;  %9578 = vst [vmem:[#allocation43_spill] sm:$0xff] %v6806_v29  ;;  %5493 = vmatprep.subr.mxu0 %v6773_v5  ;;  %5523 = vmatprep.subr.mxu1 %v6823_v43  ;;  %v635_v35 = vsel %vm609_vm1, %v504_v56, 0  ;;  %v6868_v21 = vsub.f32 %v686_v18, %v6825_v45  ;;  %v680_v16 = vsel %vm609_vm1, %v519_v60, 0  ;;  %v6872_v55 = vand.u32 4294901760, %v849_v62 }
  0x36   : > { %9579 = vst [vmem:[#allocation44_spill] sm:$0xff] %v6813_v40  ;;  %9580 = vst [vmem:[#allocation45_spill] sm:$0xff] %v6816_v41  ;;  %v6877_v51 = vand.u32 4294901760, %v6856_v2  ;;  %v632_v50 = vsel %vm609_vm1, %v503_v0, 0  ;;  %v975_v18 = vsub.f32 %v6844_v20, %v6864_v8  ;;  %v6884_v56 = vand.u32 4294901760, %v635_v35 }
  0x37   : > { %9581 = vst [vmem:[#allocation46_spill] sm:$0xff] %v6819_v42  ;;  %9582 = vst [vmem:[#allocation47_spill] sm:$0xff] %v6823_v43  ;;  %v856_v43 = vsub.f32 %v6829_v49, %v6841_v63  ;;  %v6887_v62 = vsub.f32 %v638_v46, %v6851_v31  ;;  %v677_v60 = vsel %vm609_vm1, %v518_v4, 0  ;;  %v6892_v1 = vand.u32 4294901760, %v968_v6  ;;  %v517_v46 = vld [vmem:[%s6654_s9 + $0xa0] sm:$0xff] }
  0x38   : > { %9583 = vst [vmem:[#allocation48_spill] sm:$0xff] %v6825_v45  ;;  %9584 = vst [vmem:[#allocation49_spill] sm:$0xff] %v6829_v49  ;;  %5494 = vmatpush3.xpose.msra.mxu0 %v6786_v10  ;;  %5524 = vmatpush3.xpose.msra.mxu1 %v6836_v58  ;;  %v6894_v0 = vand.u32 4294901760, %v680_v16  ;;  %v6910_v6 = vand.u32 4294901760, %v677_v60  ;;  %v6914_v41 = vand.u32 4294901760, %v975_v18  ;;  %v674_v18 = vsel %vm609_vm1, %v517_v46, 0 }
  0x39   : > { %9585 = vst [vmem:[#allocation50_spill] sm:$0xff] %v6832_v54  ;;  %9586 = vst [vmem:[#allocation51_spill] sm:$0xff] %v6836_v58  ;;  %5495 = vmatprep.subr.mxu0 %v6806_v29  ;;  %5525 = vmatprep.subr.mxu1 %v6849_v22  ;;  %v6897_v58 = vand.u32 4294901760, %v6868_v21  ;;  %v6903_v54 = vand.u32 4294901760, %v632_v50  ;;  %v6906_v4 = vand.u32 4294901760, %v856_v43  ;;  %v6921_v43 = vsub.f32 %v635_v35, %v6884_v56 }
  0x3a   : > { %9587 = vst [vmem:[#allocation52_spill] sm:$0xff] %v6841_v63  ;;  %9588 = vst [vmem:[#allocation53_spill] sm:$0xff] %v6844_v20  ;;  %v502_v63 = vld [vmem:[%s6654_s9 + $0x28] sm:$0xff]  ;;  %v611_v48 = vsel %vm609_vm1, %v6644_v3, 0  ;;  %v626_v46 = vsel %vm609_vm1, %v501_v9, 0 }
  0x3b   : > { %9589 = vst [vmem:[#allocation54_spill] sm:$0xff] %v6849_v22  ;;  %9590 = vst [vmem:[#allocation55_spill] sm:$0xff] %v6851_v31  ;;  %v863_v22 = vsub.f32 %v6856_v2, %v6877_v51  ;;  %v629_v12 = vsel %vm609_vm1, %v502_v63, 0  ;;  %v6936_v63 = vsub.f32 %v632_v50, %v6903_v54  ;;  %v6972_v32 = vsub.f32 %v611_v48, %v611_v48 }
  0x3c   : > { %9591 = vst [vmem:[#allocation56_spill] sm:$0xff] %v6853_v23  ;;  %9592 = vst [vmem:[#allocation57_spill] sm:$0xff] %v6856_v2  ;;  %5496 = vmatpush3.xpose.msra.mxu0 %v6813_v40  ;;  %5526 = vmatpush3.xpose.msra.mxu1 %v6872_v55  ;;  %v6940_v52 = vand.u32 4294901760, %v629_v12  ;;  %v6974_v9 = vand.u32 4294901760, %v626_v46 }
  0x3d   : > { %9593 = vst [vmem:[#allocation58_spill] sm:$0xff] %v6864_v8  ;;  %9594 = vst [vmem:[#allocation59_spill] sm:$0xff] %v6868_v21  ;;  %v6900_v8 = vsub.f32 %v683_v53, %v6853_v23  ;;  %v6917_v53 = vand.u32 4294901760, %v6887_v62  ;;  %5497 = vmatprep.subr.mxu0 %v6825_v45  ;;  %5527 = vmatprep.subr.mxu1 %v6892_v1  ;;  %v6938_v35 = vand.u32 4294901760, %v863_v22  ;;  %v6953_v22 = vand.u32 4294901760, %v6921_v43 }
  0x3e   : > { %9595 = vst [vmem:[#allocation60_spill] sm:$0xff] %v6872_v55  ;;  %9596 = vst [vmem:[#allocation61_spill] sm:$0xff] %v6877_v51  ;;  %v982_v51 = vsub.f32 %v6868_v21, %v6897_v58  ;;  %v6932_v55 = vsub.f32 %v680_v16, %v6894_v0  ;;  %v6955_v16 = vand.u32 4294901760, %v674_v18  ;;  %v7006_v45 = vand.u32 4294901760, %v6972_v32 }
  0x3f   : > { %9597 = vst [vmem:[#allocation62_spill] sm:$0xff] %v6884_v56  ;;  %9598 = vst [vmem:[#allocation63_spill] sm:$0xff] %v6887_v62  ;;  %v6928_v11 = vand.u32 4294901760, %v6900_v8  ;;  %v870_v50 = vsub.f32 %v6887_v62, %v6917_v53 }
  0x40   : > { %9599 = vst [vmem:[#allocation64_spill] sm:$0xff] %v6892_v1  ;;  %9600 = vst [vmem:[#allocation65_spill] sm:$0xff] %v6894_v0  ;;  %v516_v1 = vld [vmem:[%s6654_s9 + $0x98] sm:$0xff]  ;;  %5498 = vmatpush3.xpose.msra.mxu0 %v6851_v31  ;;  %5528 = vmatpush3.xpose.msra.mxu1 %v6906_v4  ;;  %v6965_v38 = vand.u32 4294901760, %v6932_v55  ;;  %v6990_v48 = vsub.f32 %v674_v18, %v6955_v16 }
  0x41   : > { %9601 = vst [vmem:[#allocation66_spill] sm:$0xff] %v6897_v58  ;;  %9602 = vst [vmem:[#allocation67_spill] sm:$0xff] %v6900_v8  ;;  %v6944_v58 = vsub.f32 %v677_v60, %v6910_v6  ;;  %5499 = vmatprep.subr.mxu0 %v6853_v23  ;;  %5529 = vmatprep.subr.mxu1 %v6914_v41  ;;  %v6960_v60 = vand.u32 4294901760, %v982_v51  ;;  %v671_v36 = vsel %vm609_vm1, %v516_v1, 0  ;;  %v6985_v23 = vand.u32 4294901760, %v870_v50 }
  0x42   : > { %9603 = vst [vmem:[#allocation68_spill] sm:$0xff] %v6903_v54  ;;  %9604 = vst [vmem:[#allocation69_spill] sm:$0xff] %v6906_v4  ;;  %v989_v4 = vsub.f32 %v6900_v8, %v6928_v11  ;;  %v877_v1 = vsub.f32 %v6921_v43, %v6953_v22  ;;  %v6998_v31 = vand.u32 4294901760, %v671_v36  ;;  %v623_v50 = vsel %vm609_vm1, %v500_v33, 0  ;;  %v514_v33 = vld [vmem:[%s6654_s9 + $0x88] sm:$0xff] }
  0x43   : > { %9605 = vst [vmem:[#allocation70_spill] sm:$0xff] %v6910_v6  ;;  %9606 = vst [vmem:[#allocation71_spill] sm:$0xff] %v6914_v41  ;;  %v6977_v51 = vand.u32 4294901760, %v6944_v58  ;;  %v6980_v41 = vsub.f32 %v629_v12, %v6940_v52 }
  0x44   : > { %9607 = vst [vmem:[#allocation72_spill] sm:$0xff] %v6917_v53  ;;  %9608 = vst [vmem:[#allocation73_spill] sm:$0xff] %v6921_v43  ;;  %v6968_v53 = vand.u32 4294901760, %v6936_v63  ;;  %5500 = vmatpush3.xpose.msra.mxu0 %v6884_v56  ;;  %5530 = vmatpush3.xpose.msra.mxu1 %v6938_v35  ;;  %v6994_v12 = vand.u32 4294901760, %v989_v4  ;;  %v996_v56 = vsub.f32 %v6932_v55, %v6965_v38 }
  0x45   : > { %9609 = vst [vmem:[#allocation74_spill] sm:$0xff] %v6928_v11  ;;  %9610 = vst [vmem:[#allocation75_spill] sm:$0xff] %v6932_v55  ;;  %v515_v11 = vld [vmem:[%s6654_s9 + $0x90] sm:$0xff]  ;;  %5501 = vmatprep.subr.mxu0 %v6894_v0  ;;  %5531 = vmatprep.subr.mxu1 %v6960_v60  ;;  %v1003_v4 = vsub.f32 %v6944_v58, %v6977_v51  ;;  %v7024_v0 = vand.u32 4294901760, %v6990_v48  ;;  %v513_v55 = vld [vmem:[%s6654_s9 + $0x80] sm:$0xff] }
  0x46   : > { %9611 = vst [vmem:[#allocation76_spill] sm:$0xff] %v6936_v63  ;;  %9612 = vst [vmem:[#allocation77_spill] sm:$0xff] %v6938_v35  ;;  %v499_v35 = vld [vmem:[%s6654_s9 + $0x10] sm:$0xff]  ;;  %v668_v18 = vsel %vm609_vm1, %v515_v11, 0  ;;  %v7019_v11 = vand.u32 4294901760, %v877_v1  ;;  %v498_v1 = vld [vmem:[%s6654_s9 + $0x8] sm:$0xff] }
  0x47   : > { %9613 = vst [vmem:[#allocation78_spill] sm:$0xff] %v6940_v52  ;;  %9614 = vst [vmem:[#allocation79_spill] sm:$0xff] %v6944_v58  ;;  %v7031_v58 = vand.u32 4294901760, %v668_v18  ;;  %v7043_v40 = vand.u32 4294901760, %v1003_v4 }
  0x48   : > { %9615 = vst [vmem:[#allocation80_spill] sm:$0xff] %v6953_v22  ;;  %9616 = vst [vmem:[#allocation81_spill] sm:$0xff] %v6955_v16  ;;  %v884_v22 = vsub.f32 %v6936_v63, %v6968_v53  ;;  %5502 = vmatpush3.xpose.msra.mxu0 %v6903_v54  ;;  %5532 = vmatpush3.xpose.msra.mxu1 %v6985_v23  ;;  %v7034_v54 = vsub.f32 %v671_v36, %v6998_v31  ;;  %v665_v63 = vsel %vm609_vm1, %v514_v33, 0 }
  0x49   : > { %9617 = vst [vmem:[#allocation82_spill] sm:$0xff] %v6960_v60  ;;  %9618 = vst [vmem:[#allocation83_spill] sm:$0xff] %v6965_v38  ;;  %v7011_v60 = vand.u32 4294901760, %v6980_v41  ;;  %v7014_v38 = vsub.f32 %v626_v46, %v6974_v9  ;;  %5503 = vmatprep.subr.mxu0 %v6910_v6  ;;  %5533 = vmatprep.subr.mxu1 %v6994_v12  ;;  %v7029_v46 = vand.u32 4294901760, %v996_v56  ;;  %v617_v33 = vsel %vm609_vm1, %v498_v1, 0  ;;  %v497_v1 = vld [vmem:[%s6654_s9] sm:$0xff]  ;;  %s8021_s9 = scalar_lea.vmem %s9201_s3, %s8013_s19 }
  0x4a   : > { %9619 = vst [vmem:[#allocation84_spill] sm:$0xff] %v6968_v53  ;;  %9620 = vst [vmem:[#allocation85_spill] sm:$0xff] %v6974_v9  ;;  %v7021_v53 = vand.u32 4294901760, %v623_v50 }
  0x4b   : > { %9621 = vst [vmem:[#allocation86_spill] sm:$0xff] %v6977_v51  ;;  %9622 = vst [vmem:[#allocation87_spill] sm:$0xff] %v6980_v41  ;;  %v620_v51 = vsel %vm609_vm1, %v499_v35, 0  ;;  %v809_v35 = vsub.f32 %v6972_v32, %v7006_v45  ;;  %v891_v56 = vsub.f32 %v6980_v41, %v7011_v60  ;;  %v7050_v36 = vand.u32 4294901760, %v7014_v38 }
  0x4c   : > { %9623 = vst [vmem:[#allocation88_spill] sm:$0xff] %v6985_v23  ;;  %9624 = vst [vmem:[#allocation89_spill] sm:$0xff] %v6990_v48  ;;  %v7037_v23 = vand.u32 4294901760, %v884_v22  ;;  %5504 = vmatpush3.xpose.msra.mxu0 %v6940_v52  ;;  %5534 = vmatpush3.xpose.msra.mxu1 %v7019_v11  ;;  %v1010_v22 = vsub.f32 %v6990_v48, %v7024_v0  ;;  %v7058_v4 = vsub.f32 %v623_v50, %v7021_v53 }
  0x4d   : > { %9625 = vst [vmem:[#allocation90_spill] sm:$0xff] %v6994_v12  ;;  %9626 = vst [vmem:[#allocation91_spill] sm:$0xff] %v6998_v31  ;;  %v7047_v12 = vand.u32 4294901760, %v620_v51  ;;  %v7060_v6 = vand.u32 4294901760, %v809_v35  ;;  %5505 = vmatprep.subr.mxu0 %v6955_v16  ;;  %5535 = vmatprep.subr.mxu1 %v7029_v46  ;;  %v7067_v52 = vand.u32 4294901760, %v7034_v54  ;;  %v7075_v50 = vand.u32 4294901760, %v891_v56 }
  0x4e   : > { %9627 = vst [vmem:[#allocation92_spill] sm:$0xff] %v7011_v60  ;;  %9628 = vst [vmem:[#allocation93_spill] sm:$0xff] %v7014_v38  ;;  %v7064_v60 = vand.u32 4294901760, %v665_v63  ;;  %v898_v35 = vsub.f32 %v7014_v38, %v7050_v36  ;;  %v7079_v16 = vand.u32 4294901760, %v617_v33 }
  0x4f   : > { %9629 = vst [vmem:[#allocation94_spill] sm:$0xff] %v7019_v11  ;;  %9630 = vst [vmem:[#allocation95_spill] sm:$0xff] %v7021_v53  ;;  %v662_v11 = vsel %vm609_vm1, %v513_v55, 0  ;;  %5515 = vmatprep.mubr.f32.mxu0 %v7060_v6  ;;  %v7086_v55 = vand.u32 4294901760, %v7058_v4  ;;  %v7091_v48 = vsub.f32 %v620_v51, %v7047_v12  ;;  %v1017_v56 = vsub.f32 %v7034_v54, %v7067_v52 }
  0x50   : > { %9631 = vst [vmem:[#allocation96_spill] sm:$0xff] %v7024_v0  ;;  %9632 = vst [vmem:[#allocation97_spill] sm:$0xff] %v7029_v46  ;;  %v7071_v0 = vsub.f32 %v668_v18, %v7031_v58  ;;  %5506 = vmatpush3.xpose.msra.mxu0 %v6974_v9  ;;  %5536 = vmatpush3.xpose.msra.mxu1 %v7037_v23  ;;  %v7083_v46 = vand.u32 4294901760, %v1010_v22  ;;  %v7088_v18 = vand.u32 4294901760, %v662_v11  ;;  %v614_v22 = vsel %vm609_vm1, %v497_v1, 0 }
  0x51   : > { %9633 = vst [vmem:[#allocation98_spill] sm:$0xff] %v7031_v58  ;;  %9634 = vst [vmem:[#allocation99_spill] sm:$0xff] %v7034_v54  ;;  %5507 = vmatprep.subr.mxu0 %v6998_v31  ;;  %5537 = vmatprep.subr.mxu1 %v7043_v40  ;;  %v7104_v9 = vand.u32 4294901760, %v898_v35  ;;  %v905_v51 = vsub.f32 %v7058_v4, %v7086_v55  ;;  %v7116_v31 = vsub.f32 %v617_v33, %v7079_v16 }
  0x52   : > { %9635 = vst [vmem:[#allocation100_spill] sm:$0xff] %v7037_v23  ;;  %9636 = vst [vmem:[#allocation101_spill] sm:$0xff] %v7043_v40  ;;  %v7102_v23 = vsub.f32 %v665_v63, %v7064_v60  ;;  %v7110_v40 = vand.u32 4294901760, %v614_v22  ;;  %v7120_v63 = vand.u32 4294901760, %v1017_v56 }
  0x53   : > { %9637 = vst [vmem:[#allocation102_spill] sm:$0xff] %v7047_v12  ;;  %9638 = vst [vmem:[#allocation103_spill] sm:$0xff] %v7050_v36  ;;  %v7098_v36 = vand.u32 4294901760, %v7071_v0  ;;  %v7132_v33 = vand.u32 4294901760, %v905_v51  ;;  %v7137_v56 = vand.u32 4294901760, %v7116_v31 }
  0x54   : > { %9639 = vst [vmem:[#allocation104_spill] sm:$0xff] %v7058_v4  ;;  %9640 = vst [vmem:[#allocation105_spill] sm:$0xff] %v7064_v60  ;;  %5508 = vmatpush3.xpose.msra.mxu0 %v7021_v53  ;;  %5538 = vmatpush3.xpose.msra.mxu1 %v7075_v50  ;;  %v7125_v35 = vand.u32 4294901760, %v7102_v23 }
  0x55   : > { %9641 = vst [vmem:[#allocation106_spill] sm:$0xff] %v7067_v52  ;;  %9642 = vst [vmem:[#allocation107_spill] sm:$0xff] %v7071_v0  ;;  %v7113_v52 = vand.u32 4294901760, %v7091_v48  ;;  %5509 = vmatprep.subr.mxu0 %v7031_v58  ;;  %5539 = vmatprep.subr.mxu1 %v7083_v46  ;;  %v1024_v1 = vsub.f32 %v7071_v0, %v7098_v36 }
  0x56   : > { %9643 = vst [vmem:[#allocation108_spill] sm:$0xff] %v7075_v50  ;;  %9644 = vst [vmem:[#allocation109_spill] sm:$0xff] %v7079_v16  ;;  %v7128_v50 = vsub.f32 %v662_v11, %v7088_v18 }
  0x57   : > { %9645 = vst [vmem:[#allocation110_spill] sm:$0xff] %v7083_v46  ;;  %9646 = vst [vmem:[#allocation111_spill] sm:$0xff] %v7086_v55  ;;  %v912_v46 = vsub.f32 %v7091_v48, %v7113_v52  ;;  %v7144_v11 = vand.u32 4294901760, %v1024_v1 }
  0x58   : > { %9647 = vst [vmem:[#allocation112_spill] sm:$0xff] %v7088_v18  ;;  %9648 = vst [vmem:[#allocation113_spill] sm:$0xff] %v7091_v48  ;;  %5510 = vmatpush3.xpose.msra.mxu0 %v7047_v12  ;;  %5540 = vmatpush3.xpose.msra.mxu1 %v7104_v9  ;;  %v7149_v51 = vand.u32 4294901760, %v7128_v50 }
  0x59   : > { %9649 = vst [vmem:[#allocation114_spill] sm:$0xff] %v7098_v36  ;;  %9650 = vst [vmem:[#allocation115_spill] sm:$0xff] %v7102_v23  ;;  %v7140_v36 = vsub.f32 %v614_v22, %v7110_v40  ;;  %5511 = vmatprep.subr.mxu0 %v7064_v60  ;;  %5541 = vmatprep.subr.mxu1 %v7120_v63  ;;  %v919_v22 = vsub.f32 %v7116_v31, %v7137_v56 }
  0x5a   : > { %9651 = vst [vmem:[#allocation116_spill] sm:$0xff] %v7104_v9  ;;  %9652 = vst [vmem:[#allocation117_spill] sm:$0xff] %v7110_v40  ;;  %v1031_v9 = vsub.f32 %v7102_v23, %v7125_v35 }
  0x5b   : > { %9653 = vst [vmem:[#allocation118_spill] sm:$0xff] %v7113_v52  ;;  %9654 = vst [vmem:[#allocation119_spill] sm:$0xff] %v7116_v31  ;;  %v7153_v52 = vand.u32 4294901760, %v912_v46  ;;  %v7158_v55 = vand.u32 4294901760, %v7140_v36  ;;  %v7168_v46 = vand.u32 4294901760, %v919_v22  ;;  %v9672_v22 = vld [vmem:[#allocation76_spill] sm:$0xff] }
  0x5c   : > { %9655 = vst [vmem:[#allocation120_spill] sm:$0xff] %v7120_v63  ;;  %9656 = vst [vmem:[#allocation121_spill] sm:$0xff] %v7125_v35  ;;  %5512 = vmatpush3.xpose.msra.mxu0 %v7079_v16  ;;  %5542 = vmatpush3.xpose.msra.mxu1 %v7132_v33  ;;  %v7162_v1 = vand.u32 4294901760, %v1031_v9  ;;  %v1038_v63 = vsub.f32 %v7128_v50, %v7149_v51 }
  0x5d   : > { %9657 = vst [vmem:[#allocation122_spill] sm:$0xff] %v7128_v50  ;;  %9658 = vst [vmem:[#allocation123_spill] sm:$0xff] %v7132_v33  ;;  %5513 = vmatprep.subr.mxu0 %v7088_v18  ;;  %5543 = vmatprep.subr.mxu1 %v7144_v11  ;;  %v926_v33 = vsub.f32 %v7140_v36, %v7158_v55 }
  0x5e   : > { %9659 = vst [vmem:[#allocation124_spill] sm:$0xff] %v7137_v56  ;;  %9660 = vst [vmem:[#allocation125_spill] sm:$0xff] %v7140_v36  ;;  %v7174_v56 = vand.u32 4294901760, %v1038_v63  ;;  %v9670_v63 = vld [vmem:[#allocation75_spill] sm:$0xff] }
  0x5f   : > { %9661 = vst [vmem:[#allocation126_spill] sm:$0xff] %v7144_v11  ;;  %9662 = vst [vmem:[#allocation127_spill] sm:$0xff] %v7149_v51  ;;  %v7179_v9 = vand.u32 4294901760, %v926_v33  ;;  %v9671_v33 = vld [vmem:[#allocation48_spill] sm:$0xff] }
  0x60   : > { %9663 = vst [vmem:[#allocation128_spill] sm:$0xff] %v7153_v52  ;;  %9664 = vst [vmem:[#allocation129_spill] sm:$0xff] %v7158_v55  ;;  %5514 = vmatpush3.xpose.msra.mxu0 %v7110_v40  ;;  %5544 = vmatpush3.xpose.msra.mxu1 %v7153_v52 }
  0x61   : > { %9665 = vst [vmem:[#allocation130_spill] sm:$0xff] %v7162_v1  ;;  %9666 = vst [vmem:[#allocation131_spill] sm:$0xff] %v7168_v46  ;;  %5545 = vmatprep.subr.mxu1 %v7162_v1  ;;  %5551 = vmatprep.subr.mxu0 %v6684_v25 }
  0x62   : > { %9667 = vst [vmem:[#allocation132_spill] sm:$0xff] %v7174_v56  ;;  %9668 = vst [vmem:[#allocation133_spill] sm:$0xff] %v7179_v9 }
  0x63   : > { %5516 = vmatmul.mubr.f32.vlgmr.msra.gmra.mxu0 %v7060_v6  ;;  %v9669_v6 = vld [vmem:[#allocation44_spill] sm:$0xff] }
  0x64   : > { %5546 = vmatpush3.xpose.msra.mxu1 %v7168_v46  ;;  %5552 = vmatpush3.xpose.msra.mxu0 %v6689_v27 }
  0x65   : > { %5547 = vmatprep.subr.mxu1 %v7174_v56  ;;  %5553 = vmatprep.subr.mxu0 %v6693_v28 }
  0x66   : > { %5583 = vmatprep.mubr.f32.mxu0 %v6972_v32 }
  0x68   : > { %5548 = vmatpush3.xpose.msra.mxu1 %v7179_v9  ;;  %5554 = vmatpush3.xpose.msra.mxu0 %v6697_v30 }
  0x69   : > { %5555 = vmatprep.subr.mxu0 %v6719_v39  ;;  %5585 = vmatprep.subr.mxu1 %v6665_v13 }
  0x6b   : > { %5550 = vmatmul.mubr.msk.f32.vlgmr.msra.gmra.mxu1 %vm609_vm1, %v6644_v3 }
  0x6c   : > { %5556 = vmatpush3.xpose.msra.mxu0 %v6728_v44  ;;  %5586 = vmatpush3.xpose.msra.mxu1 %v6667_v14  ;;  %v558_v44 = vld [vmem:[%s7303_s14 + $0xe8] sm:$0xff] }
  0x6d   : > { %5557 = vmatprep.subr.mxu0 %v6761_v59  ;;  %5587 = vmatprep.subr.mxu1 %v6669_v15  ;;  %v543_v59 = vld [vmem:[%s7303_s14 + $0x70] sm:$0xff] }
  0x6e   : > { %5617 = vmatprep.mubr.f32.mxu1 %v7006_v45 }
  0x70   : > { %5558 = vmatpush3.xpose.msra.mxu0 %v6765_v61  ;;  %5588 = vmatpush3.xpose.msra.mxu1 %v6674_v19  ;;  %v9718_v61 = vld [vmem:[#allocation114_spill] sm:$0xff] }
  0x71   : > { %5559 = vmatprep.subr.mxu0 %v6777_v7  ;;  %5589 = vmatprep.subr.mxu1 %v6681_v24  ;;  %v9717_v7 = vld [vmem:[#allocation111_spill] sm:$0xff] }
  0x74   : > { %5560 = vmatpush3.xpose.msra.mxu0 %v6796_v17  ;;  %5590 = vmatpush3.xpose.msra.mxu1 %v6686_v26 }
  0x75   : > { %5561 = vmatprep.subr.mxu0 %v6819_v42  ;;  %5591 = vmatprep.subr.mxu1 %v6707_v34  ;;  %v559_v42 = vld [vmem:[%s7303_s14 + $0xf0] sm:$0xff] }
  0x78   : > { %5562 = vmatpush3.xpose.msra.mxu0 %v6829_v49  ;;  %5592 = vmatpush3.xpose.msra.mxu1 %v6713_v37  ;;  %v544_v49 = vld [vmem:[%s7303_s14 + $0x78] sm:$0xff] }
  0x79   : > { %5563 = vmatprep.subr.mxu0 %v6844_v20  ;;  %5593 = vmatprep.subr.mxu1 %v6735_v47  ;;  %v9677_v20 = vld [vmem:[#allocation89_spill] sm:$0xff] }
  0x7c   : > { %5564 = vmatpush3.xpose.msra.mxu0 %v6856_v2  ;;  %5594 = vmatpush3.xpose.msra.mxu1 %v6755_v57  ;;  %v9674_v2 = vld [vmem:[#allocation79_spill] sm:$0xff] }
  0x7d   : > { %5565 = vmatprep.subr.mxu0 %v6868_v21  ;;  %5595 = vmatprep.subr.mxu1 %v6773_v5  ;;  %v9673_v21 = vld [vmem:[#allocation55_spill] sm:$0xff] }
  0x80   : > { %5566 = vmatpush3.xpose.msra.mxu0 %v6887_v62  ;;  %5596 = vmatpush3.xpose.msra.mxu1 %v6786_v10  ;;  %v9675_v62 = vld [vmem:[#allocation56_spill] sm:$0xff] }
  0x81   : > { %5567 = vmatprep.subr.mxu0 %v6900_v8  ;;  %5597 = vmatprep.subr.mxu1 %v6806_v29  ;;  %v9676_v8 = vld [vmem:[#allocation62_spill] sm:$0xff] }
  0x84   : > { %5568 = vmatpush3.xpose.msra.mxu0 %v6921_v43  ;;  %5598 = vmatpush3.xpose.msra.mxu1 %v9669_v6  ;;  %v9678_v43 = vld [vmem:[#allocation65_spill] sm:$0xff] }
  0x85   : > { %5569 = vmatprep.subr.mxu0 %v9670_v63  ;;  %5599 = vmatprep.subr.mxu1 %v9671_v33  ;;  %v9679_v63 = vld [vmem:[#allocation68_spill] sm:$0xff] }
  0x88   : > { %5570 = vmatpush3.xpose.msra.mxu0 %v9672_v22  ;;  %5600 = vmatpush3.xpose.msra.mxu1 %v9673_v21  ;;  %v9680_v22 = vld [vmem:[#allocation70_spill] sm:$0xff] }
  0x89   : > { %5571 = vmatprep.subr.mxu0 %v9674_v2  ;;  %5601 = vmatprep.subr.mxu1 %v9675_v62  ;;  %v9681_v2 = vld [vmem:[#allocation78_spill] sm:$0xff] }
  0x8c   : > { %5572 = vmatpush3.xpose.msra.mxu0 %v6980_v41  ;;  %5602 = vmatpush3.xpose.msra.mxu1 %v9676_v8  ;;  %v9682_v41 = vld [vmem:[#allocation81_spill] sm:$0xff] }
  0x8d   : > { %5573 = vmatprep.subr.mxu0 %v9677_v20  ;;  %5603 = vmatprep.subr.mxu1 %v9678_v43  ;;  %v9683_v20 = vld [vmem:[#allocation85_spill] sm:$0xff] }
  0x90   : > { %5574 = vmatpush3.xpose.msra.mxu0 %v7014_v38  ;;  %5604 = vmatpush3.xpose.msra.mxu1 %v9679_v63  ;;  %v9684_v38 = vld [vmem:[#allocation91_spill] sm:$0xff] }
  0x91   : > { %5575 = vmatprep.subr.mxu0 %v7034_v54  ;;  %5605 = vmatprep.subr.mxu1 %v9680_v22  ;;  %v9714_v54 = vld [vmem:[#allocation106_spill] sm:$0xff] }
  0x94   : > { %5576 = vmatpush3.xpose.msra.mxu0 %v7058_v4  ;;  %5606 = vmatpush3.xpose.msra.mxu1 %v9681_v2 }
  0x95   : > { %5577 = vmatprep.subr.mxu0 %v7071_v0  ;;  %5607 = vmatprep.subr.mxu1 %v9682_v41  ;;  %v9707_v0 = vld [vmem:[#allocation84_spill] sm:$0xff] }
  0x98   : > { %5578 = vmatpush3.xpose.msra.mxu0 %v7091_v48  ;;  %5608 = vmatpush3.xpose.msra.mxu1 %v9683_v20  ;;  %v9685_v48 = vld [vmem:[#allocation16_spill] sm:$0xff] }
  0x99   : > { %5579 = vmatprep.subr.mxu0 %v7102_v23  ;;  %5609 = vmatprep.subr.mxu1 %v9684_v38  ;;  %v9686_v23 = vld [vmem:[#allocation17_spill] sm:$0xff] }
  0x9c   : > { %5580 = vmatpush3.xpose.msra.mxu0 %v7116_v31  ;;  %5610 = vmatpush3.xpose.msra.mxu1 %v7021_v53  ;;  %v9687_v31 = vld [vmem:[#allocation19_spill] sm:$0xff] }
  0x9d   : > { %5581 = vmatprep.subr.mxu0 %v7128_v50  ;;  %5611 = vmatprep.subr.mxu1 %v7031_v58  ;;  %v9689_v50 = vld [vmem:[#allocation25_spill] sm:$0xff] }
  0xa0   : > { %5582 = vmatpush3.xpose.msra.mxu0 %v7140_v36  ;;  %5612 = vmatpush3.xpose.msra.mxu1 %v7047_v12  ;;  %v9688_v36 = vld [vmem:[#allocation21_spill] sm:$0xff] }
  0xa1   : > { %5613 = vmatprep.subr.mxu1 %v7064_v60  ;;  %5619 = vmatprep.subr.mxu0 %v9685_v48  ;;  %v9706_v48 = vld [vmem:[#allocation5_spill] sm:$0xff] }
  0xa2   : > { %vm1659_vm3 = vcmp.lt.s32.totalorder %v9706_v48, 10 }
  0xa3   : > { %5584 = vmatmul.mubr.f32.vlgmr.msra.gmra.mxu0 %v6972_v32  ;;  %v9690_v32 = vld [vmem:[#allocation28_spill] sm:$0xff] }
  0xa4   : > { %5614 = vmatpush3.xpose.msra.mxu1 %v7079_v16  ;;  %5620 = vmatpush3.xpose.msra.mxu0 %v9686_v23  ;;  %v9691_v23 = vld [vmem:[#allocation37_spill] sm:$0xff] }
  0xa5   : > { %5615 = vmatprep.subr.mxu1 %v7088_v18  ;;  %5621 = vmatprep.subr.mxu0 %v9687_v31  ;;  %v9692_v31 = vld [vmem:[#allocation39_spill] sm:$0xff] }
  0xa6   : > { %5651 = vmatprep.mubr.msk.f32.mxu0 %vm609_vm1, %v6644_v3 }
  0xa8   : > { %5616 = vmatpush3.xpose.msra.mxu1 %v7110_v40  ;;  %5622 = vmatpush3.xpose.msra.mxu0 %v9688_v36  ;;  %v9697_v36 = vld [vmem:[#allocation58_spill] sm:$0xff] }
  0xa9   : > { %5623 = vmatprep.subr.mxu0 %v9689_v50  ;;  %5653 = vmatprep.subr.mxu1 %v6665_v13  ;;  %v9693_v50 = vld [vmem:[#allocation40_spill] sm:$0xff] }
  0xab   : > { %5618 = vmatmul.mubr.f32.vlgmr.msra.gmra.mxu1 %v7006_v45  ;;  %v9694_v45 = vld [vmem:[#allocation45_spill] sm:$0xff] }
  0xac   : > { %5624 = vmatpush3.xpose.msra.mxu0 %v9690_v32  ;;  %5654 = vmatpush3.xpose.msra.mxu1 %v6667_v14  ;;  %v9695_v32 = vld [vmem:[#allocation50_spill] sm:$0xff] }
  0xad   : > { %5625 = vmatprep.subr.mxu0 %v9691_v23  ;;  %5655 = vmatprep.subr.mxu1 %v6669_v15  ;;  %v9696_v23 = vld [vmem:[#allocation52_spill] sm:$0xff] }
  0xae   : > { %5685 = vmatprep.mubr.msk.f32.mxu1 %vm609_vm1, %v6644_v3 }
  0xb0   : > { %5626 = vmatpush3.xpose.msra.mxu0 %v9692_v31  ;;  %5656 = vmatpush3.xpose.msra.mxu1 %v6674_v19  ;;  %v9698_v31 = vld [vmem:[#allocation61_spill] sm:$0xff] }
  0xb1   : > { %5627 = vmatprep.subr.mxu0 %v9693_v50  ;;  %5657 = vmatprep.subr.mxu1 %v6681_v24  ;;  %v9699_v50 = vld [vmem:[#allocation66_spill] sm:$0xff] }
  0xb2   : > { %v534_v24 = vld [vmem:[%s7303_s14 + $0x28] sm:$0xff] }
  0xb4   : > { %5628 = vmatpush3.xpose.msra.mxu0 %v9694_v45  ;;  %5658 = vmatpush3.xpose.msra.mxu1 %v6686_v26  ;;  %v9700_v45 = vld [vmem:[#allocation72_spill] sm:$0xff] }
  0xb5   : > { %5629 = vmatprep.subr.mxu0 %v9695_v32  ;;  %5659 = vmatprep.subr.mxu1 %v6707_v34  ;;  %v550_v34 = vld [vmem:[%s7303_s14 + $0xa8] sm:$0xff] }
  0xb8   : > { %5630 = vmatpush3.xpose.msra.mxu0 %v9696_v23  ;;  %5660 = vmatpush3.xpose.msra.mxu1 %v6713_v37  ;;  %v9701_v23 = vld [vmem:[#allocation74_spill] sm:$0xff] }
  0xb9   : > { %5631 = vmatprep.subr.mxu0 %v9697_v36  ;;  %5661 = vmatprep.subr.mxu1 %v6735_v47  ;;  %v9702_v36 = vld [vmem:[#allocation80_spill] sm:$0xff]  ;;  %v535_v47 = vld [vmem:[%s7303_s14 + $0x30] sm:$0xff] }
  0xbc   : > { %5632 = vmatpush3.xpose.msra.mxu0 %v9698_v31  ;;  %5662 = vmatpush3.xpose.msra.mxu1 %v6755_v57  ;;  %v9703_v31 = vld [vmem:[#allocation83_spill] sm:$0xff] }
  0xbd   : > { %5633 = vmatprep.subr.mxu0 %v9699_v50  ;;  %5663 = vmatprep.subr.mxu1 %v6773_v5  ;;  %v9704_v50 = vlaneseq }
  0xbf   : > { %v7290_v32 = vshrl.u32 %v9704_v50, 7  ;;  %v9709_v50 = vld [vmem:[#allocation92_spill] sm:$0xff] }
  0xc0   : > { %5634 = vmatpush3.xpose.msra.mxu0 %v9700_v45  ;;  %5664 = vmatpush3.xpose.msra.mxu1 %v6786_v10  ;;  %v1656_v45 = vadd.s32 4, %v9706_v48 }
  0xc1   : > { %5635 = vmatprep.subr.mxu0 %v9701_v23  ;;  %5665 = vmatprep.subr.mxu1 %v6806_v29  ;;  %9705 = vst [vmem:[#allocation134_spill] sm:$0xff] %v7290_v32  ;;  %v9708_v23 = vld [vmem:[#allocation86_spill] sm:$0xff] }
  0xc2   : > { %vm1657_vm2 = vcmp.eq.s32.totalorder %v7290_v32, %v1656_v45 }
  0xc3   : > { %vm1660_vm4 = vmand %vm1657_vm2, %vm1659_vm3  ;;  %vm1611_vm2 = vcmask 1040384  }
  0xc4   : > { %5636 = vmatpush3.xpose.msra.mxu0 %v9702_v36  ;;  %5666 = vmatpush3.xpose.msra.mxu1 %v9669_v6  ;;  %v9712_v36 = vmov 0.0  }
  0xc5   : > { %5637 = vmatprep.subr.mxu0 %v9703_v31  ;;  %5667 = vmatprep.subr.mxu1 %v9671_v33  ;;  %v9711_v31 = vld [vmem:[#allocation103_spill] sm:$0xff]  ;;  %v7315_v4 = vsel %vm1660_vm4, 1.0, %v9712_v36 }
  0xc8   : > { %5638 = vmatpush3.xpose.msra.mxu0 %v9707_v0  ;;  %5668 = vmatpush3.xpose.msra.mxu1 %v9673_v21  ;;  %v9710_v0 = vld [vmem:[#allocation96_spill] sm:$0xff] }
  0xc9   : > { %5639 = vmatprep.subr.mxu0 %v9708_v23  ;;  %5669 = vmatprep.subr.mxu1 %v9675_v62  ;;  %v560_v23 = vld [vmem:[%s7303_s14 + $0xf8] sm:$0xff]  ;;  %v537_v62 = vld [vmem:[%s7303_s14 + $0x40] sm:$0xff] }
  0xcc   : > { %5640 = vmatpush3.xpose.msra.mxu0 %v9709_v50  ;;  %5670 = vmatpush3.xpose.msra.mxu1 %v9676_v8  ;;  %v7318_v50 = vadd.s32 8, %v7290_v32 }
  0xcd   : > { %5641 = vmatprep.subr.mxu0 %v9710_v0  ;;  %5671 = vmatprep.subr.mxu1 %v9678_v43  ;;  %v1767_v0 = vsel %vm1666_vm5, %v560_v23, 0  ;;  %v1719_v23 = vsel %vm1666_vm5, %v544_v49, 0  ;;  %v1716_v49 = vsel %vm1666_vm5, %v543_v59, 0  ;;  %v557_v59 = vld [vmem:[%s7303_s14 + $0xe0] sm:$0xff] }
  0xce   : > { %9713 = vst [vmem:[#allocation135_spill] sm:$0xff] %v7318_v50  ;;  %vm1658_vm6 = vcmp.eq.s32.totalorder %v7318_v50, %v1656_v45  ;;  %v1764_v45 = vsel %vm1666_vm5, %v559_v42, 0  ;;  %v7346_v30 = vand.u32 4294901760, %v1719_v23  ;;  %v1761_v42 = vsel %vm1666_vm5, %v558_v44, 0 }
  0xcf   : > { %vm7330_vm7 = vmand %vm1658_vm6, %vm1659_vm3  ;;  %v7350_v9 = vand.u32 4294901760, %v1764_v45  ;;  %v7366_v56 = vand.u32 4294901760, %v1716_v49  ;;  %v1758_v25 = vsel %vm1666_vm5, %v557_v59, 0  ;;  %vm3593_vm3 = vcmask 15360  }
  0xd0   : > { %5642 = vmatpush3.xpose.msra.mxu0 %v9711_v31  ;;  %5672 = vmatpush3.xpose.msra.mxu1 %v9679_v63  ;;  %v1668_v31 = vsel %vm1666_vm5, %v7315_v4, 0  ;;  %v553_v63 = vld [vmem:[%s7303_s14 + $0xc0] sm:$0xff]  ;;  %vm4618_vm6 = vcmask 64512  }
  0xd1   : > { %5643 = vmatprep.subr.mxu0 %v9714_v54  ;;  %5673 = vmatprep.subr.mxu1 %v9680_v22  ;;  %v7336_v54 = vand.u32 4294901760, %v1767_v0  ;;  %v7344_v39 = vsub.f32 %v1668_v31, %v1668_v31  ;;  %v542_v31 = vld [vmem:[%s7303_s14 + $0x68] sm:$0xff]  ;;  %v7376_v46 = vsub.f32 %v1764_v45, %v7350_v9  ;;  %v7385_v1 = vsub.f32 %v1716_v49, %v7366_v56 }
  0xd2   : > { %v1713_v44 = vsel %vm1666_vm5, %v542_v31, 0  ;;  %v556_v31 = vld [vmem:[%s7303_s14 + $0xd8] sm:$0xff]  ;;  %v7403_v45 = vand.u32 4294901760, %v1758_v25 }
  0xd3   : > { %v7361_v28 = vand.u32 4294901760, %v7344_v39  ;;  %v7387_v27 = vand.u32 4294901760, %v1713_v44 }
  0xd4   : > { %5644 = vmatpush3.xpose.msra.mxu0 %v9717_v7  ;;  %5674 = vmatpush3.xpose.msra.mxu1 %v9681_v2  ;;  %v9719_v7 = vld [vmem:[#allocation118_spill] sm:$0xff] }
  0xd5   : > { %5645 = vmatprep.subr.mxu0 %v9718_v61  ;;  %5675 = vmatprep.subr.mxu1 %v9682_v41  ;;  %v7354_v61 = vsub.f32 %v1767_v0, %v7336_v54  ;;  %v9720_v0 = vld [vmem:[#allocation124_spill] sm:$0xff] }
  0xd8   : > { %5646 = vmatpush3.xpose.msra.mxu0 %v9719_v7  ;;  %5676 = vmatpush3.xpose.msra.mxu1 %v9683_v20  ;;  %v7364_v7 = vsub.f32 %v1719_v23, %v7346_v30  ;;  %v541_v23 = vld [vmem:[%s7303_s14 + $0x60] sm:$0xff]  ;;  %v7434_v20 = vsub.f32 %v1758_v25, %v7403_v45 }
  0xd9   : > { %5647 = vmatprep.subr.mxu0 %v7125_v35  ;;  %5677 = vmatprep.subr.mxu1 %v9684_v38  ;;  %v7371_v35 = vand.u32 4294901760, %v1761_v42  ;;  %v1710_v11 = vsel %vm1666_vm5, %v541_v23, 0 }
  0xda   : > { %v9388_v22 = vand.u32 4294901760, %v7434_v20 }
  0xdb   : > { %v7399_v49 = vsub.f32 %v1761_v42, %v7371_v35  ;;  %v7415_v42 = vand.u32 4294901760, %v1710_v11 }
  0xdc   : > { %5648 = vmatpush3.xpose.msra.mxu0 %v9720_v0  ;;  %5678 = vmatpush3.xpose.msra.mxu1 %v7021_v53  ;;  %v1869_v0 = vsub.f32 %v7344_v39, %v7361_v28 }
  0xdd   : > { %5649 = vmatprep.subr.mxu0 %v7149_v51  ;;  %5679 = vmatprep.subr.mxu1 %v7031_v58  ;;  %v9721_v51 = vand.u32 4294901760, %v7354_v61  ;;  %v555_v58 = vld [vmem:[%s7303_s14 + $0xd0] sm:$0xff] }
  0xde   : > { %v7408_v53 = vand.u32 4294901760, %v1869_v0  ;;  %v9722_v0 = vand.u32 4294901760, %v7364_v7 }
  0xdf   : > { %v2004_v59 = vsub.f32 %v7354_v61, %v9721_v51  ;;  %v7413_v51 = vsub.f32 %v1713_v44, %v7387_v27  ;;  %v9724_v44 = vand.u32 4294901760, %v7385_v1 }
  0xe0   : > { %5650 = vmatpush3.xpose.msra.mxu0 %v7158_v55  ;;  %5680 = vmatpush3.xpose.msra.mxu1 %v7047_v12  ;;  %v1755_v55 = vsel %vm1666_vm5, %v556_v31, 0  ;;  %v540_v12 = vld [vmem:[%s7303_s14 + $0x58] sm:$0xff]  ;;  %v1892_v52 = vsub.f32 %v7364_v7, %v9722_v0  ;;  %v539_v0 = vld [vmem:[%s7303_s14 + $0x50] sm:$0xff] }
  0xe1   : > { %5681 = vmatprep.subr.mxu1 %v7064_v60  ;;  %5687 = vmatprep.subr.mxu0 %v7336_v54  ;;  %v2005_v31 = vand.u32 4294901760, %v2004_v59  ;;  %v9723_v60 = vand.u32 4294901760, %v7376_v46  ;;  %v7429_v23 = vand.u32 4294901760, %v1755_v55  ;;  %v1752_v59 = vsel %vm1666_vm5, %v555_v58, 0 }
  0xe2   : > { %v1893_v25 = vand.u32 4294901760, %v1892_v52  ;;  %v7450_v2 = vand.u32 4294901760, %v1752_v59  ;;  %v538_v52 = vld [vmem:[%s7303_s14 + $0x48] sm:$0xff] }
  0xe3   : > { %5652 = vmatmul.mubr.msk.f32.vlgmr.msra.gmra.mxu0 %vm609_vm1, %v6644_v3  ;;  %v2011_v38 = vsub.f32 %v7376_v46, %v9723_v60  ;;  %v7439_v60 = vsub.f32 %v1710_v11, %v7415_v42  ;;  %v1704_v11 = vsel %vm1666_vm5, %v539_v0, 0 }
  0xe4   : > { %5682 = vmatpush3.xpose.msra.mxu1 %v7079_v16  ;;  %5688 = vmatpush3.xpose.msra.mxu0 %v7346_v30  ;;  %v1707_v16 = vsel %vm1666_vm5, %v540_v12, 0  ;;  %v554_v12 = vld [vmem:[%s7303_s14 + $0xc8] sm:$0xff]  ;;  %v7469_v8 = vand.u32 4294901760, %v1704_v11 }
  0xe5   : > { %5683 = vmatprep.subr.mxu1 %v7088_v18  ;;  %5689 = vmatprep.subr.mxu0 %v7350_v9  ;;  %v1899_v18 = vsub.f32 %v7385_v1, %v9724_v44  ;;  %v7448_v58 = vand.u32 4294901760, %v1707_v16  ;;  %v2012_v50 = vand.u32 4294901760, %v2011_v38  ;;  %v9725_v44 = vand.u32 4294901760, %v7399_v49 }
  0xe6   : > { %5719 = vmatprep.mubr.f32.mxu0 %v7408_v53  ;;  %v1749_v43 = vsel %vm1666_vm5, %v554_v12, 0  ;;  %v1701_v12 = vsel %vm1666_vm5, %v538_v52, 0 }
  0xe7   : > { %v2018_v41 = vsub.f32 %v7399_v49, %v9725_v44  ;;  %v1900_v0 = vand.u32 4294901760, %v1899_v18  ;;  %v7479_v18 = vsub.f32 %v1752_v59, %v7450_v2  ;;  %v2025_v44 = vsub.f32 %v7434_v20, %v9388_v22 }
  0xe8   : > { %5684 = vmatpush3.xpose.msra.mxu1 %v7110_v40  ;;  %5690 = vmatpush3.xpose.msra.mxu0 %v7366_v56  ;;  %v7459_v40 = vsub.f32 %v1755_v55, %v7429_v23  ;;  %v7474_v55 = vsub.f32 %v1707_v16, %v7448_v58  ;;  %v7492_v59 = vsub.f32 %v1704_v11, %v7469_v8  ;;  %v7494_v52 = vand.u32 4294901760, %v1701_v12 }
  0xe9   : > { %5691 = vmatprep.subr.mxu0 %v7371_v35  ;;  %5723 = vmatprep.subr.mxu1 %v2005_v31  ;;  %v9726_v31 = vand.u32 4294901760, %v7413_v51  ;;  %v9730_v22 = vand.u32 4294901760, %v7439_v60  ;;  %v1698_v11 = vsel %vm1666_vm5, %v537_v62, 0  ;;  %v2026_v33 = vand.u32 4294901760, %v2025_v44 }
  0xea   : > { %9728 = vst [vmem:[#allocation137_spill] sm:$0xff] %v7494_v52  ;;  %v9731_v6 = vand.u32 4294901760, %v7459_v40  ;;  %v7516_v21 = vsub.f32 %v1701_v12, %v7494_v52  ;;  %v9734_v12 = vand.u32 4294901760, %v7479_v18 }
  0xeb   : > { %5686 = vmatmul.mubr.msk.f32.vlgmr.msra.gmra.mxu1 %vm609_vm1, %v6644_v3  ;;  %v1906_v38 = vsub.f32 %v7413_v51, %v9726_v31  ;;  %v1746_v3 = vsel %vm1666_vm5, %v553_v63, 0  ;;  %v2019_v31 = vand.u32 4294901760, %v2018_v41  ;;  %v1913_v16 = vsub.f32 %v7439_v60, %v9730_v22  ;;  %v536_v22 = vld [vmem:[%s7303_s14 + $0x38] sm:$0xff] }
  0xec   : > { %5692 = vmatpush3.xpose.msra.mxu0 %v7387_v27  ;;  %5724 = vmatpush3.xpose.msra.mxu1 %v1893_v25  ;;  %v7485_v25 = vand.u32 4294901760, %v1749_v43  ;;  %v7496_v41 = vand.u32 4294901760, %v1746_v3  ;;  %v2032_v29 = vsub.f32 %v7459_v40, %v9731_v6  ;;  %v9733_v6 = vand.u32 4294901760, %v7474_v55 }
  0xed   : > { %5693 = vmatprep.subr.mxu0 %v7403_v45  ;;  %5725 = vmatprep.subr.mxu1 %v2012_v50  ;;  %v1907_v63 = vand.u32 4294901760, %v1906_v38  ;;  %v552_v50 = vld [vmem:[%s7303_s14 + $0xb8] sm:$0xff]  ;;  %v7518_v38 = vand.u32 4294901760, %v1698_v11  ;;  %v2039_v5 = vsub.f32 %v7479_v18, %v9734_v12  ;;  %v9741_v19 = vand.u32 4294901760, %v7516_v21 }
  0xee   : > { %9727 = vst [vmem:[#allocation136_spill] sm:$0xff] %v7485_v25  ;;  %5755 = vmatprep.mubr.msk.f32.mxu1 %vm1666_vm5, %v7315_v4  ;;  %9729 = vst [vmem:[#allocation138_spill] sm:$0xff] %v7496_v41  ;;  %v1743_v10 = vsel %vm1666_vm5, %v552_v50, 0  ;;  %v7523_v44 = vsub.f32 %v1746_v3, %v7496_v41  ;;  %v1920_v50 = vsub.f32 %v7474_v55, %v9733_v6  ;;  %v2033_v62 = vand.u32 4294901760, %v2032_v29 }
  0xef   : > { %9732 = vst [vmem:[#allocation139_spill] sm:$0xff] %v7518_v38  ;;  %v7533_v57 = vand.u32 4294901760, %v1743_v10  ;;  %v7540_v37 = vsub.f32 %v1698_v11, %v7518_v38  ;;  %v9736_v6 = vand.u32 4294901760, %v7492_v59  ;;  %v1692_v29 = vsel %vm1666_vm5, %v535_v47, 0 }
  0xf0   : > { %5694 = vmatpush3.xpose.msra.mxu0 %v7415_v42  ;;  %5726 = vmatpush3.xpose.msra.mxu1 %v1900_v0  ;;  %v7511_v0 = vsub.f32 %v1749_v43, %v7485_v25  ;;  %v1914_v43 = vand.u32 4294901760, %v1913_v16  ;;  %v9742_v15 = vand.u32 4294901760, %v7523_v44 }
  0xf1   : > { %5695 = vmatprep.subr.mxu0 %v7429_v23  ;;  %5727 = vmatprep.subr.mxu1 %v2019_v31  ;;  %v551_v31 = vld [vmem:[%s7303_s14 + $0xb0] sm:$0xff]  ;;  %9735 = vst [vmem:[#allocation140_spill] sm:$0xff] %v7533_v57  ;;  %v1927_v12 = vsub.f32 %v7492_v59, %v9736_v6  ;;  %v9746_v48 = vand.u32 4294901760, %v7540_v37 }
  0xf2   : > { %v1740_v16 = vsel %vm1666_vm5, %v551_v31, 0  ;;  %v2040_v31 = vand.u32 4294901760, %v2039_v5  ;;  %v9738_v11 = vand.u32 4294901760, %v7511_v0  ;;  %v1737_v5 = vsel %vm1666_vm5, %v550_v34, 0 }
  0xf3   : > { %v7555_v26 = vand.u32 4294901760, %v1740_v16  ;;  %v7575_v34 = vand.u32 4294901760, %v1692_v29  ;;  %v7580_v13 = vand.u32 4294901760, %v1737_v5 }
  0xf4   : > { %5696 = vmatpush3.xpose.msra.mxu0 %v7448_v58  ;;  %5728 = vmatpush3.xpose.msra.mxu1 %v1907_v63  ;;  %v1695_v63 = vsel %vm1666_vm5, %v536_v22, 0  ;;  %v1921_v22 = vand.u32 4294901760, %v1920_v50  ;;  %v2046_v6 = vsub.f32 %v7511_v0, %v9738_v11  ;;  %v1928_v50 = vand.u32 4294901760, %v1927_v12 }
  0xf5   : > { %5697 = vmatprep.subr.mxu0 %v7450_v2  ;;  %5729 = vmatprep.subr.mxu1 %v2026_v33  ;;  %v7549_v3 = vand.u32 4294901760, %v1695_v63  ;;  %9739 = vst [vmem:[#allocation142_spill] sm:$0xff] %v7555_v26  ;;  %v7559_v33 = vsub.f32 %v1743_v10, %v7533_v57  ;;  %v2053_v11 = vsub.f32 %v7523_v44, %v9742_v15  ;;  %9743 = vst [vmem:[#allocation144_spill] sm:$0xff] %v7575_v34 }
  0xf6   : > { %v1689_v12 = vsel %vm1666_vm5, %v534_v24, 0  ;;  %9744 = vst [vmem:[#allocation145_spill] sm:$0xff] %v7580_v13  ;;  %v7584_v47 = vsub.f32 %v1740_v16, %v7555_v26  ;;  %v1941_v24 = vsub.f32 %v7540_v37, %v9746_v48  ;;  %v7597_v16 = vsub.f32 %v1692_v29, %v7575_v34  ;;  %v532_v29 = vld [vmem:[%s7303_s14 + $0x18] sm:$0xff] }
  0xf7   : > { %9737 = vst [vmem:[#allocation141_spill] sm:$0xff] %v7549_v3  ;;  %9740 = vst [vmem:[#allocation143_spill] sm:$0xff] %v7559_v33  ;;  %v7573_v10 = vsub.f32 %v1695_v63, %v7549_v3  ;;  %v9429_v15 = vand.u32 4294901760, %v7559_v33  ;;  %v548_v63 = vld [vmem:[%s7303_s14 + $0x98] sm:$0xff] }
  0xf8   : > { %5698 = vmatpush3.xpose.msra.mxu0 %v7469_v8  ;;  %5730 = vmatpush3.xpose.msra.mxu1 %v1914_v43  ;;  %v549_v43 = vld [vmem:[%s7303_s14 + $0xa0] sm:$0xff]  ;;  %9745 = vst [vmem:[#allocation146_spill] sm:$0xff] %v7584_v47  ;;  %9749 = vst [vmem:[#allocation149_spill] sm:$0xff] %v7597_v16 }
  0xf9   : > { %5699 = vmatprep.subr.mxu0 %v7485_v25  ;;  %5731 = vmatprep.subr.mxu1 %v2033_v62  ;;  %v1934_v62 = vsub.f32 %v7516_v21, %v9741_v19  ;;  %v1734_v14 = vsel %vm1666_vm5, %v549_v43, 0  ;;  %v2047_v19 = vand.u32 4294901760, %v2046_v6  ;;  %v7591_v43 = vand.u32 4294901760, %v1689_v12 }
  0xfa   : > { %v2060_v48 = vsub.f32 %v7559_v33, %v9429_v15  ;;  %v531_v33 = vld [vmem:[%s7303_s14 + $0x10] sm:$0xff] }
  0xfb   : > { %v1935_v32 = vand.u32 4294901760, %v1934_v62  ;;  %9747 = vst [vmem:[#allocation147_spill] sm:$0xff] %v7591_v43  ;;  %v7612_v6 = vsub.f32 %v1689_v12, %v7591_v43  ;;  %v1683_v12 = vsel %vm1666_vm5, %v532_v29, 0 }
  0xfc   : > { %5700 = vmatpush3.xpose.msra.mxu0 %v7494_v52  ;;  %5732 = vmatpush3.xpose.msra.mxu1 %v1921_v22  ;;  %v533_v22 = vld [vmem:[%s7303_s14 + $0x20] sm:$0xff]  ;;  %v2061_v52 = vand.u32 4294901760, %v2060_v48  ;;  %v546_v48 = vld [vmem:[%s7303_s14 + $0x88] sm:$0xff] }
  0xfd   : > { %5701 = vmatprep.subr.mxu0 %v7496_v41  ;;  %5733 = vmatprep.subr.mxu1 %v2040_v31  ;;  %v7593_v41 = vand.u32 4294901760, %v1734_v14  ;;  %v2054_v31 = vand.u32 4294901760, %v2053_v11  ;;  %v1686_v62 = vsel %vm1666_vm5, %v533_v22, 0  ;;  %v1942_v11 = vand.u32 4294901760, %v1941_v24  ;;  %9751 = vst [vmem:[#allocation151_spill] sm:$0xff] %v7612_v6 }
  0xfe   : > { %v7614_v22 = vand.u32 4294901760, %v1686_v62  ;;  %v7638_v24 = vand.u32 4294901760, %v1683_v12 }
  0xff   : > { %9748 = vst [vmem:[#allocation148_spill] sm:$0xff] %v7593_v41 }
 0x100   : > { %5702 = vmatpush3.xpose.msra.mxu0 %v7518_v38  ;;  %5734 = vmatpush3.xpose.msra.mxu1 %v1928_v50  ;;  %v1731_v38 = vsel %vm1666_vm5, %v548_v63, 0  ;;  %v7608_v50 = vsub.f32 %v1737_v5, %v7580_v13  ;;  %9752 = vst [vmem:[#allocation152_spill] sm:$0xff] %v7614_v22  ;;  %v9754_v63 = vand.u32 4294901760, %v7573_v10  ;;  %9756 = vst [vmem:[#allocation154_spill] sm:$0xff] %v7638_v24 }
 0x101   : > { %5703 = vmatprep.subr.mxu0 %v7533_v57  ;;  %5735 = vmatprep.subr.mxu1 %v2047_v19  ;;  %v547_v19 = vld [vmem:[%s7303_s14 + $0x90] sm:$0xff]  ;;  %v7618_v57 = vsub.f32 %v1734_v14, %v7593_v41  ;;  %v7625_v15 = vand.u32 4294901760, %v1731_v38  ;;  %v9755_v14 = vand.u32 4294901760, %v7584_v47 }
 0x102   : > { %9750 = vst [vmem:[#allocation150_spill] sm:$0xff] %v7608_v50  ;;  %v1948_v5 = vsub.f32 %v7573_v10, %v9754_v63  ;;  %v1728_v25 = vsel %vm1666_vm5, %v547_v19, 0  ;;  %v7636_v63 = vsub.f32 %v1686_v62, %v7614_v22  ;;  %v9759_v29 = vand.u32 4294901760, %v7608_v50 }
 0x103   : > { %9753 = vst [vmem:[#allocation153_spill] sm:$0xff] %v7618_v57  ;;  %v7648_v62 = vsub.f32 %v1731_v38, %v7625_v15  ;;  %v9760_v38 = vand.u32 4294901760, %v7612_v6 }
 0x104   : > { %5704 = vmatpush3.xpose.msra.mxu0 %v7549_v3  ;;  %5736 = vmatpush3.xpose.msra.mxu1 %v1935_v32  ;;  %v2067_v3 = vsub.f32 %v7584_v47, %v9755_v14  ;;  %v1949_v14 = vand.u32 4294901760, %v1948_v5  ;;  %v9757_v32 = vand.u32 4294901760, %v7597_v16  ;;  %v7654_v47 = vand.u32 4294901760, %v1728_v25 }
 0x105   : > { %5705 = vmatprep.subr.mxu0 %v7555_v26  ;;  %5737 = vmatprep.subr.mxu1 %v2054_v31  ;;  %9758 = vst [vmem:[#allocation155_spill] sm:$0xff] %v7648_v62  ;;  %v2074_v31 = vsub.f32 %v7608_v50, %v9759_v29  ;;  %v1725_v5 = vsel %vm1666_vm5, %v546_v48, 0  ;;  %v545_v50 = vld [vmem:[%s7303_s14 + $0x80] sm:$0xff] }
 0x106   : > { %v1955_v19 = vsub.f32 %v7597_v16, %v9757_v32  ;;  %v2068_v26 = vand.u32 4294901760, %v2067_v3  ;;  %v7660_v32 = vsub.f32 %v1683_v12, %v7638_v24  ;;  %v1722_v29 = vsel %vm1666_vm5, %v545_v50, 0 }
 0x108   : > { %5706 = vmatpush3.xpose.msra.mxu0 %v7575_v34  ;;  %5738 = vmatpush3.xpose.msra.mxu1 %v1942_v11  ;;  %v1680_v11 = vsel %vm1666_vm5, %v531_v33, 0  ;;  %v530_v34 = vld [vmem:[%s7303_s14 + $0x8] sm:$0xff]  ;;  %v1956_v33 = vand.u32 4294901760, %v1955_v19 }
 0x109   : > { %5707 = vmatprep.subr.mxu0 %v7580_v13  ;;  %5739 = vmatprep.subr.mxu1 %v2061_v52  ;;  %v1962_v13 = vsub.f32 %v7612_v6, %v9760_v38  ;;  %v9761_v52 = vand.u32 4294901760, %v7618_v57  ;;  %v7671_v48 = vand.u32 4294901760, %v1680_v11  ;;  %v2075_v38 = vand.u32 4294901760, %v2074_v31 }
 0x10a   : > { %v7675_v6 = vand.u32 4294901760, %v1725_v5  ;;  %v1677_v16 = vsel %vm1666_vm5, %v530_v34, 0 }
 0x10b   : > { %v2081_v3 = vsub.f32 %v7618_v57, %v9761_v52  ;;  %v7679_v52 = vsub.f32 %v1728_v25, %v7654_v47  ;;  %v9763_v57 = vand.u32 4294901760, %v7636_v63  ;;  %v9764_v25 = vand.u32 4294901760, %v7648_v62 }
 0x10c   : > { %5708 = vmatpush3.xpose.msra.mxu0 %v7591_v43  ;;  %5740 = vmatpush3.xpose.msra.mxu1 %v1949_v14  ;;  %9762 = vst [vmem:[#allocation156_spill] sm:$0xff] %v7675_v6  ;;  %v529_v43 = vld [vmem:[%s7303_s14] sm:$0xff]  ;;  %v1963_v14 = vand.u32 4294901760, %v1962_v13  ;;  %v7694_v50 = vand.u32 4294901760, %v1677_v16  ;;  %v7699_v13 = vsel %vm7330_vm7, 1.0, %v9712_v36  ;;  %s496_s14 = scalar_lea.vmem %s9203_s5, %s5482_s30 }
 0x10d   : > { %5709 = vmatprep.subr.mxu0 %v7593_v41  ;;  %5741 = vmatprep.subr.mxu1 %v2068_v26  ;;  %v2082_v19 = vand.u32 4294901760, %v2081_v3  ;;  %v1969_v12 = vsub.f32 %v7636_v63, %v9763_v57  ;;  %v9459_v41 = vand.u32 4294901760, %v7660_v32  ;;  %v7689_v26 = vsub.f32 %v1680_v11, %v7671_v48  ;;  %9765 = vst [vmem:[#allocation157_spill] sm:$0xff] %v7699_v13 }
 0x10e   : > { %v2088_v34 = vsub.f32 %v7648_v62, %v9764_v25  ;;  %v7702_v57 = vand.u32 4294901760, %v1722_v29  ;;  %v1674_v11 = vsel %vm1666_vm5, %v529_v43, 0  ;;  %v7707_v3 = vsub.f32 %v1725_v5, %v7675_v6 }
 0x10f   : > { %v1671_v25 = vsel %vm1666_vm5, %v7699_v13, 0  ;;  %v7713_v17 = vsub.f32 %v1677_v16, %v7694_v50  ;;  %v7718_v31 = vand.u32 4294901760, %v1674_v11 }
 0x110   : > { %5710 = vmatpush3.xpose.msra.mxu0 %v7614_v22  ;;  %5742 = vmatpush3.xpose.msra.mxu1 %v1956_v33  ;;  %v1970_v33 = vand.u32 4294901760, %v1969_v12  ;;  %v2089_v5 = vand.u32 4294901760, %v2088_v34  ;;  %v9767_v12 = vand.u32 4294901760, %v7679_v52  ;;  %v7727_v16 = vsub.f32 %v1722_v29, %v7702_v57 }
 0x111   : > { %5711 = vmatprep.subr.mxu0 %v7625_v15  ;;  %5743 = vmatprep.subr.mxu1 %v2075_v38  ;;  %9766 = vst [vmem:[#allocation158_spill] sm:$0xff] %v7713_v17  ;;  %v1976_v38 = vsub.f32 %v7660_v32, %v9459_v41  ;;  %v7733_v43 = vsub.f32 %v1674_v11, %v7718_v31 }
 0x112   : > { %v2095_v36 = vsub.f32 %v7679_v52, %v9767_v12  ;;  %v9465_v12 = vand.u32 4294901760, %v7713_v17 }
 0x113   : > { %v1977_v41 = vand.u32 4294901760, %v1976_v38  ;;  %9768 = vst [vmem:[#allocation159_spill] sm:$0xff] %v7733_v43 }
 0x114   : > { %5712 = vmatpush3.xpose.msra.mxu0 %v7638_v24  ;;  %5744 = vmatpush3.xpose.msra.mxu1 %v1963_v14  ;;  %v9460_v14 = vand.u32 4294901760, %v7707_v3  ;;  %v7729_v24 = vsub.f32 %v1671_v25, %v1671_v25  ;;  %v2096_v29 = vand.u32 4294901760, %v2095_v36 }
 0x115   : > { %5713 = vmatprep.subr.mxu0 %v7654_v47  ;;  %5745 = vmatprep.subr.mxu1 %v2082_v19  ;;  %v9769_v19 = vand.u32 4294901760, %v7689_v26 }
 0x116   : > { %v2102_v25 = vsub.f32 %v7707_v3, %v9460_v14  ;;  %v7745_v38 = vand.u32 4294901760, %v7729_v24 }
 0x117   : > { %v1983_v34 = vsub.f32 %v7689_v26, %v9769_v19  ;;  %v1990_v19 = vsub.f32 %v7713_v17, %v9465_v12  ;;  %v9782_v12 = vld [vmem:[#allocation142_spill] sm:$0xff] }
 0x118   : > { %5714 = vmatpush3.xpose.msra.mxu0 %v7671_v48  ;;  %5746 = vmatpush3.xpose.msra.mxu1 %v1970_v33  ;;  %v9463_v33 = vand.u32 4294901760, %v7727_v16  ;;  %v2103_v36 = vand.u32 4294901760, %v2102_v25 }
 0x119   : > { %5715 = vmatprep.subr.mxu0 %v7675_v6  ;;  %5747 = vmatprep.subr.mxu1 %v2089_v5  ;;  %v1984_v11 = vand.u32 4294901760, %v1983_v34  ;;  %v9464_v5 = vand.u32 4294901760, %v7733_v43  ;;  %v1880_v6 = vsub.f32 %v7729_v24, %v7745_v38 }
 0x11a   : > { %v2109_v14 = vsub.f32 %v7727_v16, %v9463_v33 }
 0x11b   : > { %v1997_v34 = vsub.f32 %v7733_v43, %v9464_v5  ;;  %v1881_v25 = vand.u32 4294901760, %v1880_v6  ;;  %v9771_v6 = vld [vmem:[#allocation136_spill] sm:$0xff]  ;;  %v9781_v5 = vld [vmem:[#allocation153_spill] sm:$0xff] }
 0x11c   : > { %5716 = vmatpush3.xpose.msra.mxu0 %v7694_v50  ;;  %5748 = vmatpush3.xpose.msra.mxu1 %v1977_v41  ;;  %v1991_v41 = vand.u32 4294901760, %v1990_v19  ;;  %v9775_v19 = vld [vmem:[#allocation149_spill] sm:$0xff] }
 0x11d   : > { %5717 = vmatprep.subr.mxu0 %v7702_v57  ;;  %5749 = vmatprep.subr.mxu1 %v2096_v29  ;;  %v2110_v29 = vand.u32 4294901760, %v2109_v14  ;;  %v1998_v33 = vand.u32 4294901760, %v1997_v34  ;;  %v9772_v14 = vld [vmem:[#allocation137_spill] sm:$0xff]  ;;  %v9778_v34 = vld [vmem:[#allocation140_spill] sm:$0xff] }
 0x120   : > { %5718 = vmatpush3.xpose.msra.mxu0 %v7718_v31  ;;  %5750 = vmatpush3.xpose.msra.mxu1 %v1984_v11  ;;  %v9774_v11 = vld [vmem:[#allocation138_spill] sm:$0xff] }
 0x121   : > { %5751 = vmatprep.subr.mxu1 %v2103_v36  ;;  %5759 = vmatprep.subr.mxu0 %v7354_v61  ;;  %v9776_v36 = vld [vmem:[#allocation139_spill] sm:$0xff] }
 0x123   : > { %5720 = vmatmul.mubr.f32.vlgmr.msra.gmra.mxu0 %v7408_v53  ;;  %v9770_v53 = vld [vmem:[#allocation143_spill] sm:$0xff] }
 0x124   : > { %5752 = vmatpush3.xpose.msra.mxu1 %v1991_v41  ;;  %5760 = vmatpush3.xpose.msra.mxu0 %v7364_v7  ;;  %v9777_v41 = vld [vmem:[#allocation150_spill] sm:$0xff] }
 0x125   : > { %5753 = vmatprep.subr.mxu1 %v2110_v29  ;;  %5761 = vmatprep.subr.mxu0 %v7376_v46  ;;  %v9779_v29 = vld [vmem:[#allocation151_spill] sm:$0xff] }
 0x126   : > { %5721 = vmatprep.mubr.f32.mxu0 %v1881_v25 }
 0x127   : > { %5722 = vmatmul.mubr.f32.gmra.mxu0 %v1881_v25  ;;  %v9780_v25 = vld [vmem:[#allocation141_spill] sm:$0xff] }
 0x128   : > { %5754 = vmatpush3.xpose.msra.mxu1 %v1998_v33  ;;  %5762 = vmatpush3.xpose.msra.mxu0 %v7385_v1  ;;  %v9773_v33 = vld [vmem:[#allocation146_spill] sm:$0xff] }
 0x129   : > { %5763 = vmatprep.subr.mxu0 %v7399_v49  ;;  %5795 = vmatprep.subr.mxu1 %v7336_v54 }
 0x12a   : > { %5791 = vmatprep.mubr.f32.mxu0 %v7344_v39 }
 0x12b   : > { %5756 = vmatmul.mubr.msk.f32.vlgmr.msra.gmra.mxu1 %vm1666_vm5, %v7315_v4 }
 0x12c   : > { %5764 = vmatpush3.xpose.msra.mxu0 %v7413_v51  ;;  %5796 = vmatpush3.xpose.msra.mxu1 %v7346_v30 }
 0x12d   : > { %5765 = vmatprep.subr.mxu0 %v7434_v20  ;;  %5797 = vmatprep.subr.mxu1 %v7350_v9 }
 0x12e   : > { %5757 = vmatprep.mubr.msk.f32.mxu1 %vm1666_vm5, %v7699_v13 }
 0x12f   : > { %5758 = vmatmul.mubr.msk.f32.gmra.mxu1 %vm1666_vm5, %v7699_v13  ;;  %v9783_v13 = vld [vmem:[#allocation144_spill] sm:$0xff] }
 0x130   : > { %5766 = vmatpush3.xpose.msra.mxu0 %v7439_v60  ;;  %5798 = vmatpush3.xpose.msra.mxu1 %v7366_v56 }
 0x131   : > { %5767 = vmatprep.subr.mxu0 %v7459_v40  ;;  %5799 = vmatprep.subr.mxu1 %v7371_v35 }
 0x132   : > { %5827 = vmatprep.mubr.f32.mxu1 %v7361_v28 }
 0x134   : > { %5768 = vmatpush3.xpose.msra.mxu0 %v7474_v55  ;;  %5800 = vmatpush3.xpose.msra.mxu1 %v7387_v27 }
 0x135   : > { %5769 = vmatprep.subr.mxu0 %v7479_v18  ;;  %5801 = vmatprep.subr.mxu1 %v7403_v45 }
 0x138   : > { %5770 = vmatpush3.xpose.msra.mxu0 %v7492_v59  ;;  %5802 = vmatpush3.xpose.msra.mxu1 %v7415_v42 }
 0x139   : > { %5771 = vmatprep.subr.mxu0 %v7511_v0  ;;  %5803 = vmatprep.subr.mxu1 %v7429_v23 }
 0x13c   : > { %5772 = vmatpush3.xpose.msra.mxu0 %v7516_v21  ;;  %5804 = vmatpush3.xpose.msra.mxu1 %v7448_v58 }
 0x13d   : > { %5773 = vmatprep.subr.mxu0 %v7523_v44  ;;  %5805 = vmatprep.subr.mxu1 %v7450_v2 }
 0x140   : > { %5774 = vmatpush3.xpose.msra.mxu0 %v7540_v37  ;;  %5806 = vmatpush3.xpose.msra.mxu1 %v7469_v8 }
 0x141   : > { %5775 = vmatprep.subr.mxu0 %v9770_v53  ;;  %5807 = vmatprep.subr.mxu1 %v9771_v6 }
 0x144   : > { %5776 = vmatpush3.xpose.msra.mxu0 %v7573_v10  ;;  %5808 = vmatpush3.xpose.msra.mxu1 %v9772_v14 }
 0x145   : > { %5777 = vmatprep.subr.mxu0 %v9773_v33  ;;  %5809 = vmatprep.subr.mxu1 %v9774_v11 }
 0x148   : > { %5778 = vmatpush3.xpose.msra.mxu0 %v9775_v19  ;;  %5810 = vmatpush3.xpose.msra.mxu1 %v9776_v36  ;;  %v9784_v19 = vld [vmem:[#allocation145_spill] sm:$0xff] }
 0x149   : > { %5779 = vmatprep.subr.mxu0 %v9777_v41  ;;  %5811 = vmatprep.subr.mxu1 %v9778_v34  ;;  %v9785_v41 = vld [vmem:[#allocation147_spill] sm:$0xff] }
 0x14c   : > { %5780 = vmatpush3.xpose.msra.mxu0 %v9779_v29  ;;  %5812 = vmatpush3.xpose.msra.mxu1 %v9780_v25  ;;  %v9786_v29 = vld [vmem:[#allocation148_spill] sm:$0xff] }
 0x14d   : > { %5781 = vmatprep.subr.mxu0 %v9781_v5  ;;  %5813 = vmatprep.subr.mxu1 %v9782_v12 }
 0x150   : > { %5782 = vmatpush3.xpose.msra.mxu0 %v7636_v63  ;;  %5814 = vmatpush3.xpose.msra.mxu1 %v9783_v13 }
 0x151   : > { %5783 = vmatprep.subr.mxu0 %v7648_v62  ;;  %5815 = vmatprep.subr.mxu1 %v9784_v19  ;;  %v9787_v62 = vld [vmem:[#allocation154_spill] sm:$0xff] }
 0x154   : > { %5784 = vmatpush3.xpose.msra.mxu0 %v7660_v32  ;;  %5816 = vmatpush3.xpose.msra.mxu1 %v9785_v41 }
 0x155   : > { %5785 = vmatprep.subr.mxu0 %v7679_v52  ;;  %5817 = vmatprep.subr.mxu1 %v9786_v29  ;;  %v9788_v29 = vld [vmem:[#allocation156_spill] sm:$0xff] }
 0x158   : > { %5786 = vmatpush3.xpose.msra.mxu0 %v7689_v26  ;;  %5818 = vmatpush3.xpose.msra.mxu1 %v7614_v22  ;;  %v9789_v22 = vand.u32 4294901760, %v7354_v61  ;;  %v9792_v61 = vand.u32 4294901760, %v7385_v1  ;;  %v9795_v1 = vand.u32 4294901760, %v7434_v20  ;;  %v9799_v20 = vand.u32 4294901760, %v7479_v18  ;;  %v9818_v18 = vld [vmem:[#allocation155_spill] sm:$0xff] }
 0x159   : > { %5787 = vmatprep.subr.mxu0 %v7707_v3  ;;  %5819 = vmatprep.subr.mxu1 %v7625_v15 }
 0x15c   : > { %5788 = vmatpush3.xpose.msra.mxu0 %v7713_v17  ;;  %5820 = vmatpush3.xpose.msra.mxu1 %v9787_v62  ;;  %v9790_v17 = vand.u32 4294901760, %v7364_v7  ;;  %v9794_v7 = vand.u32 4294901760, %v7413_v51  ;;  %v9812_v51 = vld [vmem:[#allocation151_spill] sm:$0xff] }
 0x15d   : > { %5789 = vmatprep.subr.mxu0 %v7727_v16  ;;  %5821 = vmatprep.subr.mxu1 %v7654_v47 }
 0x160   : > { %5790 = vmatpush3.xpose.msra.mxu0 %v7733_v43  ;;  %5822 = vmatpush3.xpose.msra.mxu1 %v7671_v48  ;;  %v9791_v43 = vand.u32 4294901760, %v7376_v46  ;;  %v9804_v46 = vand.u32 4294901760, %v7540_v37 }
 0x161   : > { %5823 = vmatprep.subr.mxu1 %v9788_v29  ;;  %5831 = vmatprep.subr.mxu0 %v9789_v22  ;;  %v9822_v22 = vand.u32 4294901760, %v7679_v52  ;;  %v9827_v52 = vld [vmem:[#allocation158_spill] sm:$0xff] }
 0x163   : > { %5792 = vmatmul.mubr.f32.vlgmr.msra.gmra.mxu0 %v7344_v39  ;;  %v9793_v39 = vand.u32 4294901760, %v7399_v49 }
 0x164   : > { %5824 = vmatpush3.xpose.msra.mxu1 %v7694_v50  ;;  %5832 = vmatpush3.xpose.msra.mxu0 %v9790_v17  ;;  %v9825_v17 = vld [vmem:[#allocation152_spill] sm:$0xff] }
 0x165   : > { %5793 = vmatprep.mubr.f32.mxu0 %v7729_v24  ;;  %5825 = vmatprep.subr.mxu1 %v7702_v57 }
 0x166   : > { %5833 = vmatprep.subr.mxu0 %v9791_v43  ;;  %v9826_v43 = vand.u32 4294901760, %v7707_v3 }
 0x167   : > { %5794 = vmatmul.mubr.f32.gmra.mxu0 %v7729_v24  ;;  %v9823_v24 = vld [vmem:[#allocation148_spill] sm:$0xff] }
 0x168   : > { %5826 = vmatpush3.xpose.msra.mxu1 %v7718_v31  ;;  %5834 = vmatpush3.xpose.msra.mxu0 %v9792_v61 }
 0x169   : > { %5835 = vmatprep.subr.mxu0 %v9793_v39  ;;  %5867 = vmatprep.subr.mxu1 %v7336_v54  ;;  %v9796_v54 = vand.u32 4294901760, %v7439_v60  ;;  %v9815_v60 = vld [vmem:[#allocation5_spill] sm:$0xff] }
 0x16a   : > { %5863 = vmatprep.mubr.msk.f32.mxu0 %vm1666_vm5, %v7315_v4  ;;  %vm1649_vm9 = vcmp.lt.s32.totalorder %v9815_v60, 4  ;;  %vm3586_vm4 = vcmp.lt.s32.totalorder %v9815_v60, 2 }
 0x16b   : > { %5828 = vmatmul.mubr.f32.vlgmr.msra.gmra.mxu1 %v7361_v28  ;;  %v9797_v28 = vand.u32 4294901760, %v7459_v40  ;;  %v9801_v40 = vand.u32 4294901760, %v7511_v0  ;;  %v9820_v0 = vand.u32 4294901760, %v7660_v32  ;;  %v812_v32 = vpop.f32.mrf.mxu0 }
 0x16c   : > { %5836 = vmatpush3.xpose.msra.mxu0 %v9794_v7  ;;  %5868 = vmatpush3.xpose.msra.mxu1 %v7346_v30  ;;  %v9798_v30 = vand.u32 4294901760, %v7474_v55  ;;  %v9817_v55 = vand.u32 4294901760, %v7636_v63 }
 0x16d   : > { %5829 = vmatprep.mubr.f32.mxu1 %v7745_v38  ;;  %5837 = vmatprep.subr.mxu0 %v9795_v1  ;;  %v9836_v1 = vld [vmem:[#allocation9_spill] sm:$0xff] }
 0x16e   : > { %5869 = vmatprep.subr.mxu1 %v7350_v9  ;;  %v9805_v9 = vand.u32 4294901760, %v9770_v53  ;;  %v1044_v53 = vpop.f32.mrf.mxu1 }
 0x16f   : > { %5830 = vmatmul.mubr.f32.gmra.mxu1 %v7745_v38  ;;  %v9828_v38 = vand.u32 4294901760, %v9827_v52  ;;  %v9856_v52 = vld [vmem:[#allocation60_spill] sm:$0xff] }
 0x170   : > { %5838 = vmatpush3.xpose.msra.mxu0 %v9796_v54  ;;  %5870 = vmatpush3.xpose.msra.mxu1 %v7366_v56  ;;  %v9800_v56 = vand.u32 4294901760, %v7492_v59  ;;  %v9819_v59 = vand.u32 4294901760, %v9818_v18 }
 0x171   : > { %5839 = vmatprep.subr.mxu0 %v9797_v28  ;;  %5871 = vmatprep.subr.mxu1 %v7371_v35  ;;  %v9802_v35 = vand.u32 4294901760, %v7516_v21  ;;  %v9806_v21 = vand.u32 4294901760, %v7573_v10  ;;  %v9837_v28 = vld [vmem:[#allocation10_spill] sm:$0xff] }
 0x172   : > { %5899 = vmatprep.mubr.msk.f32.mxu1 %vm1666_vm5, %v7315_v4 }
 0x174   : > { %5840 = vmatpush3.xpose.msra.mxu0 %v9798_v30  ;;  %5872 = vmatpush3.xpose.msra.mxu1 %v7387_v27  ;;  %v9803_v27 = vand.u32 4294901760, %v7523_v44  ;;  %v9821_v44 = vmov 0.0  }
 0x175   : > { %5841 = vmatprep.subr.mxu0 %v9799_v20  ;;  %5873 = vmatprep.subr.mxu1 %v7403_v45  ;;  %v9807_v45 = vand.u32 4294901760, %v9773_v33  ;;  %v1046_v33 = vpop.f32.mrf.mxu1 }
 0x178   : > { %5842 = vmatpush3.xpose.msra.mxu0 %v9800_v56  ;;  %5874 = vmatpush3.xpose.msra.mxu1 %v7415_v42  ;;  %v9813_v42 = vand.u32 4294901760, %v9812_v51  ;;  %v9845_v51 = vld [vmem:[#allocation24_spill] sm:$0xff] }
 0x179   : > { %5843 = vmatprep.subr.mxu0 %v9801_v40  ;;  %5875 = vmatprep.subr.mxu1 %v7429_v23  ;;  %v9814_v23 = vand.u32 4294901760, %v9781_v5  ;;  %v814_v5 = vpop.f32.mrf.mxu0 }
 0x17b   : > { %v1181_v3 = vpop.f32.mrf.mxu0 }
 0x17c   : > { %5844 = vmatpush3.xpose.msra.mxu0 %v9802_v35  ;;  %5876 = vmatpush3.xpose.msra.mxu1 %v7448_v58  ;;  %v9816_v58 = vld [vmem:[#allocation134_spill] sm:$0xff] }
 0x17d   : > { %5845 = vmatprep.subr.mxu0 %v9803_v27  ;;  %5877 = vmatprep.subr.mxu1 %v7450_v2  ;;  %v9808_v2 = vld [vmem:[#allocation149_spill] sm:$0xff]  ;;  %vm1647_vm8 = vcmp.eq.s32.totalorder %v9816_v58, %v9815_v60  ;;  %v9839_v27 = vld [vmem:[#allocation12_spill] sm:$0xff] }
 0x17e   : > { %v9809_v37 = vand.u32 4294901760, %v9808_v2  ;;  %vm1650_vm10 = vmand %vm1647_vm8, %vm1649_vm9  ;;  %v9842_v2 = vld [vmem:[#allocation29_spill] sm:$0xff] }
 0x17f   : > { %v7925_v10 = vsel %vm1650_vm10, 1.0, %v9821_v44 }
 0x180   : > { %5846 = vmatpush3.xpose.msra.mxu0 %v9804_v46  ;;  %5878 = vmatpush3.xpose.msra.mxu1 %v7469_v8  ;;  %v9810_v8 = vld [vmem:[#allocation150_spill] sm:$0xff]  ;;  %v2674_v63 = vsel %vm609_vm1, %v7925_v10, 0 }
 0x181   : > { %5847 = vmatprep.subr.mxu0 %v9805_v9  ;;  %5879 = vmatprep.subr.mxu1 %v9771_v6  ;;  %v9811_v49 = vand.u32 4294901760, %v9810_v8  ;;  %v9841_v9 = vld [vmem:[#allocation18_spill] sm:$0xff]  ;;  %v9843_v8 = vld [vmem:[#allocation20_spill] sm:$0xff] }
 0x184   : > { %5848 = vmatpush3.xpose.msra.mxu0 %v9806_v21  ;;  %5880 = vmatpush3.xpose.msra.mxu1 %v9772_v14  ;;  %v9830_v14 = vld [vmem:[#allocation159_spill] sm:$0xff] }
 0x185   : > { %5849 = vmatprep.subr.mxu0 %v9807_v45  ;;  %5881 = vmatprep.subr.mxu1 %v9774_v11  ;;  %v1183_v11 = vpop.f32.mrf.mxu0 }
 0x188   : > { %5850 = vmatpush3.xpose.msra.mxu0 %v9809_v37  ;;  %5882 = vmatpush3.xpose.msra.mxu1 %v9776_v36  ;;  %v9833_v36 = vld [vmem:[#allocation7_spill] sm:$0xff] }
 0x189   : > { %5851 = vmatprep.subr.mxu0 %v9811_v49  ;;  %5883 = vmatprep.subr.mxu1 %v9778_v34  ;;  %v1047_v34 = vadd.f32 %v1046_v33, %v814_v5  ;;  %v9844_v49 = vld [vmem:[#allocation33_spill] sm:$0xff]  ;;  %v9858_v5 = vld [vmem:[#allocation64_spill] sm:$0xff] }
 0x18b   : > { %v1184_v7 = vadd.f32 %v1183_v11, %v1047_v34  ;;  %v9863_v11 = vld [vmem:[#allocation62_spill] sm:$0xff]  ;;  %v8026_v34 = vsub.s32 0, %v9816_v58 }
 0x18c   : > { %5852 = vmatpush3.xpose.msra.mxu0 %v9813_v42  ;;  %5884 = vmatpush3.xpose.msra.mxu1 %v9780_v25  ;;  %v9835_v25 = vld [vmem:[#allocation8_spill] sm:$0xff] }
 0x18d   : > { %5853 = vmatprep.subr.mxu0 %v9814_v23  ;;  %5885 = vmatprep.subr.mxu1 %v9782_v12  ;;  %v7938_v12 = vsub.f32 %v2674_v63, %v2674_v63  ;;  %v9846_v42 = vld [vmem:[#allocation36_spill] sm:$0xff]  ;;  %v9851_v63 = vld [vmem:[#allocation38_spill] sm:$0xff]  ;;  %9867 = vst [vmem:[#allocation143_spill] sm:$0xff] %v8026_v34 }
 0x18f   : > { %v7947_v6 = vand.u32 4294901760, %v7938_v12 }
 0x190   : > { %5854 = vmatpush3.xpose.msra.mxu0 %v9817_v55  ;;  %5886 = vmatpush3.xpose.msra.mxu1 %v9783_v13  ;;  %v9824_v13 = vand.u32 4294901760, %v7689_v26  ;;  %v9829_v26 = vand.u32 4294901760, %v7727_v16 }
 0x191   : > { %5855 = vmatprep.subr.mxu0 %v9819_v59  ;;  %5887 = vmatprep.subr.mxu1 %v9784_v19  ;;  %v2779_v16 = vsub.f32 %v7938_v12, %v7947_v6  ;;  %v1287_v19 = vpop.f32.mrf.mxu1  ;;  %v9847_v59 = vld [vmem:[#allocation30_spill] sm:$0xff] }
 0x193   : > { %v7964_v61 = vand.u32 4294901760, %v2779_v16  ;;  %v1289_v39 = vpop.f32.mrf.mxu1 }
 0x194   : > { %5856 = vmatpush3.xpose.msra.mxu0 %v9820_v0  ;;  %5888 = vmatpush3.xpose.msra.mxu1 %v9785_v41  ;;  %v1290_v30 = vadd.f32 %v1289_v39, %v1184_v7  ;;  %v9848_v0 = vld [vmem:[#allocation42_spill] sm:$0xff]  ;;  %v9868_v39 = vld [vmem:[#allocation68_spill] sm:$0xff] }
 0x195   : > { %5857 = vmatprep.subr.mxu0 %v9822_v22  ;;  %5889 = vmatprep.subr.mxu1 %v9823_v24  ;;  %v9849_v22 = vld [vmem:[#allocation34_spill] sm:$0xff]  ;;  %v9850_v24 = vld [vmem:[#allocation47_spill] sm:$0xff]  ;;  %v9869_v7 = vld [vmem:[#allocation88_spill] sm:$0xff] }
 0x198   : > { %5858 = vmatpush3.xpose.msra.mxu0 %v9824_v13  ;;  %5890 = vmatpush3.xpose.msra.mxu1 %v9825_v17  ;;  %v9852_v13 = vld [vmem:[#allocation51_spill] sm:$0xff] }
 0x199   : > { %5859 = vmatprep.subr.mxu0 %v9826_v43  ;;  %5891 = vmatprep.subr.mxu1 %v7625_v15  ;;  %v9831_v15 = vand.u32 4294901760, %v9830_v14  ;;  %v9853_v17 = vld [vmem:[#allocation43_spill] sm:$0xff]  ;;  %v9855_v43 = vld [vmem:[#allocation44_spill] sm:$0xff] }
 0x19a   : > { %v9861_v14 = vld [vmem:[#allocation56_spill] sm:$0xff] }
 0x19c   : > { %5860 = vmatpush3.xpose.msra.mxu0 %v9828_v38  ;;  %5892 = vmatpush3.xpose.msra.mxu1 %v9787_v62  ;;  %v9832_v62 = vld [vmem:[#allocation6_spill] sm:$0xff]  ;;  %v9857_v38 = vld [vmem:[#allocation48_spill] sm:$0xff] }
 0x19d   : > { %5861 = vmatprep.subr.mxu0 %v9829_v26  ;;  %5893 = vmatprep.subr.mxu1 %v7654_v47  ;;  %v1045_v47 = vadd.f32 %v1044_v53, %v812_v32  ;;  %v9854_v32 = vld [vmem:[#allocation54_spill] sm:$0xff]  ;;  %v9859_v53 = vld [vmem:[#allocation55_spill] sm:$0xff]  ;;  %v9860_v26 = vld [vmem:[#allocation69_spill] sm:$0xff] }
 0x1a0   : > { %5862 = vmatpush3.xpose.msra.mxu0 %v9831_v15  ;;  %5894 = vmatpush3.xpose.msra.mxu1 %v7671_v48  ;;  %v9834_v48 = vld [vmem:[#allocation157_spill] sm:$0xff]  ;;  %v9862_v15 = vld [vmem:[#allocation71_spill] sm:$0xff] }
 0x1a1   : > { %5895 = vmatprep.subr.mxu1 %v9788_v29  ;;  %5903 = vmatprep.subr.mxu0 %v9832_v62  ;;  %v1182_v29 = vadd.f32 %v1181_v3, %v1045_v47 }
 0x1a3   : > { %5864 = vmatmul.mubr.msk.f32.vlgmr.msra.gmra.mxu0 %vm1666_vm5, %v7315_v4  ;;  %v1455_v41 = vpop.f32.mrf.mxu0 }
 0x1a4   : > { %5896 = vmatpush3.xpose.msra.mxu1 %v7694_v50  ;;  %5904 = vmatpush3.xpose.msra.mxu0 %v9833_v36  ;;  %v1288_v50 = vadd.f32 %v1287_v19, %v1182_v29  ;;  %v9864_v19 = vld [vmem:[#allocation77_spill] sm:$0xff]  ;;  %v593_v29 = vld [vmem:[%s8021_s9] sm:$0x3] }
 0x1a5   : > { %5865 = vmatprep.mubr.msk.f32.mxu0 %vm1666_vm5, %v9834_v48  ;;  %5897 = vmatprep.subr.mxu1 %v7702_v57  ;;  %v1457_v54 = vpop.f32.mrf.mxu0  ;;  %v9838_v57 = vld [vmem:[#allocation26_spill] sm:$0xff] }
 0x1a6   : > { %5905 = vmatprep.subr.mxu0 %v9835_v25  ;;  %v1456_v20 = vadd.f32 %v1455_v41, %v1288_v50  ;;  %v1458_v40 = vadd.f32 %v1457_v54, %v1290_v30  ;;  %v9865_v41 = vld [vmem:[#allocation65_spill] sm:$0xff]  ;;  %v8032_v50 = vsub.s32 1, %v9816_v58  ;;  %v9871_v54 = vld [vmem:[#allocation70_spill] sm:$0xff]  ;;  %v9873_v30 = vld [vmem:[#allocation135_spill] sm:$0xff] }
 0x1a7   : > { %5866 = vmatmul.mubr.msk.f32.gmra.mxu0 %vm1666_vm5, %v9834_v48  ;;  %vm1648_vm11 = vcmp.eq.s32.totalorder %v9873_v30, %v9815_v60 }
 0x1a8   : > { %5898 = vmatpush3.xpose.msra.mxu1 %v7718_v31  ;;  %5906 = vmatpush3.xpose.msra.mxu0 %v9836_v1  ;;  %v9840_v31 = vld [vmem:[#allocation27_spill] sm:$0xff]  ;;  %9870 = vst [vmem:[#allocation136_spill] sm:$0xff] %v8032_v50  ;;  %vm1651_vm12 = vmand %vm1648_vm11, %vm1649_vm9 }
 0x1a9   : > { %5907 = vmatprep.subr.mxu0 %v9837_v28  ;;  %5939 = vmatprep.subr.mxu1 %v9838_v57  ;;  %v9872_v57 = vld [vmem:[#allocation90_spill] sm:$0xff] }
 0x1aa   : > { %5935 = vmatprep.mubr.f32.mxu0 %v7964_v61 }
 0x1ab   : > { %v1559_v56 = vpop.f32.mrf.mxu1  ;;  %5900 = vmatmul.mubr.msk.f32.vlgmr.msra.gmra.mxu1 %vm1666_vm5, %v7315_v4 }
 0x1ac   : > { %v7975_v35 = vadd.f32 %v1559_v56, %v1456_v20  ;;  %5908 = vmatpush3.xpose.msra.mxu0 %v9839_v27  ;;  %5940 = vmatpush3.xpose.msra.mxu1 %v9840_v31  ;;  %v1570_v56 = vrot.slane %v593_v29, %v8026_v34  ;;  %v9875_v31 = vld [vmem:[#allocation94_spill] sm:$0xff] }
 0x1ad   : > { %v1561_v46 = vpop.f32.mrf.mxu1  ;;  %5901 = vmatprep.mubr.msk.f32.mxu1 %vm1666_vm5, %v9834_v48  ;;  %5909 = vmatprep.subr.mxu0 %v9841_v9 }
 0x1ae   : > { %v1581_v21 = vand.u32 2147483647, %v7975_v35  ;;  %v7983_v45 = vadd.f32 %v1561_v46, %v1458_v40  ;;  %5941 = vmatprep.subr.mxu1 %v9842_v2  ;;  %v9874_v40 = vld [vmem:[#allocation78_spill] sm:$0xff]  ;;  %v9876_v2 = vld [vmem:[#allocation81_spill] sm:$0xff] }
 0x1af   : > { %5902 = vmatmul.mubr.msk.f32.gmra.mxu1 %vm1666_vm5, %v9834_v48  ;;  %v9866_v48 = vld [vmem:[#allocation82_spill] sm:$0xff] }
 0x1b0   : > { %v1583_v4 = vsub.f32 0.0, %v1581_v21  ;;  %v1582_v37 = vand.u32 2147483647, %v7983_v45  ;;  %5910 = vmatpush3.xpose.msra.mxu0 %v9843_v8  ;;  %5942 = vmatpush3.xpose.msra.mxu1 %v9844_v49  ;;  %v1574_v21 = vrot.slane %v593_v29, %v8032_v50  ;;  %v599_v49 = vadd.s32 128, %v9815_v60 }
 0x1b1   : > { %5911 = vmatprep.subr.mxu0 %v9845_v51  ;;  %5943 = vmatprep.subr.mxu1 %v9846_v42 }
 0x1b2   : > { %v1585_v23 = vmul.f32 1.442695, %v1583_v4  ;;  %v1584_v55 = vsub.f32 0.0, %v1582_v37  ;;  %5971 = vmatprep.mubr.msk.f32.mxu1 %vm609_vm1, %v7925_v10  ;;  %v9877_v4 = vld [vmem:[#allocation97_spill] sm:$0xff]  ;;  %v601_v37 = vstv %s5441_s12 }
 0x1b4   : > { %6419 = vpow2.f32 %v1585_v23  ;;  %v1587_v18 = vmul.f32 1.442695, %v1584_v55  ;;  %5912 = vmatpush3.xpose.msra.mxu0 %v9847_v59  ;;  %5944 = vmatpush3.xpose.msra.mxu1 %v9848_v0  ;;  %v1564_v23 = vmax.f32 %v7975_v35, 0.0  ;;  %v1577_v55 = vmul.f32 %v1570_v56, %v7975_v35  ;;  %v9882_v35 = vld [vmem:[#allocation101_spill] sm:$0xff]  ;;  %v9884_v56 = vld [vmem:[#allocation95_spill] sm:$0xff] }
 0x1b5   : > { %5913 = vmatprep.subr.mxu0 %v9849_v22  ;;  %5945 = vmatprep.subr.mxu1 %v9850_v24  ;;  %v8051_v0 = vsel %vm1651_vm12, 1.0, %v9821_v44  ;;  %v9878_v24 = vld [vmem:[#allocation85_spill] sm:$0xff] }
 0x1b6   : > { %6421 = vpow2.f32 %v1587_v18 }
 0x1b8   : > { %5914 = vmatpush3.xpose.msra.mxu0 %v9851_v63  ;;  %5946 = vmatpush3.xpose.msra.mxu1 %v9852_v13  ;;  %v9879_v13 = vld [vmem:[#allocation100_spill] sm:$0xff] }
 0x1b9   : > { %5915 = vmatprep.subr.mxu0 %v9853_v17  ;;  %5947 = vmatprep.subr.mxu1 %v9854_v32  ;;  %v8056_v32 = vadd.s32 %v601_v37, %v9815_v60 }
 0x1bb   : > { %9880 = vst [vmem:[#allocation137_spill] sm:$0xff] %v8056_v32  ;;  %vm604_vm14 = vcmp.lt.s32.totalorder %v8056_v32, 400 }
 0x1bc   : > { %5916 = vmatpush3.xpose.msra.mxu0 %v9855_v43  ;;  %5948 = vmatpush3.xpose.msra.mxu1 %v9856_v52 }
 0x1bd   : > { %5917 = vmatprep.subr.mxu0 %v9857_v38  ;;  %5949 = vmatprep.subr.mxu1 %v9858_v5 }
 0x1c0   : > { %5918 = vmatpush3.xpose.msra.mxu0 %v9859_v53  ;;  %5950 = vmatpush3.xpose.msra.mxu1 %v9860_v26  ;;  %v1565_v26 = vmax.f32 %v7983_v45, 0.0 }
 0x1c1   : > { %v6420_v3 = vpop.eup %6419  ;;  %5919 = vmatprep.subr.mxu0 %v9861_v14  ;;  %5951 = vmatprep.subr.mxu1 %v9862_v15  ;;  %v1578_v15 = vmul.f32 %v1574_v21, %v7983_v45 }
 0x1c2   : > { %v1589_v33 = vadd.f32 1.0, %v6420_v3  ;;  %v1592_v20 = vmul.f32 -0.5, %v6420_v3  ;;  %v1595_v18 = vand.u32 2147483647, %v6420_v3 }
 0x1c3   : > { %v6422_v16 = vpop.eup %6421 }
 0x1c4   : > { %5920 = vmatpush3.xpose.msra.mxu0 %v9863_v11  ;;  %5952 = vmatpush3.xpose.msra.mxu1 %v9864_v19  ;;  %6423 = vlog2.f32 %v1589_v33  ;;  %v1598_v47 = vadd.f32 1.0, %v6422_v16  ;;  %v1601_v46 = vmul.f32 -0.5, %v6422_v16  ;;  %v1593_v42 = vadd.f32 1.0, %v1592_v20  ;;  %v9881_v33 = vld [vmem:[#allocation91_spill] sm:$0xff] }
 0x1c5   : > { %5921 = vmatprep.subr.mxu0 %v9865_v41  ;;  %5953 = vmatprep.subr.mxu1 %v9866_v48  ;;  %v1604_v19 = vand.u32 2147483647, %v6422_v16  ;;  %v1579_v20 = vsub.f32 %v1564_v23, %v1577_v55  ;;  %vm1596_vm13 = vcmp.lt.f32.partialorder %v1595_v18, 0.0004427343 }
 0x1c6   : > { %6425 = vlog2.f32 %v1598_v47  ;;  %v1602_v52 = vadd.f32 1.0, %v1601_v46  ;;  %v8062_v47 = vadd.s32 %v601_v37, %v599_v49  ;;  %v1594_v29 = vmul.f32 %v6420_v3, %v1593_v42  ;;  %v9887_v37 = vld [vmem:[#allocation110_spill] sm:$0xff] }
 0x1c7   : > { %v1580_v3 = vsub.f32 %v1565_v26, %v1578_v15  ;;  %vm1605_vm15 = vcmp.lt.f32.partialorder %v1604_v19, 0.0004427343 }
 0x1c8   : > { %5922 = vmatpush3.xpose.msra.mxu0 %v9868_v39  ;;  %5954 = vmatpush3.xpose.msra.mxu1 %v9869_v7  ;;  %9883 = vst [vmem:[#allocation146_spill] sm:$0xff] %v8062_v47  ;;  %v2677_v7 = vsel %vm609_vm1, %v8051_v0, 0  ;;  %v1603_v21 = vmul.f32 %v6422_v16, %v1602_v52  ;;  %vm605_vm0 = vcmp.lt.s32.totalorder %v8062_v47, 400  ;;  %v9889_v16 = vld [vmem:[#allocation116_spill] sm:$0xff]  ;;  %v9890_v52 = vld [vmem:[#allocation105_spill] sm:$0xff] }
 0x1c9   : > { %5923 = vmatprep.subr.mxu0 %v9871_v54  ;;  %5955 = vmatprep.subr.mxu1 %v9872_v57  ;;  %v8071_v42 = vsub.f32 %v2677_v7, %v2677_v7  ;;  %v9893_v7 = vld [vmem:[#allocation123_spill] sm:$0xff] }
 0x1cb   : > { %v8083_v15 = vand.u32 4294901760, %v8071_v42 }
 0x1cc   : > { %5924 = vmatpush3.xpose.msra.mxu0 %v9874_v40  ;;  %5956 = vmatpush3.xpose.msra.mxu1 %v9875_v31  ;;  %v9885_v31 = vld [vmem:[#allocation108_spill] sm:$0xff] }
 0x1cd   : > { %5925 = vmatprep.subr.mxu0 %v9876_v2  ;;  %5957 = vmatprep.subr.mxu1 %v9877_v4  ;;  %v9886_v4 = vld [vmem:[#allocation98_spill] sm:$0xff] }
 0x1d0   : > { %5926 = vmatpush3.xpose.msra.mxu0 %v9878_v24  ;;  %5958 = vmatpush3.xpose.msra.mxu1 %v9879_v13  ;;  %v9888_v13 = vld [vmem:[#allocation102_spill] sm:$0xff] }
 0x1d1   : > { %v6424_v5 = vpop.eup %6423  ;;  %5927 = vmatprep.subr.mxu0 %v9881_v33  ;;  %5959 = vmatprep.subr.mxu1 %v9882_v35 }
 0x1d2   : > { %v1591_v48 = vmul.f32 0.6931472, %v6424_v5  ;;  %v9891_v5 = vld [vmem:[#allocation120_spill] sm:$0xff] }
 0x1d3   : > { %v6426_v57 = vpop.eup %6425 }
 0x1d4   : > { %5928 = vmatpush3.xpose.msra.mxu0 %v9884_v56  ;;  %5960 = vmatpush3.xpose.msra.mxu1 %v9885_v31  ;;  %v1597_v45 = vsel %vm1596_vm13, %v1594_v29, %v1591_v48  ;;  %v1600_v46 = vmul.f32 0.6931472, %v6426_v57  ;;  %v9892_v29 = vld [vmem:[#allocation109_spill] sm:$0xff]  ;;  %v9894_v57 = vld [vmem:[#allocation112_spill] sm:$0xff]  ;;  %v9895_v31 = vld [vmem:[#allocation126_spill] sm:$0xff] }
 0x1d5   : > { %5929 = vmatprep.subr.mxu0 %v9886_v4  ;;  %5961 = vmatprep.subr.mxu1 %v9887_v37  ;;  %v1607_v49 = vadd.f32 %v1597_v45, %v1579_v20  ;;  %v2790_v20 = vsub.f32 %v8071_v42, %v8083_v15  ;;  %v9896_v45 = vld [vmem:[#allocation117_spill] sm:$0xff]  ;;  %v9899_v37 = vld [vmem:[#allocation11_spill] sm:$0xff] }
 0x1d6   : > { %v1606_v23 = vsel %vm1605_vm15, %v1603_v21, %v1600_v46  ;;  %v9897_v46 = vld [vmem:[#allocation128_spill] sm:$0xff]  ;;  %v9898_v21 = vld [vmem:[#allocation130_spill] sm:$0xff] }
 0x1d7   : > { %v1608_v55 = vadd.f32 %v1606_v23, %v1580_v3  ;;  %v1609_v18 = vsel %vm604_vm14, %v1607_v49, 0.0  ;;  %v2791_v3 = vand.u32 4294901760, %v2790_v20  ;;  %v9900_v49 = vld [vmem:[#allocation131_spill] sm:$0xff]  ;;  %v9901_v23 = vld [vmem:[#allocation13_spill] sm:$0xff] }
 0x1d8   : > { %5930 = vmatpush3.xpose.msra.mxu0 %v9888_v13  ;;  %5962 = vmatpush3.xpose.msra.mxu1 %v9889_v16  ;;  %v1612_v35 = vsel %vm1611_vm2, %v1609_v18, 0.0  ;;  %v9903_v18 = vld [vmem:[#allocation14_spill] sm:$0xff] }
 0x1d9   : > { %5931 = vmatprep.subr.mxu0 %v9890_v52  ;;  %5963 = vmatprep.subr.mxu1 %v9891_v5  ;;  %v1610_v26 = vsel %vm605_vm0, %v1608_v55, 0.0  ;;  %v9902_v55 = vld [vmem:[#allocation132_spill] sm:$0xff]  ;;  %v9904_v5 = vld [vmem:[#allocation133_spill] sm:$0xff] }
 0x1da   : > { %v1613_v19 = vsel %vm1611_vm2, %v1610_v26, 0.0  ;;  %v9905_v26 = vld [vmem:[#allocation15_spill] sm:$0xff] }
 0x1db   : > { %v1614_v48 = vadd.f32 %v1613_v19, %v1612_v35  ;;  %v9906_v35 = vld [vmem:[#allocation22_spill] sm:$0xff] }
 0x1dc   : > { %5932 = vmatpush3.xpose.msra.mxu0 %v9892_v29  ;;  %5964 = vmatpush3.xpose.msra.mxu1 %v9893_v7  ;;  %v9907_v7 = vld [vmem:[#allocation23_spill] sm:$0xff] }
 0x1dd   : > { %1615 = vadd.xlane.f32.xlu1 %v1614_v48  ;;  %5933 = vmatprep.subr.mxu0 %v9894_v57 }
 0x1de   : > { %5965 = vmatprep.subr.mxu1 %v9895_v31  ;;  %v9908_v31 = vld [vmem:[#allocation31_spill] sm:$0xff] }
 0x1e0   : > { %5934 = vmatpush3.xpose.msra.mxu0 %v9896_v45  ;;  %5966 = vmatpush3.xpose.msra.mxu1 %v9897_v46 }
 0x1e1   : > { %5967 = vmatprep.subr.mxu1 %v9898_v21  ;;  %5975 = vmatprep.subr.mxu0 %v9899_v37 }
 0x1e3   : > { %5936 = vmatmul.mubr.f32.vlgmr.msra.gmra.mxu0 %v7964_v61  ;;  %v1872_v16 = vpop.f32.mrf.mxu0 }
 0x1e4   : > { %5968 = vmatpush3.xpose.msra.mxu1 %v9900_v49  ;;  %5976 = vmatpush3.xpose.msra.mxu0 %v9901_v23  ;;  %v9911_v23 = vld [vmem:[#allocation35_spill] sm:$0xff] }
 0x1e5   : > { %5937 = vmatprep.mubr.f32.mxu0 %v2791_v3  ;;  %5969 = vmatprep.subr.mxu1 %v9902_v55  ;;  %v1874_v61 = vpop.f32.mrf.mxu0 }
 0x1e6   : > { %5977 = vmatprep.subr.mxu0 %v9903_v18 }
 0x1e7   : > { %5938 = vmatmul.mubr.f32.gmra.mxu0 %v2791_v3  ;;  %v1883_v46 = vpop.f32.mrf.mxu0  ;;  %v9910_v3 = vld [vmem:[#allocation32_spill] sm:$0xff] }
 0x1e8   : > { %5970 = vmatpush3.xpose.msra.mxu1 %v9904_v5  ;;  %5978 = vmatpush3.xpose.msra.mxu0 %v9905_v26  ;;  %v9913_v5 = vld [vmem:[#allocation41_spill] sm:$0xff]  ;;  %v9914_v26 = vld [vmem:[#allocation46_spill] sm:$0xff] }
 0x1e9   : > { %5979 = vmatprep.subr.mxu0 %v9906_v35  ;;  %6011 = vmatprep.subr.mxu1 %v9832_v62  ;;  %v1885_v55 = vpop.f32.mrf.mxu0  ;;  %v9915_v35 = vld [vmem:[#allocation49_spill] sm:$0xff] }
 0x1ea   : > { %6007 = vmatprep.mubr.f32.mxu0 %v7938_v12 }
 0x1eb   : > { %v2115_v19 = vpop.f32.mrf.mxu1  ;;  %5972 = vmatmul.mubr.msk.f32.vlgmr.msra.gmra.mxu1 %vm609_vm1, %v7925_v10 }
 0x1ec   : > { %v8107_v48 = vadd.f32 %v2115_v19, %v1872_v16  ;;  %5980 = vmatpush3.xpose.msra.mxu0 %v9907_v7  ;;  %6012 = vmatpush3.xpose.msra.mxu1 %v9833_v36  ;;  %v9917_v19 = vld [vmem:[#allocation57_spill] sm:$0xff]  ;;  %v9918_v7 = vld [vmem:[#allocation59_spill] sm:$0xff] }
 0x1ed   : > { %v2117_v20 = vpop.f32.mrf.mxu1  ;;  %5973 = vmatprep.mubr.msk.f32.mxu1 %vm609_vm1, %v8051_v0  ;;  %5981 = vmatprep.subr.mxu0 %v9908_v31  ;;  %v9920_v31 = vld [vmem:[#allocation67_spill] sm:$0xff] }
 0x1ee   : > { %v8114_v21 = vadd.f32 %v2117_v20, %v1874_v61  ;;  %6013 = vmatprep.subr.mxu1 %v9835_v25  ;;  %v9916_v61 = vld [vmem:[#allocation53_spill] sm:$0xff]  ;;  %v9919_v20 = vld [vmem:[#allocation63_spill] sm:$0xff] }
 0x1ef   : > { %5974 = vmatmul.mubr.msk.f32.gmra.mxu1 %vm609_vm1, %v8051_v0  ;;  %v2122_v37 = vpop.f32.mrf.mxu1 }
 0x1f0   : > { %9909 = vst [vmem:[#allocation138_spill] sm:$0xff] %v8114_v21  ;;  %5982 = vmatpush3.xpose.msra.mxu0 %v9910_v3  ;;  %6014 = vmatpush3.xpose.msra.mxu1 %v9836_v1  ;;  %v8121_v49 = vadd.f32 %v2122_v37, %v1883_v46  ;;  %v9921_v46 = vld [vmem:[#allocation73_spill] sm:$0xff]  ;;  %v9922_v37 = vld [vmem:[#allocation75_spill] sm:$0xff]  ;;  %v9923_v3 = vld [vmem:[#allocation76_spill] sm:$0xff] }
 0x1f1   : > { %5983 = vmatprep.subr.mxu0 %v9911_v23  ;;  %6015 = vmatprep.subr.mxu1 %v9837_v28  ;;  %v2124_v18 = vpop.f32.mrf.mxu1  ;;  %v9924_v23 = vld [vmem:[#allocation79_spill] sm:$0xff] }
 0x1f2   : > { %v8125_v16 = vadd.f32 %v2124_v18, %v1885_v55  ;;  %6043 = vmatprep.mubr.f32.mxu1 %v7947_v6  ;;  %v9925_v55 = vld [vmem:[#allocation87_spill] sm:$0xff]  ;;  %v9926_v18 = vld [vmem:[#allocation89_spill] sm:$0xff] }
 0x1f4   : > { %9912 = vst [vmem:[#allocation139_spill] sm:$0xff] %v8125_v16  ;;  %5984 = vmatpush3.xpose.msra.mxu0 %v9913_v5  ;;  %6016 = vmatpush3.xpose.msra.mxu1 %v9839_v27  ;;  %v9927_v5 = vld [vmem:[#allocation93_spill] sm:$0xff] }
 0x1f5   : > { %5985 = vmatprep.subr.mxu0 %v9914_v26  ;;  %6017 = vmatprep.subr.mxu1 %v9841_v9  ;;  %v9928_v26 = vld [vmem:[#allocation99_spill] sm:$0xff] }
 0x1f8   : > { %5986 = vmatpush3.xpose.msra.mxu0 %v9915_v35  ;;  %6018 = vmatpush3.xpose.msra.mxu1 %v9843_v8  ;;  %v9929_v35 = vld [vmem:[#allocation104_spill] sm:$0xff] }
 0x1f9   : > { %5987 = vmatprep.subr.mxu0 %v9916_v61  ;;  %6019 = vmatprep.subr.mxu1 %v9845_v51  ;;  %v9930_v61 = vld [vmem:[#allocation107_spill] sm:$0xff] }
 0x1fc   : > { %5988 = vmatpush3.xpose.msra.mxu0 %v9917_v19  ;;  %6020 = vmatpush3.xpose.msra.mxu1 %v9847_v59  ;;  %v9931_v19 = vld [vmem:[#allocation113_spill] sm:$0xff] }
 0x1fd   : > { %5989 = vmatprep.subr.mxu0 %v9918_v7  ;;  %6021 = vmatprep.subr.mxu1 %v9849_v22  ;;  %v9932_v7 = vld [vmem:[#allocation115_spill] sm:$0xff] }
 0x200   : > { %5990 = vmatpush3.xpose.msra.mxu0 %v9919_v20  ;;  %6022 = vmatpush3.xpose.msra.mxu1 %v9851_v63  ;;  %v9933_v20 = vld [vmem:[#allocation119_spill] sm:$0xff] }
 0x201   : > { %5991 = vmatprep.subr.mxu0 %v9920_v31  ;;  %6023 = vmatprep.subr.mxu1 %v9853_v17  ;;  %v9934_v31 = vld [vmem:[#allocation122_spill] sm:$0xff] }
 0x204   : > { %5992 = vmatpush3.xpose.msra.mxu0 %v9921_v46  ;;  %6024 = vmatpush3.xpose.msra.mxu1 %v9855_v43  ;;  %v9935_v46 = vld [vmem:[#allocation125_spill] sm:$0xff] }
 0x205   : > { %5993 = vmatprep.subr.mxu0 %v9922_v37  ;;  %6025 = vmatprep.subr.mxu1 %v9857_v38  ;;  %v9936_v37 = vld [vmem:[#allocation16_spill] sm:$0xff] }
 0x208   : > { %5994 = vmatpush3.xpose.msra.mxu0 %v9923_v3  ;;  %6026 = vmatpush3.xpose.msra.mxu1 %v9859_v53 }
 0x209   : > { %5995 = vmatprep.subr.mxu0 %v9924_v23  ;;  %6027 = vmatprep.subr.mxu1 %v9861_v14 }
 0x20c   : > { %5996 = vmatpush3.xpose.msra.mxu0 %v9925_v55  ;;  %6028 = vmatpush3.xpose.msra.mxu1 %v9863_v11  ;;  %v9937_v55 = vld [vmem:[#allocation17_spill] sm:$0xff] }
 0x20d   : > { %5997 = vmatprep.subr.mxu0 %v9926_v18  ;;  %6029 = vmatprep.subr.mxu1 %v9865_v41 }
 0x210   : > { %5998 = vmatpush3.xpose.msra.mxu0 %v9927_v5  ;;  %6030 = vmatpush3.xpose.msra.mxu1 %v9868_v39  ;;  %v9939_v5 = vld [vmem:[#allocation19_spill] sm:$0xff] }
 0x211   : > { %5999 = vmatprep.subr.mxu0 %v9928_v26  ;;  %6031 = vmatprep.subr.mxu1 %v9871_v54 }
 0x214   : > { %6000 = vmatpush3.xpose.msra.mxu0 %v9929_v35  ;;  %6032 = vmatpush3.xpose.msra.mxu1 %v9874_v40 }
 0x215   : > { %6001 = vmatprep.subr.mxu0 %v9930_v61  ;;  %6033 = vmatprep.subr.mxu1 %v9876_v2 }
 0x218   : > { %6002 = vmatpush3.xpose.msra.mxu0 %v9931_v19  ;;  %6034 = vmatpush3.xpose.msra.mxu1 %v9878_v24 }
 0x219   : > { %6003 = vmatprep.subr.mxu0 %v9932_v7  ;;  %6035 = vmatprep.subr.mxu1 %v9881_v33  ;;  %v9943_v7 = vld [vmem:[#allocation28_spill] sm:$0xff] }
 0x21c   : > { %6004 = vmatpush3.xpose.msra.mxu0 %v9933_v20  ;;  %6036 = vmatpush3.xpose.msra.mxu1 %v9884_v56 }
 0x21d   : > { %6005 = vmatprep.subr.mxu0 %v9934_v31  ;;  %6037 = vmatprep.subr.mxu1 %v9886_v4  ;;  %v9948_v31 = vld [vmem:[#allocation40_spill] sm:$0xff] }
 0x220   : > { %6006 = vmatpush3.xpose.msra.mxu0 %v9935_v46  ;;  %6038 = vmatpush3.xpose.msra.mxu1 %v9888_v13  ;;  %v9954_v46 = vld [vmem:[#allocation66_spill] sm:$0xff] }
 0x221   : > { %6039 = vmatprep.subr.mxu1 %v9890_v52  ;;  %6047 = vmatprep.subr.mxu0 %v9936_v37  ;;  %v576_v37 = vld [vmem:[%s8240_s16 + $0x78] sm:$0xff] }
 0x223   : > { %v2259_v3 = vpop.f32.mrf.mxu0  ;;  %6008 = vmatmul.mubr.f32.vlgmr.msra.gmra.mxu0 %v7938_v12  ;;  %v9940_v12 = vld [vmem:[#allocation21_spill] sm:$0xff] }
 0x224   : > { %v2260_v23 = vadd.f32 %v2259_v3, %v8107_v48  ;;  %6040 = vmatpush3.xpose.msra.mxu1 %v9892_v29  ;;  %6048 = vmatpush3.xpose.msra.mxu0 %v9937_v55  ;;  %v9941_v48 = vld [vmem:[#allocation25_spill] sm:$0xff]  ;;  %v9965_v3 = vld [vmem:[#allocation111_spill] sm:$0xff]  ;;  %v9966_v55 = vld [vmem:[#allocation114_spill] sm:$0xff] }
 0x225   : > { %v8180_v18 = vpop.f32.mrf.mxu0  ;;  %6009 = vmatprep.mubr.f32.mxu0 %v8071_v42  ;;  %6041 = vmatprep.subr.mxu1 %v9894_v57 }
 0x226   : > { %9938 = vst [vmem:[#allocation140_spill] sm:$0xff] %v8180_v18  ;;  %6049 = vmatprep.subr.mxu0 %v9939_v5 }
 0x227   : > { %v2267_v26 = vpop.f32.mrf.mxu0  ;;  %6010 = vmatmul.mubr.f32.gmra.mxu0 %v8071_v42 }
 0x228   : > { %v2268_v35 = vadd.f32 %v2267_v26, %v8121_v49  ;;  %6042 = vmatpush3.xpose.msra.mxu1 %v9896_v45  ;;  %6050 = vmatpush3.xpose.msra.mxu0 %v9940_v12  ;;  %v9945_v49 = vld [vmem:[#allocation37_spill] sm:$0xff] }
 0x229   : > { %6051 = vmatprep.subr.mxu0 %v9941_v48  ;;  %6083 = vmatprep.subr.mxu1 %v9832_v62 }
 0x22a   : > { %6079 = vmatprep.mubr.msk.f32.mxu0 %vm609_vm1, %v7925_v10 }
 0x22b   : > { %v2373_v61 = vpop.f32.mrf.mxu1  ;;  %6044 = vmatmul.mubr.f32.vlgmr.msra.gmra.mxu1 %v7947_v6  ;;  %v9947_v6 = vld [vmem:[#allocation39_spill] sm:$0xff] }
 0x22c   : > { %v8194_v19 = vadd.f32 %v2373_v61, %v2260_v23  ;;  %6052 = vmatpush3.xpose.msra.mxu0 %v9943_v7  ;;  %6084 = vmatpush3.xpose.msra.mxu1 %v9833_v36  ;;  %v9949_v36 = vld [vmem:[#allocation45_spill] sm:$0xff]  ;;  %v575_v23 = vld [vmem:[%s8240_s16 + $0x70] sm:$0xff] }
 0x22d   : > { %v8198_v42 = vpop.f32.mrf.mxu1  ;;  %6045 = vmatprep.mubr.f32.mxu1 %v8083_v15  ;;  %6053 = vmatprep.subr.mxu0 %v9945_v49  ;;  %v3643_v26 = vsel %vm3593_vm3, %v575_v23, 0  ;;  %v9968_v61 = vld [vmem:[#allocation121_spill] sm:$0xff] }
 0x22e   : > { %9942 = vst [vmem:[#allocation141_spill] sm:$0xff] %v8194_v19  ;;  %9944 = vst [vmem:[#allocation153_spill] sm:$0xff] %v8198_v42  ;;  %6085 = vmatprep.subr.mxu1 %v9835_v25  ;;  %v9950_v25 = vld [vmem:[#allocation50_spill] sm:$0xff]  ;;  %v8278_v49 = vand.u32 4294901760, %v3643_v26 }
 0x22f   : > { %v2382_v62 = vpop.f32.mrf.mxu1  ;;  %6046 = vmatmul.mubr.f32.gmra.mxu1 %v8083_v15  ;;  %v9951_v15 = vld [vmem:[#allocation52_spill] sm:$0xff]  ;;  %v566_v19 = vld [vmem:[%s8240_s16 + $0x28] sm:$0xff] }
 0x230   : > { %v8204_v20 = vadd.f32 %v2382_v62, %v2268_v35  ;;  %6054 = vmatpush3.xpose.msra.mxu0 %v9947_v6  ;;  %6086 = vmatpush3.xpose.msra.mxu1 %v9836_v1  ;;  %v9952_v1 = vld [vmem:[#allocation58_spill] sm:$0xff]  ;;  %v589_v6 = vld [vmem:[%s8240_s16 + $0xe0] sm:$0xff] }
 0x231   : > { %6055 = vmatprep.subr.mxu0 %v9948_v31  ;;  %6087 = vmatprep.subr.mxu1 %v9837_v28  ;;  %v9953_v28 = vld [vmem:[#allocation61_spill] sm:$0xff]  ;;  %v9967_v35 = vld [vmem:[#allocation118_spill] sm:$0xff]  ;;  %v9969_v31 = vld [vmem:[#allocation124_spill] sm:$0xff] }
 0x232   : > { %9946 = vst [vmem:[#allocation142_spill] sm:$0xff] %v8204_v20  ;;  %6115 = vmatprep.mubr.msk.f32.mxu1 %vm609_vm1, %v7925_v10 }
 0x234   : > { %6056 = vmatpush3.xpose.msra.mxu0 %v9949_v36  ;;  %6088 = vmatpush3.xpose.msra.mxu1 %v9839_v27  ;;  %v9955_v27 = vld [vmem:[#allocation72_spill] sm:$0xff] }
 0x235   : > { %6057 = vmatprep.subr.mxu0 %v9950_v25  ;;  %6089 = vmatprep.subr.mxu1 %v9841_v9  ;;  %v9956_v9 = vld [vmem:[#allocation74_spill] sm:$0xff] }
 0x238   : > { %6058 = vmatpush3.xpose.msra.mxu0 %v9951_v15  ;;  %6090 = vmatpush3.xpose.msra.mxu1 %v9843_v8  ;;  %v9957_v8 = vld [vmem:[#allocation80_spill] sm:$0xff] }
 0x239   : > { %6059 = vmatprep.subr.mxu0 %v9952_v1  ;;  %6091 = vmatprep.subr.mxu1 %v9845_v51  ;;  %v9958_v51 = vld [vmem:[#allocation83_spill] sm:$0xff]  ;;  %v573_v15 = vld [vmem:[%s8240_s16 + $0x60] sm:$0xff]  ;;  %v8294_v1 = vsub.f32 %v3643_v26, %v8278_v49 }
 0x23c   : > { %6060 = vmatpush3.xpose.msra.mxu0 %v9953_v28  ;;  %6092 = vmatpush3.xpose.msra.mxu1 %v9847_v59  ;;  %v9959_v59 = vld [vmem:[#allocation84_spill] sm:$0xff] }
 0x23d   : > { %6061 = vmatprep.subr.mxu0 %v9954_v46  ;;  %6093 = vmatprep.subr.mxu1 %v9849_v22  ;;  %v9960_v22 = vld [vmem:[#allocation86_spill] sm:$0xff]  ;;  %v3685_v46 = vsel %vm3593_vm3, %v589_v6, 0 }
 0x240   : > { %6062 = vmatpush3.xpose.msra.mxu0 %v9955_v27  ;;  %6094 = vmatpush3.xpose.msra.mxu1 %v9851_v63  ;;  %v9961_v63 = vld [vmem:[#allocation92_spill] sm:$0xff] }
 0x241   : > { %6063 = vmatprep.subr.mxu0 %v9956_v9  ;;  %6095 = vmatprep.subr.mxu1 %v9853_v17  ;;  %v9962_v17 = vld [vmem:[#allocation96_spill] sm:$0xff] }
 0x242   : > { %v588_v27 = vld [vmem:[%s8240_s16 + $0xd8] sm:$0xff] }
 0x244   : > { %6064 = vmatpush3.xpose.msra.mxu0 %v9957_v8  ;;  %6096 = vmatpush3.xpose.msra.mxu1 %v9855_v43  ;;  %v592_v43 = vld [vmem:[%s8240_s16 + $0xf8] sm:$0xff]  ;;  %v9971_v8 = vld [vmem:[#allocation129_spill] sm:$0xff] }
 0x245   : > { %6065 = vmatprep.subr.mxu0 %v9958_v51  ;;  %6097 = vmatprep.subr.mxu1 %v9857_v38  ;;  %v9963_v38 = vld [vmem:[#allocation103_spill] sm:$0xff] }
 0x248   : > { %6066 = vmatpush3.xpose.msra.mxu0 %v9959_v59  ;;  %6098 = vmatpush3.xpose.msra.mxu1 %v9859_v53  ;;  %v9964_v53 = vld [vmem:[#allocation106_spill] sm:$0xff]  ;;  %v3637_v59 = vsel %vm3593_vm3, %v573_v15, 0 }
 0x249   : > { %6067 = vmatprep.subr.mxu0 %v9960_v22  ;;  %6099 = vmatprep.subr.mxu1 %v9861_v14  ;;  %v3694_v14 = vsel %vm3593_vm3, %v592_v43, 0  ;;  %v8315_v22 = vand.u32 4294901760, %v3685_v46  ;;  %v3682_v43 = vsel %vm3593_vm3, %v588_v27, 0 }
 0x24c   : > { %6068 = vmatpush3.xpose.msra.mxu0 %v9961_v63  ;;  %6100 = vmatpush3.xpose.msra.mxu1 %v9863_v11  ;;  %v8255_v11 = vand.u32 4294901760, %v3694_v14 }
 0x24d   : > { %6069 = vmatprep.subr.mxu0 %v9962_v17  ;;  %6101 = vmatprep.subr.mxu1 %v9865_v41  ;;  %v591_v41 = vld [vmem:[%s8240_s16 + $0xf0] sm:$0xff] }
 0x24e   : > { %v3691_v5 = vsel %vm3593_vm3, %v591_v41, 0  ;;  %v8271_v48 = vsub.f32 %v3694_v14, %v8255_v11  ;;  %v8338_v41 = vand.u32 4294901760, %v3682_v43 }
 0x24f   : > { %v8276_v7 = vand.u32 4294901760, %v3691_v5 }
 0x250   : > { %6070 = vmatpush3.xpose.msra.mxu0 %v9963_v38  ;;  %6102 = vmatpush3.xpose.msra.mxu1 %v9868_v39  ;;  %v3646_v39 = vsel %vm3593_vm3, %v576_v37, 0  ;;  %v9480_v25 = vand.u32 4294901760, %v8271_v48  ;;  %v572_v38 = vld [vmem:[%s8240_s16 + $0x58] sm:$0xff]  ;;  %v8373_v27 = vsub.f32 %v3682_v43, %v8338_v41 }
 0x251   : > { %6071 = vmatprep.subr.mxu0 %v9964_v53  ;;  %6103 = vmatprep.subr.mxu1 %v9871_v54  ;;  %v590_v54 = vld [vmem:[%s8240_s16 + $0xe8] sm:$0xff]  ;;  %v587_v53 = vld [vmem:[%s8240_s16 + $0xd0] sm:$0xff]  ;;  %v3634_v23 = vsel %vm3593_vm3, %v572_v38, 0 }
 0x252   : > { %v3688_v12 = vsel %vm3593_vm3, %v590_v54, 0  ;;  %v8365_v6 = vand.u32 4294901760, %v3634_v23 }
 0x253   : > { %v8280_v62 = vand.u32 4294901760, %v3688_v12 }
 0x254   : > { %6072 = vmatpush3.xpose.msra.mxu0 %v9965_v3  ;;  %6104 = vmatpush3.xpose.msra.mxu1 %v9874_v40  ;;  %v8267_v40 = vand.u32 4294901760, %v3646_v39 }
 0x255   : > { %6073 = vmatprep.subr.mxu0 %v9966_v55  ;;  %6105 = vmatprep.subr.mxu1 %v9876_v2  ;;  %v574_v2 = vld [vmem:[%s8240_s16 + $0x68] sm:$0xff]  ;;  %v8304_v9 = vsub.f32 %v3688_v12, %v8280_v62  ;;  %v3679_v55 = vsel %vm3593_vm3, %v587_v53, 0 }
 0x256   : > { %v8287_v36 = vsub.f32 %v3646_v39, %v8267_v40  ;;  %v571_v39 = vld [vmem:[%s8240_s16 + $0x50] sm:$0xff] }
 0x257   : > { %v9474_v14 = vand.u32 4294901760, %v8304_v9 }
 0x258   : > { %6074 = vmatpush3.xpose.msra.mxu0 %v9967_v35  ;;  %6106 = vmatpush3.xpose.msra.mxu1 %v9878_v24  ;;  %v3640_v24 = vsel %vm3593_vm3, %v574_v2, 0  ;;  %v9479_v51 = vand.u32 4294901760, %v8287_v36 }
 0x259   : > { %6075 = vmatprep.subr.mxu0 %v9968_v61  ;;  %6107 = vmatprep.subr.mxu1 %v9881_v33  ;;  %v9970_v33 = vld [vmem:[#allocation127_spill] sm:$0xff]  ;;  %v8296_v28 = vand.u32 4294901760, %v3640_v24  ;;  %v3945_v2 = vsub.f32 %v8304_v9, %v9474_v14  ;;  %v586_v61 = vld [vmem:[%s8240_s16 + $0xc8] sm:$0xff] }
 0x25a   : > { %v3819_v3 = vsub.f32 %v8287_v36, %v9479_v51  ;;  %v3676_v53 = vsel %vm3593_vm3, %v586_v61, 0  ;;  %v9478_v61 = vand.u32 4294901760, %v8373_v27  ;;  %v567_v51 = vld [vmem:[%s8240_s16 + $0x30] sm:$0xff] }
 0x25b   : > { %v8318_v63 = vsub.f32 %v3640_v24, %v8296_v28 }
 0x25c   : > { %6076 = vmatpush3.xpose.msra.mxu0 %v9969_v31  ;;  %6108 = vmatpush3.xpose.msra.mxu1 %v9884_v56  ;;  %v8300_v56 = vsub.f32 %v3691_v5, %v8276_v7  ;;  %v3820_v24 = vand.u32 4294901760, %v3819_v3  ;;  %v8367_v31 = vand.u32 4294901760, %v3679_v55 }
 0x25d   : > { %6077 = vmatprep.subr.mxu0 %v9970_v33  ;;  %6109 = vmatprep.subr.mxu1 %v9886_v4  ;;  %v3931_v4 = vsub.f32 %v8271_v48, %v9480_v25  ;;  %v9472_v26 = vand.u32 4294901760, %v8318_v63  ;;  %v3631_v33 = vsel %vm3593_vm3, %v571_v39, 0 }
 0x25e   : > { %v9477_v17 = vand.u32 4294901760, %v8300_v56  ;;  %v8384_v43 = vand.u32 4294901760, %v3631_v33 }
 0x25f   : > { %v3932_v37 = vand.u32 4294901760, %v3931_v4  ;;  %v3833_v38 = vsub.f32 %v8318_v63, %v9472_v26 }
 0x260   : > { %6078 = vmatpush3.xpose.msra.mxu0 %v9971_v8  ;;  %6110 = vmatpush3.xpose.msra.mxu1 %v9888_v13  ;;  %v9475_v13 = vand.u32 4294901760, %v8294_v1  ;;  %v3938_v5 = vsub.f32 %v8300_v56, %v9477_v17  ;;  %v570_v8 = vld [vmem:[%s8240_s16 + $0x48] sm:$0xff]  ;;  %v568_v17 = vld [vmem:[%s8240_s16 + $0x38] sm:$0xff] }
 0x261   : > { %6111 = vmatprep.subr.mxu1 %v9890_v52  ;;  %6119 = vmatprep.subr.mxu0 %v8255_v11  ;;  %v8327_v52 = vand.u32 4294901760, %v3637_v59 }
 0x262   : > { %v3939_v4 = vand.u32 4294901760, %v3938_v5  ;;  %v3628_v5 = vsel %vm3593_vm3, %v570_v8, 0  ;;  %v3834_v8 = vand.u32 4294901760, %v3833_v38 }
 0x263   : > { %6080 = vmatmul.mubr.msk.f32.vlgmr.msra.gmra.mxu0 %vm609_vm1, %v7925_v10  ;;  %v8357_v12 = vsub.f32 %v3637_v59, %v8327_v52  ;;  %v8411_v26 = vand.u32 4294901760, %v3628_v5 }
 0x264   : > { %6112 = vmatpush3.xpose.msra.mxu1 %v9892_v29  ;;  %6120 = vmatpush3.xpose.msra.mxu0 %v8267_v40  ;;  %v8343_v29 = vsub.f32 %v3685_v46, %v8315_v22 }
 0x265   : > { %6081 = vmatprep.mubr.msk.f32.mxu0 %vm609_vm1, %v8051_v0  ;;  %6113 = vmatprep.subr.mxu1 %v9894_v57  ;;  %v3826_v57 = vsub.f32 %v8294_v1, %v9475_v13  ;;  %v9476_v39 = vand.u32 4294901760, %v8357_v12  ;;  %9972 = vst [vmem:[#allocation144_spill] sm:$0xff] %v8411_v26 }
 0x266   : > { %v1616_v54 = vpop.xlane.xlu1 %1615  ;;  %6121 = vmatprep.subr.mxu0 %v8276_v7  ;;  %v9473_v46 = vand.u32 4294901760, %v8343_v29 }
 0x267   : > { %v1617_v35 = vrot.slane %v1616_v54, 4  ;;  %6082 = vmatmul.mubr.msk.f32.gmra.mxu0 %vm609_vm1, %v8051_v0  ;;  %v3827_v59 = vand.u32 4294901760, %v3826_v57 }
 0x268   : > { %6114 = vmatpush3.xpose.msra.mxu1 %v9896_v45  ;;  %6122 = vmatpush3.xpose.msra.mxu0 %v8278_v49  ;;  %v585_v45 = vld [vmem:[%s8240_s16 + $0xc0] sm:$0xff] }
 0x269   : > { %v1618_v15 = vadd.f32 %v1617_v35, %v1616_v54  ;;  %6123 = vmatprep.subr.mxu0 %v8280_v62  ;;  %6155 = vmatprep.subr.mxu1 %v3932_v37  ;;  %v3946_v37 = vand.u32 4294901760, %v3945_v2  ;;  %v8389_v54 = vsub.f32 %v3634_v23, %v8365_v6  ;;  %v3673_v57 = vsel %vm3593_vm3, %v585_v45, 0 }
 0x26a   : > { %6151 = vmatprep.mubr.f32.mxu0 %v9821_v44  ;;  %v8394_v35 = vsub.f32 %v3679_v55, %v8367_v31  ;;  %v3952_v2 = vsub.f32 %v8343_v29, %v9473_v46  ;;  %v8402_v23 = vand.u32 4294901760, %v3676_v53  ;;  %v8409_v45 = vsub.f32 %v3631_v33, %v8384_v43 }
 0x26b   : > { %v1619_v3 = vrot.slane %v1618_v15, 2  ;;  %6116 = vmatmul.mubr.msk.f32.vlgmr.msra.gmra.mxu1 %vm609_vm1, %v7925_v10  ;;  %v9482_v38 = vand.u32 4294901760, %v8389_v54 }
 0x26c   : > { %6124 = vmatpush3.xpose.msra.mxu0 %v8296_v28  ;;  %6156 = vmatpush3.xpose.msra.mxu1 %v3820_v24  ;;  %v569_v24 = vld [vmem:[%s8240_s16 + $0x40] sm:$0xff]  ;;  %v3953_v14 = vand.u32 4294901760, %v3952_v2  ;;  %v8428_v13 = vsub.f32 %v3676_v53, %v8402_v23  ;;  %v583_v2 = vld [vmem:[%s8240_s16 + $0xb0] sm:$0xff] }
 0x26d   : > { %6117 = vmatprep.mubr.msk.f32.mxu1 %vm609_vm1, %v8051_v0  ;;  %6125 = vmatprep.subr.mxu0 %v8315_v22  ;;  %v1620_v10 = vadd.f32 %v1619_v3, %v1618_v15  ;;  %v8413_v15 = vand.u32 4294901760, %v3673_v57  ;;  %v584_v3 = vld [vmem:[%s8240_s16 + $0xb8] sm:$0xff]  ;;  %v3625_v33 = vsel %vm3593_vm3, %v569_v24, 0  ;;  %v8434_v24 = vsub.f32 %v3628_v5, %v8411_v26 }
 0x26e   : > { %6157 = vmatprep.subr.mxu1 %v3939_v4  ;;  %v3840_v4 = vsub.f32 %v8357_v12, %v9476_v39  ;;  %v3670_v39 = vsel %vm3593_vm3, %v584_v3, 0 }
 0x26f   : > { %6118 = vmatmul.mubr.msk.f32.gmra.mxu1 %vm609_vm1, %v8051_v0  ;;  %v1621_v55 = vrot.slane %v1620_v10, 1  ;;  %9973 = vst [vmem:[#allocation145_spill] sm:$0xff] %v8413_v15  ;;  %v9481_v0 = vand.u32 4294901760, %v8394_v35  ;;  %v9979_v42 = vand.u32 4294901760, %v8434_v24 }
 0x270   : > { %6126 = vmatpush3.xpose.msra.mxu0 %v8327_v52  ;;  %6158 = vmatpush3.xpose.msra.mxu1 %v3827_v59  ;;  %v3959_v59 = vsub.f32 %v8373_v27, %v9478_v61  ;;  %v3841_v53 = vand.u32 4294901760, %v3840_v4  ;;  %v8451_v61 = vand.u32 4294901760, %v3670_v39  ;;  %v3667_v4 = vsel %vm3593_vm3, %v583_v2, 0 }
 0x271   : > { %v1622_v46 = vadd.f32 %v1621_v55, %v1620_v10  ;;  %6127 = vmatprep.subr.mxu0 %v8338_v41  ;;  %6159 = vmatprep.subr.mxu1 %v3946_v37  ;;  %v8436_v10 = vand.u32 4294901760, %v3625_v33  ;;  %v9483_v37 = vand.u32 4294901760, %v8409_v45  ;;  %v8441_v55 = vsub.f32 %v3673_v57, %v8413_v15 }
 0x272   : > { %6187 = vmatprep.mubr.f32.mxu1 %v9821_v44  ;;  %v3966_v5 = vsub.f32 %v8394_v35, %v9481_v0  ;;  %v3960_v3 = vand.u32 4294901760, %v3959_v59  ;;  %9975 = vst [vmem:[#allocation154_spill] sm:$0xff] %v8451_v61  ;;  %v8473_v20 = vand.u32 4294901760, %v3667_v4  ;;  %v8477_v59 = vsub.f32 %v3670_v39, %v8451_v61 }
 0x273   : > { %6336 = vpush %v1622_v46  ;;  %9974 = vst [vmem:[#allocation147_spill] sm:$0xff] %v8436_v10  ;;  %v3847_v46 = vsub.f32 %v8389_v54, %v9482_v38  ;;  %v8458_v25 = vsub.f32 %v3625_v33, %v8436_v10  ;;  %v3854_v0 = vsub.f32 %v8409_v45, %v9483_v37  ;;  %v582_v38 = vld [vmem:[%s8240_s16 + $0xa8] sm:$0xff]  ;;  %v9977_v33 = vand.u32 4294901760, %v8428_v13 }
 0x274   : > { %6128 = vmatpush3.xpose.msra.mxu0 %v8365_v6  ;;  %6160 = vmatpush3.xpose.msra.mxu1 %v3834_v8  ;;  %v3622_v8 = vsel %vm3593_vm3, %v568_v17, 0  ;;  %v3967_v2 = vand.u32 4294901760, %v3966_v5  ;;  %9978 = vst [vmem:[#allocation149_spill] sm:$0xff] %v8473_v20  ;;  %v9980_v47 = vand.u32 4294901760, %v8441_v55 }
 0x275   : > { %6129 = vmatprep.subr.mxu0 %v8367_v31  ;;  %6161 = vmatprep.subr.mxu1 %v3953_v14  ;;  %v3848_v17 = vand.u32 4294901760, %v3847_v46  ;;  %v8467_v57 = vand.u32 4294901760, %v3622_v8  ;;  %v3973_v37 = vsub.f32 %v8428_v13, %v9977_v33  ;;  %v3619_v14 = vsel %vm3593_vm3, %v567_v51, 0 }
 0x276   : > { %v3664_v46 = vsel %vm3593_vm3, %v582_v38, 0  ;;  %v3855_v5 = vand.u32 4294901760, %v3854_v0  ;;  %v3980_v33 = vsub.f32 %v8441_v55, %v9980_v47  ;;  %v8493_v38 = vand.u32 4294901760, %v3619_v14 }
 0x277   : > { %9976 = vst [vmem:[#allocation156_spill] sm:$0xff] %v8467_v57  ;;  %v8491_v39 = vsub.f32 %v3622_v8, %v8467_v57  ;;  %v3616_v0 = vsel %vm3593_vm3, %v566_v19, 0  ;;  %v8498_v16 = vand.u32 4294901760, %v3664_v46  ;;  %v9493_v47 = vand.u32 4294901760, %v8477_v59  ;;  %v580_v8 = vld [vmem:[%s8240_s16 + $0x98] sm:$0xff] }
 0x278   : > { %6130 = vmatpush3.xpose.msra.mxu0 %v8384_v43  ;;  %6162 = vmatpush3.xpose.msra.mxu1 %v3841_v53  ;;  %v581_v53 = vld [vmem:[%s8240_s16 + $0xa0] sm:$0xff]  ;;  %9981 = vst [vmem:[#allocation150_spill] sm:$0xff] %v8493_v38  ;;  %v8502_v51 = vsub.f32 %v3667_v4, %v8473_v20  ;;  %v9984_v21 = vand.u32 4294901760, %v8458_v25  ;;  %v8515_v4 = vsub.f32 %v3619_v14, %v8493_v38  ;;  %v3658_v50 = vsel %vm3593_vm3, %v580_v8, 0  ;;  %v564_v14 = vld [vmem:[%s8240_s16 + $0x18] sm:$0xff] }
 0x279   : > { %6131 = vmatprep.subr.mxu0 %v8402_v23  ;;  %6163 = vmatprep.subr.mxu1 %v3960_v3  ;;  %v3861_v3 = vsub.f32 %v8434_v24, %v9979_v42  ;;  %v3661_v32 = vsel %vm3593_vm3, %v581_v53, 0  ;;  %v3974_v42 = vand.u32 4294901760, %v3973_v37  ;;  %9982 = vst [vmem:[#allocation151_spill] sm:$0xff] %v8498_v16  ;;  %v8509_v53 = vand.u32 4294901760, %v3616_v0 }
 0x27a   : > { %9983 = vst [vmem:[#allocation155_spill] sm:$0xff] %v8502_v51  ;;  %v3868_v19 = vsub.f32 %v8458_v25, %v9984_v21  ;;  %v8511_v58 = vand.u32 4294901760, %v3661_v32  ;;  %v3981_v37 = vand.u32 4294901760, %v3980_v33  ;;  %v3987_v21 = vsub.f32 %v8477_v59, %v9493_v47 }
 0x27b   : > { %v3862_v18 = vand.u32 4294901760, %v3861_v3  ;;  %v9990_v8 = vand.u32 4294901760, %v8491_v39  ;;  %v8543_v47 = vand.u32 4294901760, %v3658_v50 }
 0x27c   : > { %6132 = vmatpush3.xpose.msra.mxu0 %v8411_v26  ;;  %6164 = vmatpush3.xpose.msra.mxu1 %v3848_v17  ;;  %v565_v17 = vld [vmem:[%s8240_s16 + $0x20] sm:$0xff]  ;;  %9985 = vst [vmem:[#allocation148_spill] sm:$0xff] %v8511_v58  ;;  %v3869_v33 = vand.u32 4294901760, %v3868_v19  ;;  %v3988_v34 = vand.u32 4294901760, %v3987_v21 }
 0x27d   : > { %6133 = vmatprep.subr.mxu0 %v8413_v15  ;;  %6165 = vmatprep.subr.mxu1 %v3967_v2  ;;  %v3613_v3 = vsel %vm3593_vm3, %v565_v17, 0  ;;  %v8530_v2 = vsub.f32 %v3616_v0, %v8509_v53  ;;  %9991 = vst [vmem:[#allocation7_spill] sm:$0xff] %v8543_v47  ;;  %v3610_v0 = vsel %vm3593_vm3, %v564_v14, 0  ;;  %v3583_v15 = vadd.s32 14, %v9815_v60  ;;  %v578_v14 = vld [vmem:[%s8240_s16 + $0x88] sm:$0xff] }
 0x27e   : > { %v8532_v17 = vand.u32 4294901760, %v3613_v3  ;;  %v8557_v26 = vand.u32 4294901760, %v3610_v0 }
 0x27f   : > { %9987 = vst [vmem:[#allocation158_spill] sm:$0xff] %v8530_v2  ;;  %vm3585_vm1 = vcmp.eq.s32.totalorder %v9873_v30, %v3583_v15 }
 0x280   : > { %6134 = vmatpush3.xpose.msra.mxu0 %v8436_v10  ;;  %6166 = vmatpush3.xpose.msra.mxu1 %v3855_v5  ;;  %v8526_v5 = vsub.f32 %v3664_v46, %v8498_v16  ;;  %9988 = vst [vmem:[#allocation159_spill] sm:$0xff] %v8532_v17  ;;  %v3875_v46 = vsub.f32 %v8491_v39, %v9990_v8  ;;  %v563_v8 = vld [vmem:[%s8240_s16 + $0x10] sm:$0xff]  ;;  %9994 = vst [vmem:[#allocation8_spill] sm:$0xff] %v8557_v26 }
 0x281   : > { %6135 = vmatprep.subr.mxu0 %v8451_v61  ;;  %6167 = vmatprep.subr.mxu1 %v3974_v42  ;;  %v579_v42 = vld [vmem:[%s8240_s16 + $0x90] sm:$0xff]  ;;  %v8536_v61 = vsub.f32 %v3661_v32, %v8511_v58  ;;  %v9992_v32 = vand.u32 4294901760, %v8502_v51  ;;  %v8555_v19 = vsub.f32 %v3613_v3, %v8532_v17  ;;  %v8567_v3 = vsub.f32 %v3658_v50, %v8543_v47  ;;  %vm3588_vm5 = vmand %vm3585_vm1, %vm3586_vm4 }
 0x282   : > { %9986 = vst [vmem:[#allocation152_spill] sm:$0xff] %v8526_v5  ;;  %v3655_v10 = vsel %vm3593_vm3, %v579_v42, 0  ;;  %v9995_v42 = vand.u32 4294901760, %v8515_v4  ;;  %v8581_v50 = vsub.f32 %v3610_v0, %v8557_v26  ;;  %vm5192_vm1 = vcmask 7168  }
 0x283   : > { %9989 = vst [vmem:[#allocation6_spill] sm:$0xff] %v8536_v61  ;;  %9993 = vst [vmem:[#allocation157_spill] sm:$0xff] %v8555_v19  ;;  %v10002_v15 = vand.u32 4294901760, %v8567_v3 }
 0x284   : > { %6136 = vmatpush3.xpose.msra.mxu0 %v8467_v57  ;;  %6168 = vmatpush3.xpose.msra.mxu1 %v3862_v18  ;;  %v3994_v57 = vsub.f32 %v8502_v51, %v9992_v32  ;;  %v3876_v32 = vand.u32 4294901760, %v3875_v46  ;;  %v3882_v18 = vsub.f32 %v8515_v4, %v9995_v42  ;;  %9996 = vst [vmem:[#allocation9_spill] sm:$0xff] %v8567_v3  ;;  %v8573_v51 = vand.u32 4294901760, %v3655_v10 }
 0x285   : > { %6137 = vmatprep.subr.mxu0 %v8473_v20  ;;  %6169 = vmatprep.subr.mxu1 %v3981_v37  ;;  %v9997_v37 = vand.u32 4294901760, %v8526_v5  ;;  %v3652_v46 = vsel %vm3593_vm3, %v578_v14, 0  ;;  %v577_v14 = vld [vmem:[%s8240_s16 + $0x80] sm:$0xff] }
 0x286   : > { %v3995_v20 = vand.u32 4294901760, %v3994_v57 }
 0x287   : > { %v4001_v21 = vsub.f32 %v8526_v5, %v9997_v37  ;;  %v9999_v37 = vand.u32 4294901760, %v8536_v61 }
 0x288   : > { %6138 = vmatpush3.xpose.msra.mxu0 %v8493_v38  ;;  %6170 = vmatpush3.xpose.msra.mxu1 %v3869_v33  ;;  %v3607_v33 = vsel %vm3593_vm3, %v563_v8, 0  ;;  %v562_v38 = vld [vmem:[%s8240_s16 + $0x8] sm:$0xff] }
 0x289   : > { %6139 = vmatprep.subr.mxu0 %v8498_v16  ;;  %6171 = vmatprep.subr.mxu1 %v3988_v34  ;;  %v9998_v34 = vand.u32 4294901760, %v8530_v2  ;;  %v4008_v42 = vsub.f32 %v8536_v61, %v9999_v37  ;;  %v3883_v16 = vand.u32 4294901760, %v3882_v18  ;;  %v8592_v5 = vand.u32 4294901760, %v3607_v33 }
 0x28a   : > { %v3604_v37 = vsel %vm3593_vm3, %v562_v38, 0  ;;  %v8600_v61 = vsub.f32 %v3655_v10, %v8573_v51  ;;  %v3649_v18 = vsel %vm3593_vm3, %v577_v14, 0  ;;  %v4015_v38 = vsub.f32 %v8567_v3, %v10002_v15 }
 0x28b   : > { %v3889_v57 = vsub.f32 %v8530_v2, %v9998_v34  ;;  %v4002_v34 = vand.u32 4294901760, %v4001_v21  ;;  %v8596_v2 = vand.u32 4294901760, %v3652_v46  ;;  %v4009_v8 = vand.u32 4294901760, %v4008_v42 }
 0x28c   : > { %6140 = vmatpush3.xpose.msra.mxu0 %v8509_v53  ;;  %6172 = vmatpush3.xpose.msra.mxu1 %v3876_v32  ;;  %v561_v32 = vld [vmem:[%s8240_s16] sm:$0xff]  ;;  %v8614_v10 = vsub.f32 %v3607_v33, %v8592_v5  ;;  %v8619_v14 = vand.u32 4294901760, %v3604_v37  ;;  %v8625_v42 = vand.u32 4294901760, %v3649_v18  ;;  %s5478_s16 = sshll.u32 %s6508_s25, 1 }
 0x28d   : > { %6141 = vmatprep.subr.mxu0 %v8511_v58  ;;  %6173 = vmatprep.subr.mxu1 %v3995_v20  ;;  %10000 = vst [vmem:[#allocation10_spill] sm:$0xff] %v8596_v2  ;;  %v3890_v0 = vand.u32 4294901760, %v3889_v57  ;;  %v10001_v20 = vand.u32 4294901760, %v8555_v19  ;;  %v8622_v57 = vsel %vm3588_vm5, 1.0, %v9821_v44  ;;  %v8630_v33 = vsub.f32 %v3652_v46, %v8596_v2  ;;  %s5268_s20 = sadd.s32 %s6504_s24, %s5478_s16  ;;  %s6526_s16 = smov [#allocation2]  }
 0x28e   : > { %10003 = vst [vmem:[#allocation26_spill] sm:$0xff] %v8622_v57  ;;  %v3598_v15 = vsel %vm3593_vm3, %v8622_v57, 0  ;;  %v8636_v60 = vsub.f32 %v3604_v37, %v8619_v14  ;;  %v4016_v46 = vand.u32 4294901760, %v4015_v38  ;;  %v8650_v37 = vsub.f32 %v3649_v18, %v8625_v42  ;;  %s5479_s30 = sshll.u32 %s5268_s20, 4 }
 0x28f   : > { %v3896_v21 = vsub.f32 %v8555_v19, %v10001_v20  ;;  %s5270_s24 = scalar_lea.hbm %s9204_s6, %s5479_s30 }
 0x290   : > { %6142 = vmatpush3.xpose.msra.mxu0 %v8532_v17  ;;  %6174 = vmatpush3.xpose.msra.mxu1 %v3883_v16  ;;  %v3601_v16 = vsel %vm3593_vm3, %v561_v32, 0  ;;  %10004 = vst [vmem:[#allocation12_spill] sm:$0xff] %v8636_v60 }
 0x291   : > { %6143 = vmatprep.subr.mxu0 %v8543_v47  ;;  %6175 = vmatprep.subr.mxu1 %v4002_v34  ;;  %v3897_v58 = vand.u32 4294901760, %v3896_v21  ;;  %v10005_v34 = vand.u32 4294901760, %v8581_v50  ;;  %v8641_v20 = vand.u32 4294901760, %v3601_v16  ;;  %v10006_v21 = vand.u32 4294901760, %v8600_v61 }
 0x292   : > { %v8652_v47 = vsub.f32 %v3598_v15, %v3598_v15 }
 0x293   : > { %v3903_v30 = vsub.f32 %v8581_v50, %v10005_v34  ;;  %v8656_v32 = vsub.f32 %v3601_v16, %v8641_v20 }
 0x294   : > { %6144 = vmatpush3.xpose.msra.mxu0 %v8557_v26  ;;  %6176 = vmatpush3.xpose.msra.mxu1 %v3890_v0  ;;  %v4022_v26 = vsub.f32 %v8600_v61, %v10006_v21  ;;  %v9524_v0 = vand.u32 4294901760, %v8630_v33  ;;  %v9529_v21 = vand.u32 4294901760, %v8636_v60 }
 0x295   : > { %6145 = vmatprep.subr.mxu0 %v8573_v51  ;;  %6177 = vmatprep.subr.mxu1 %v4009_v8  ;;  %v3904_v34 = vand.u32 4294901760, %v3903_v30  ;;  %10007 = vst [vmem:[#allocation27_spill] sm:$0xff] %v8656_v32  ;;  %v10008_v8 = vand.u32 4294901760, %v8614_v10  ;;  %v8668_v30 = vand.u32 4294901760, %v8652_v47 }
 0x296   : > { %v4023_v18 = vand.u32 4294901760, %v4022_v26  ;;  %v4029_v15 = vsub.f32 %v8630_v33, %v9524_v0 }
 0x297   : > { %v3910_v38 = vsub.f32 %v8614_v10, %v10008_v8  ;;  %v3917_v8 = vsub.f32 %v8636_v60, %v9529_v21  ;;  %v10020_v21 = vld [vmem:[#allocation151_spill] sm:$0xff] }
 0x298   : > { %6146 = vmatpush3.xpose.msra.mxu0 %v8592_v5  ;;  %6178 = vmatpush3.xpose.msra.mxu1 %v3897_v58  ;;  %v9527_v58 = vand.u32 4294901760, %v8650_v37  ;;  %v4030_v26 = vand.u32 4294901760, %v4029_v15 }
 0x299   : > { %6147 = vmatprep.subr.mxu0 %v8596_v2  ;;  %6179 = vmatprep.subr.mxu1 %v4016_v46  ;;  %v3911_v16 = vand.u32 4294901760, %v3910_v38  ;;  %v9528_v46 = vand.u32 4294901760, %v8656_v32  ;;  %v3807_v2 = vsub.f32 %v8652_v47, %v8668_v30 }
 0x29a   : > { %v4036_v0 = vsub.f32 %v8650_v37, %v9527_v58 }
 0x29b   : > { %v3924_v38 = vsub.f32 %v8656_v32, %v9528_v46  ;;  %v3808_v15 = vand.u32 4294901760, %v3807_v2  ;;  %v10009_v2 = vld [vmem:[#allocation144_spill] sm:$0xff]  ;;  %v10019_v46 = vld [vmem:[#allocation150_spill] sm:$0xff] }
 0x29c   : > { %6148 = vmatpush3.xpose.msra.mxu0 %v8619_v14  ;;  %6180 = vmatpush3.xpose.msra.mxu1 %v3904_v34  ;;  %v3918_v34 = vand.u32 4294901760, %v3917_v8  ;;  %v10013_v8 = vld [vmem:[#allocation152_spill] sm:$0xff] }
 0x29d   : > { %6149 = vmatprep.subr.mxu0 %v8625_v42  ;;  %6181 = vmatprep.subr.mxu1 %v4023_v18  ;;  %v4037_v18 = vand.u32 4294901760, %v4036_v0  ;;  %v3925_v58 = vand.u32 4294901760, %v3924_v38  ;;  %v10010_v0 = vld [vmem:[#allocation155_spill] sm:$0xff]  ;;  %v10016_v38 = vld [vmem:[#allocation156_spill] sm:$0xff] }
 0x2a0   : > { %6150 = vmatpush3.xpose.msra.mxu0 %v8641_v20  ;;  %6182 = vmatpush3.xpose.msra.mxu1 %v3911_v16  ;;  %v10012_v16 = vld [vmem:[#allocation147_spill] sm:$0xff] }
 0x2a1   : > { %6183 = vmatprep.subr.mxu1 %v4030_v26  ;;  %6191 = vmatprep.subr.mxu0 %v8271_v48  ;;  %v10014_v26 = vld [vmem:[#allocation154_spill] sm:$0xff] }
 0x2a3   : > { %6152 = vmatmul.mubr.f32.vlgmr.msra.gmra.mxu0 %v9821_v44 }
 0x2a4   : > { %6184 = vmatpush3.xpose.msra.mxu1 %v3918_v34  ;;  %6192 = vmatpush3.xpose.msra.mxu0 %v8287_v36  ;;  %v10015_v34 = vld [vmem:[#allocation158_spill] sm:$0xff]  ;;  %s6337_s17 = spop %6336 }
 0x2a5   : > { %6185 = vmatprep.subr.mxu1 %v4037_v18  ;;  %6193 = vmatprep.subr.mxu0 %v8300_v56  ;;  %v10017_v18 = vld [vmem:[#allocation6_spill] sm:$0xff] }
 0x2a6   : > { %6153 = vmatprep.mubr.f32.mxu0 %v3808_v15 }
 0x2a7   : > { %6154 = vmatmul.mubr.f32.gmra.mxu0 %v3808_v15  ;;  %v10018_v15 = vld [vmem:[#allocation149_spill] sm:$0xff] }
 0x2a8   : > { %6186 = vmatpush3.xpose.msra.mxu1 %v3925_v58  ;;  %6194 = vmatpush3.xpose.msra.mxu0 %v8294_v1  ;;  %v10011_v58 = vld [vmem:[#allocation145_spill] sm:$0xff] }
 0x2a9   : > { %6195 = vmatprep.subr.mxu0 %v8304_v9  ;;  %6227 = vmatprep.subr.mxu1 %v8255_v11 }
 0x2aa   : > { %6223 = vmatprep.mubr.f32.mxu0 %v9821_v44 }
 0x2ab   : > { %6188 = vmatmul.mubr.f32.vlgmr.msra.gmra.mxu1 %v9821_v44 }
 0x2ac   : > { %6196 = vmatpush3.xpose.msra.mxu0 %v8318_v63  ;;  %6228 = vmatpush3.xpose.msra.mxu1 %v8267_v40 }
 0x2ad   : > { %6197 = vmatprep.subr.mxu0 %v8343_v29  ;;  %6229 = vmatprep.subr.mxu1 %v8276_v7 }
 0x2ae   : > { %6189 = vmatprep.mubr.msk.f32.mxu1 %vm3593_vm3, %v8622_v57 }
 0x2af   : > { %6190 = vmatmul.mubr.msk.f32.gmra.mxu1 %vm3593_vm3, %v8622_v57  ;;  %v10021_v57 = vld [vmem:[#allocation148_spill] sm:$0xff] }
 0x2b0   : > { %6198 = vmatpush3.xpose.msra.mxu0 %v8357_v12  ;;  %6230 = vmatpush3.xpose.msra.mxu1 %v8278_v49 }
 0x2b1   : > { %6199 = vmatprep.subr.mxu0 %v8373_v27  ;;  %6231 = vmatprep.subr.mxu1 %v8280_v62 }
 0x2b2   : > { %6259 = vmatprep.mubr.f32.mxu1 %v9821_v44 }
 0x2b4   : > { %6200 = vmatpush3.xpose.msra.mxu0 %v8389_v54  ;;  %6232 = vmatpush3.xpose.msra.mxu1 %v8296_v28 }
 0x2b5   : > { %6201 = vmatprep.subr.mxu0 %v8394_v35  ;;  %6233 = vmatprep.subr.mxu1 %v8315_v22 }
 0x2b8   : > { %6202 = vmatpush3.xpose.msra.mxu0 %v8409_v45  ;;  %6234 = vmatpush3.xpose.msra.mxu1 %v8327_v52 }
 0x2b9   : > { %6203 = vmatprep.subr.mxu0 %v8428_v13  ;;  %6235 = vmatprep.subr.mxu1 %v8338_v41 }
 0x2bc   : > { %6204 = vmatpush3.xpose.msra.mxu0 %v8434_v24  ;;  %6236 = vmatpush3.xpose.msra.mxu1 %v8365_v6 }
 0x2bd   : > { %6205 = vmatprep.subr.mxu0 %v8441_v55  ;;  %6237 = vmatprep.subr.mxu1 %v8367_v31 }
 0x2c0   : > { %6206 = vmatpush3.xpose.msra.mxu0 %v8458_v25  ;;  %6238 = vmatpush3.xpose.msra.mxu1 %v8384_v43 }
 0x2c1   : > { %6207 = vmatprep.subr.mxu0 %v8477_v59  ;;  %6239 = vmatprep.subr.mxu1 %v8402_v23 }
 0x2c4   : > { %6208 = vmatpush3.xpose.msra.mxu0 %v8491_v39  ;;  %6240 = vmatpush3.xpose.msra.mxu1 %v10009_v2 }
 0x2c5   : > { %6209 = vmatprep.subr.mxu0 %v10010_v0  ;;  %6241 = vmatprep.subr.mxu1 %v10011_v58 }
 0x2c8   : > { %6210 = vmatpush3.xpose.msra.mxu0 %v8515_v4  ;;  %6242 = vmatpush3.xpose.msra.mxu1 %v10012_v16 }
 0x2c9   : > { %6211 = vmatprep.subr.mxu0 %v10013_v8  ;;  %6243 = vmatprep.subr.mxu1 %v10014_v26 }
 0x2cc   : > { %6212 = vmatpush3.xpose.msra.mxu0 %v10015_v34  ;;  %6244 = vmatpush3.xpose.msra.mxu1 %v10016_v38 }
 0x2cd   : > { %6213 = vmatprep.subr.mxu0 %v10017_v18  ;;  %6245 = vmatprep.subr.mxu1 %v10018_v15 }
 0x2d0   : > { %6214 = vmatpush3.xpose.msra.mxu0 %v8555_v19  ;;  %6246 = vmatpush3.xpose.msra.mxu1 %v10019_v46  ;;  %v10022_v19 = vld [vmem:[#allocation7_spill] sm:$0xff] }
 0x2d1   : > { %6215 = vmatprep.subr.mxu0 %v8567_v3  ;;  %6247 = vmatprep.subr.mxu1 %v10020_v21  ;;  %v10023_v3 = vld [vmem:[#allocation8_spill] sm:$0xff] }
 0x2d4   : > { %6216 = vmatpush3.xpose.msra.mxu0 %v8581_v50  ;;  %6248 = vmatpush3.xpose.msra.mxu1 %v8509_v53 }
 0x2d5   : > { %6217 = vmatprep.subr.mxu0 %v8600_v61  ;;  %6249 = vmatprep.subr.mxu1 %v10021_v57  ;;  %v10024_v57 = vld [vmem:[#allocation10_spill] sm:$0xff] }
 0x2d8   : > { %6218 = vmatpush3.xpose.msra.mxu0 %v8614_v10  ;;  %6250 = vmatpush3.xpose.msra.mxu1 %v8532_v17  ;;  %v10025_v17 = vand.u32 4294901760, %v8271_v48  ;;  %v10028_v48 = vand.u32 4294901760, %v8294_v1  ;;  %v10033_v1 = vand.u32 4294901760, %v8373_v27  ;;  %v10049_v27 = vld [vmem:[#allocation157_spill] sm:$0xff] }
 0x2d9   : > { %6219 = vmatprep.subr.mxu0 %v8630_v33  ;;  %6251 = vmatprep.subr.mxu1 %v10022_v19 }
 0x2dc   : > { %6220 = vmatpush3.xpose.msra.mxu0 %v8636_v60  ;;  %6252 = vmatpush3.xpose.msra.mxu1 %v10023_v3  ;;  %v10026_v60 = vand.u32 4294901760, %v8287_v36  ;;  %v10031_v36 = vand.u32 4294901760, %v8343_v29  ;;  %v594_v29 = vld [vmem:[%s490_s29] sm:$0x3] }
 0x2dd   : > { %6221 = vmatprep.subr.mxu0 %v8650_v37  ;;  %6253 = vmatprep.subr.mxu1 %v8573_v51 }
 0x2e0   : > { %6222 = vmatpush3.xpose.msra.mxu0 %v8656_v32  ;;  %6254 = vmatpush3.xpose.msra.mxu1 %v8592_v5  ;;  %v10027_v32 = vand.u32 4294901760, %v8300_v56  ;;  %v10036_v56 = vand.u32 4294901760, %v8409_v45  ;;  %v10053_v45 = vld [vmem:[#allocation143_spill] sm:$0xff] }
 0x2e1   : > { %6255 = vmatprep.subr.mxu1 %v10024_v57  ;;  %6263 = vmatprep.subr.mxu0 %v10025_v17  ;;  %v10029_v17 = vand.u32 4294901760, %v8304_v9  ;;  %v10040_v9 = vand.u32 4294901760, %v8458_v25  ;;  %v10044_v25 = vand.u32 4294901760, %v8515_v4  ;;  %v10058_v4 = vand.u32 4294901760, %v8600_v61 }
 0x2e3   : > { %6224 = vmatmul.mubr.f32.vlgmr.msra.gmra.mxu0 %v9821_v44 }
 0x2e4   : > { %6256 = vmatpush3.xpose.msra.mxu1 %v8619_v14  ;;  %6264 = vmatpush3.xpose.msra.mxu0 %v10026_v60  ;;  %v10030_v60 = vand.u32 4294901760, %v8318_v63  ;;  %v10042_v63 = vand.u32 4294901760, %v8491_v39  ;;  %v10057_v39 = vand.u32 4294901760, %v8581_v50 }
 0x2e5   : > { %6225 = vmatprep.mubr.f32.mxu0 %v8652_v47  ;;  %6257 = vmatprep.subr.mxu1 %v8625_v42 }
 0x2e6   : > { %6265 = vmatprep.subr.mxu0 %v10027_v32  ;;  %v10059_v32 = vld [vmem:[#allocation148_spill] sm:$0xff] }
 0x2e7   : > { %6226 = vmatmul.mubr.f32.gmra.mxu0 %v8652_v47 }
 0x2e8   : > { %6258 = vmatpush3.xpose.msra.mxu1 %v8641_v20  ;;  %6266 = vmatpush3.xpose.msra.mxu0 %v10028_v48  ;;  %v10068_v48 = vld [vmem:[#allocation27_spill] sm:$0xff] }
 0x2e9   : > { %6267 = vmatprep.subr.mxu0 %v10029_v17  ;;  %6299 = vmatprep.subr.mxu1 %v8255_v11  ;;  %v10032_v11 = vand.u32 4294901760, %v8357_v12  ;;  %v10047_v12 = vand.u32 4294901760, %v10017_v18  ;;  %v10069_v17 = vand.u32 4294901760, %v10068_v48 }
 0x2ea   : > { %6295 = vmatprep.mubr.f32.mxu0 %v9821_v44 }
 0x2eb   : > { %6260 = vmatmul.mubr.f32.vlgmr.msra.gmra.mxu1 %v9821_v44 }
 0x2ec   : > { %6268 = vmatpush3.xpose.msra.mxu0 %v10030_v60  ;;  %6300 = vmatpush3.xpose.msra.mxu1 %v8267_v40  ;;  %v10034_v40 = vand.u32 4294901760, %v8389_v54  ;;  %v10051_v54 = vld [vmem:[#allocation9_spill] sm:$0xff] }
 0x2ed   : > { %6261 = vmatprep.mubr.f32.mxu1 %v8668_v30  ;;  %6269 = vmatprep.subr.mxu0 %v10031_v36  ;;  %v6523_v36 = vmov 1.0  }
 0x2ee   : > { %6301 = vmatprep.subr.mxu1 %v8276_v7  ;;  %v10035_v7 = vand.u32 4294901760, %v8394_v35  ;;  %v10052_v35 = vand.u32 4294901760, %v10051_v54 }
 0x2ef   : > { %6262 = vmatmul.mubr.f32.gmra.mxu1 %v8668_v30 }
 0x2f0   : > { %6270 = vmatpush3.xpose.msra.mxu0 %v10032_v11  ;;  %6302 = vmatpush3.xpose.msra.mxu1 %v8278_v49  ;;  %v10037_v49 = vand.u32 4294901760, %v8428_v13  ;;  %v10043_v13 = vand.u32 4294901760, %v10010_v0  ;;  %v10064_v0 = vand.u32 4294901760, %v8630_v33  ;;  %v10067_v33 = vand.u32 4294901760, %v8650_v37  ;;  %v10070_v11 = vld [vmem:[#allocation26_spill] sm:$0xff] }
 0x2f1   : > { %6271 = vmatprep.subr.mxu0 %v10033_v1  ;;  %6303 = vmatprep.subr.mxu1 %v8280_v62  ;;  %v10038_v62 = vand.u32 4294901760, %v8434_v24  ;;  %v4607_v24 = vrot.slane %v594_v29, %v10053_v45  ;;  %v10085_v45 = vld [vmem:[#allocation139_spill] sm:$0xff] }
 0x2f2   : > { %6331 = vmatprep.mubr.f32.mxu1 %v9821_v44 }
 0x2f4   : > { %6272 = vmatpush3.xpose.msra.mxu0 %v10034_v40  ;;  %6304 = vmatpush3.xpose.msra.mxu1 %v8296_v28  ;;  %v10039_v28 = vand.u32 4294901760, %v8441_v55  ;;  %v10054_v55 = vld [vmem:[#allocation134_spill] sm:$0xff] }
 0x2f5   : > { %6273 = vmatprep.subr.mxu0 %v10035_v7  ;;  %6305 = vmatprep.subr.mxu1 %v8315_v22  ;;  %v10041_v22 = vand.u32 4294901760, %v8477_v59  ;;  %vm8861_vm8 = vcmp.eq.s32.totalorder %v10054_v55, %v4607_v24  ;;  %vm5205_vm4 = vcmp.ge.s32.totalorder %v10054_v55, 4 }
 0x2f8   : > { %6274 = vmatpush3.xpose.msra.mxu0 %v10036_v56  ;;  %6306 = vmatpush3.xpose.msra.mxu1 %v8327_v52  ;;  %v10045_v52 = vand.u32 4294901760, %v10013_v8 }
 0x2f9   : > { %6275 = vmatprep.subr.mxu0 %v10037_v49  ;;  %6307 = vmatprep.subr.mxu1 %v8338_v41  ;;  %v10046_v41 = vand.u32 4294901760, %v10015_v34  ;;  %v10065_v34 = vld [vmem:[#allocation12_spill] sm:$0xff]  ;;  %v8937_v49 = vpop.f32.mrf.mxu1 }
 0x2fc   : > { %6276 = vmatpush3.xpose.msra.mxu0 %v10038_v62  ;;  %6308 = vmatpush3.xpose.msra.mxu1 %v8365_v6  ;;  %v10048_v6 = vld [vmem:[#allocation136_spill] sm:$0xff] }
 0x2fd   : > { %6277 = vmatprep.subr.mxu0 %v10039_v28  ;;  %6309 = vmatprep.subr.mxu1 %v8367_v31  ;;  %v4611_v31 = vrot.slane %v594_v29, %v10048_v6  ;;  %v8941_v28 = vpop.f32.mrf.mxu1 }
 0x2ff   : > { %vm8847_vm7 = vcmp.eq.s32.totalorder %v10054_v55, %v4611_v31 }
 0x300   : > { %6278 = vmatpush3.xpose.msra.mxu0 %v10040_v9  ;;  %6310 = vmatpush3.xpose.msra.mxu1 %v8384_v43  ;;  %v10050_v43 = vand.u32 4294901760, %v10049_v27  ;;  %v5467_v30 = vsel %vm8847_vm7, 1.0, %v9821_v44 }
 0x301   : > { %6279 = vmatprep.subr.mxu0 %v10041_v22  ;;  %6311 = vmatprep.subr.mxu1 %v8402_v23  ;;  %v595_v23 = vld [vmem:[%s496_s14] sm:$0xff]  ;;  %v8945_v22 = vpop.f32.mrf.mxu1 }
 0x302   : > { %v4620_v47 = vsel %vm4618_vm6, %v595_v23, 0 }
 0x303   : > { %v8865_v50 = vand.u32 4294901760, %v4620_v47 }
 0x304   : > { %6280 = vmatpush3.xpose.msra.mxu0 %v10042_v63  ;;  %6312 = vmatpush3.xpose.msra.mxu1 %v10009_v2  ;;  %v10063_v2 = vld [vmem:[#allocation159_spill] sm:$0xff] }
 0x305   : > { %6281 = vmatprep.subr.mxu0 %v10043_v13  ;;  %6313 = vmatprep.subr.mxu1 %v10011_v58  ;;  %v4745_v58 = vsub.f32 %v5467_v30, %v5467_v30  ;;  %v4693_v8 = vsub.f32 %v4620_v47, %v8865_v50 }
 0x307   : > { %v4694_v18 = vand.u32 4294901760, %v4693_v8 }
 0x308   : > { %6282 = vmatpush3.xpose.msra.mxu0 %v10044_v25  ;;  %6314 = vmatpush3.xpose.msra.mxu1 %v10012_v16  ;;  %v5466_v16 = vsel %vm8861_vm8, 1.0, %v9821_v44 }
 0x309   : > { %6283 = vmatprep.subr.mxu0 %v10045_v52  ;;  %6315 = vmatprep.subr.mxu1 %v10014_v26 }
 0x30c   : > { %6284 = vmatpush3.xpose.msra.mxu0 %v10046_v41  ;;  %6316 = vmatpush3.xpose.msra.mxu1 %v10016_v38  ;;  %v4751_v38 = vsub.f32 %v5466_v16, %v5466_v16 }
 0x30d   : > { %6285 = vmatprep.subr.mxu0 %v10047_v12  ;;  %6317 = vmatprep.subr.mxu1 %v10018_v15 }
 0x30e   : > { %v4752_v60 = vand.u32 4294901760, %v4751_v38 }
 0x310   : > { %6286 = vmatpush3.xpose.msra.mxu0 %v10050_v43  ;;  %6318 = vmatpush3.xpose.msra.mxu1 %v10019_v46  ;;  %v4753_v1 = vsub.f32 %v4751_v38, %v4752_v60 }
 0x311   : > { %6287 = vmatprep.subr.mxu0 %v10052_v35  ;;  %6319 = vmatprep.subr.mxu1 %v10020_v21  ;;  %v596_v21 = vld [vmem:[%s496_s14 + $0x8] sm:$0xff] }
 0x312   : > { %v4623_v61 = vsel %vm4618_vm6, %v596_v21, 0 }
 0x313   : > { %v8877_v26 = vand.u32 4294901760, %v4623_v61 }
 0x314   : > { %6288 = vmatpush3.xpose.msra.mxu0 %v10057_v39  ;;  %6320 = vmatpush3.xpose.msra.mxu1 %v8509_v53  ;;  %v10062_v53 = vand.u32 4294901760, %v8614_v10  ;;  %v10066_v10 = vand.u32 4294901760, %v10065_v34 }
 0x315   : > { %6289 = vmatprep.subr.mxu0 %v10058_v4  ;;  %6321 = vmatprep.subr.mxu1 %v10059_v32  ;;  %v4704_v15 = vsub.f32 %v4623_v61, %v8877_v26 }
 0x317   : > { %v4705_v37 = vand.u32 4294901760, %v4704_v15 }
 0x318   : > { %6290 = vmatpush3.xpose.msra.mxu0 %v10062_v53  ;;  %6322 = vmatpush3.xpose.msra.mxu1 %v10063_v2 }
 0x319   : > { %6291 = vmatprep.subr.mxu0 %v10064_v0  ;;  %6323 = vmatprep.subr.mxu1 %v10022_v19  ;;  %v4746_v19 = vand.u32 4294901760, %v4745_v58  ;;  %v4706_v40 = vsub.f32 %v4704_v15, %v4705_v37 }
 0x31c   : > { %6292 = vmatpush3.xpose.msra.mxu0 %v10066_v10  ;;  %6324 = vmatpush3.xpose.msra.mxu1 %v10023_v3  ;;  %v4747_v3 = vsub.f32 %v4745_v58, %v4746_v19 }
 0x31d   : > { %6293 = vmatprep.subr.mxu0 %v10067_v33  ;;  %6325 = vmatprep.subr.mxu1 %v8573_v51  ;;  %v4695_v51 = vsub.f32 %v4693_v8, %v4694_v18 }
 0x320   : > { %6294 = vmatpush3.xpose.msra.mxu0 %v10069_v17  ;;  %6326 = vmatpush3.xpose.msra.mxu1 %v8592_v5  ;;  %v4748_v5 = vand.u32 4294901760, %v4747_v3 }
 0x321   : > { %6327 = vmatprep.subr.mxu1 %v10024_v57  ;;  %5468 = vmatprep.subr.msk.mxu0 %vm8847_vm7, %v6523_v36  ;;  %v4696_v57 = vand.u32 4294901760, %v4695_v51  ;;  %v6524_v51 = vmov 1966171168  }
 0x323   : > { %6296 = vmatmul.mubr.f32.vlgmr.msra.gmra.mxu0 %v9821_v44 }
 0x324   : > { %6328 = vmatpush3.xpose.msra.mxu1 %v8619_v14  ;;  %6297 = vmatprep.mubr.msk.f32.mxu0 %vm3593_vm3, %v10070_v11  ;;  %v4754_v14 = vand.u32 4294901760, %v4753_v1 }
 0x325   : > { %6329 = vmatprep.subr.mxu1 %v8625_v42  ;;  %5469 = vmatpush1.msk.msra.mxu0 %vm8861_vm8, %v6523_v36  ;;  %v4707_v42 = vand.u32 4294901760, %v4706_v40  ;;  %v10083_v40 = vld [vmem:[#allocation138_spill] sm:$0xff] }
 0x326   : > { %4835 = vmatprep.subr.mxu0 %v4745_v58 }
 0x327   : > { %6298 = vmatmul.mubr.msk.f32.gmra.mxu0 %vm3593_vm3, %v10070_v11 }
 0x328   : > { %6330 = vmatpush3.xpose.msra.mxu1 %v8641_v20  ;;  %4691 = vmatprep.mubr.f32.mxu0 %v9821_v44  ;;  %v2269_v20 = vpop.f32.mrf.mxu0 }
 0x329   : > { %4749 = vmatprep.subr.mxu1 %v4748_v5 }
 0x32a   : > { %v8933_v7 = vpop.f32.mrf.mxu0 }
 0x32b   : > { %6332 = vmatmul.mubr.f32.vlgmr.msra.gmra.mxu1 %v9821_v44  ;;  %4697 = vmatmul.mubr.f32.vlgmr.msra.gmra.mxu0 %v4696_v57 }
 0x32c   : > { %4755 = vmatpush1.msra.mxu1 %v4754_v14  ;;  %6333 = vmatprep.mubr.msk.f32.mxu1 %vm3593_vm3, %v10070_v11  ;;  %v8935_v56 = vpop.f32.mrf.mxu0  ;;  %v10084_v14 = vld [vmem:[#allocation140_spill] sm:$0xff] }
 0x32d   : > { %4702 = vmatprep.mubr.f32.mxu0 %v9821_v44  ;;  %4838 = vmatpush1.msra.mxu0 %v4751_v38 }
 0x32e   : > { %5470 = vmatprep.subr.msk.mxu1 %vm8847_vm7, %v6523_v36  ;;  %5006 = vmatprep.subr.mxu0 %v4746_v19  ;;  %v8939_v62 = vpop.f32.mrf.mxu0 }
 0x32f   : > { %6334 = vmatmul.mubr.msk.f32.gmra.mxu1 %vm3593_vm3, %v10070_v11  ;;  %4708 = vmatmul.mubr.f32.gmra.mxu0 %v4707_v42  ;;  %v2262_v42 = vadd.f32 %v10084_v14, %v10083_v40  ;;  %vm5188_vm3 = vcmp.lt.s32.totalorder %v10054_v55, 4 }
 0x330   : > { %4788 = vmatprep.mubr.f32.mxu1 %v9821_v44  ;;  %4871 = vmatprep.mubr.f32.mxu0 %v9821_v44  ;;  %v8943_v9 = vpop.f32.mrf.mxu0 }
 0x332   : > { %v8947_v63 = vpop.f32.mrf.mxu0 }
 0x333   : > { %4790 = vmatmul.mubr.f32.vlgmr.msra.gmra.mxu1 %v8865_v50  ;;  %4874 = vmatmul.mubr.f32.vlgmr.msra.gmra.mxu0 %v4693_v8 }
 0x334   : > { %5471 = vmatpush1.msk.msra.mxu1 %vm8861_vm8, %v6523_v36  ;;  %4795 = vmatprep.mubr.f32.mxu1 %v9821_v44  ;;  %v8951_v13 = vpop.f32.mrf.mxu0 }
 0x335   : > { %4879 = vmatprep.mubr.f32.mxu0 %v9821_v44  ;;  %5010 = vmatpush1.msra.mxu0 %v4752_v60 }
 0x336   : > { %5472 = vmatprep.subr.msk.mxu1 %vm8847_vm7, %v6523_v36  ;;  %v8955_v52 = vpop.f32.mrf.mxu0 }
 0x337   : > { %4797 = vmatmul.mubr.f32.gmra.mxu1 %v8877_v26  ;;  %4882 = vmatmul.mubr.f32.gmra.mxu0 %v4704_v15 }
 0x338   : > { %4954 = vmatprep.mubr.f32.mxu1 %v9821_v44  ;;  %5043 = vmatprep.mubr.f32.mxu0 %v9821_v44  ;;  %v8959_v29 = vpop.f32.mrf.mxu0 }
 0x33a   : > { %v8963_v31 = vpop.f32.mrf.mxu0 }
 0x33b   : > { %4958 = vmatmul.mubr.f32.vlgmr.msra.gmra.mxu1 %v4694_v18  ;;  %5045 = vmatmul.mubr.f32.vlgmr.msra.gmra.mxu0 %v8865_v50 }
 0x33c   : > { %5473 = vmatpush1.msk.msra.mxu1 %vm8861_vm8, %v6523_v36  ;;  %4963 = vmatprep.mubr.f32.mxu1 %v9821_v44  ;;  %v8967_v43 = vpop.f32.mrf.mxu0 }
 0x33d   : > { %5050 = vmatprep.mubr.f32.mxu0 %v9821_v44 }
 0x33e   : > { %v8971_v35 = vpop.f32.mrf.mxu0 }
 0x33f   : > { %4967 = vmatmul.mubr.f32.gmra.mxu1 %v4705_v37  ;;  %5052 = vmatmul.mubr.f32.gmra.mxu0 %v8877_v26  ;;  %v1629_v37 = vunpack.c.l.s4 %v6524_v51 }
 0x340   : > { %5124 = vmatprep.mubr.f32.mxu1 %v9821_v44  ;;  %v8975_v24 = vpop.f32.mrf.mxu0 }
 0x341   : > { %v1630_v6 = vunpack.c.0.s8 %v1629_v37 }
 0x342   : > { %v8979_v39 = vpop.f32.mrf.mxu0 }
 0x343   : > { %5126 = vmatmul.mubr.f32.vlgmr.msra.gmra.mxu1 %v8865_v50 }
 0x344   : > { %5131 = vmatprep.mubr.f32.mxu1 %v9821_v44  ;;  %v8949_v44 = vpop.f32.mrf.mxu1  ;;  %v8983_v4 = vpop.f32.mrf.mxu0 }
 0x346   : > { %v8953_v25 = vpop.f32.mrf.mxu1  ;;  %v8987_v21 = vpop.f32.mrf.mxu0 }
 0x347   : > { %5133 = vmatmul.mubr.f32.gmra.mxu1 %v8877_v26  ;;  %10071 = vst [vmem:[#allocation18_spill] sm:$0xff] %v8987_v21 }
 0x348   : > { %v8957_v41 = vpop.f32.mrf.mxu1  ;;  %v8991_v46 = vpop.f32.mrf.mxu0 }
 0x349   : > { %10073 = vst [vmem:[#allocation20_spill] sm:$0xff] %v8991_v46 }
 0x34a   : > { %v8961_v12 = vpop.f32.mrf.mxu1 }
 0x34c   : > { %v8965_v27 = vpop.f32.mrf.mxu1 }
 0x34e   : > { %v8969_v54 = vpop.f32.mrf.mxu1 }
 0x350   : > { %v8973_v23 = vpop.f32.mrf.mxu1 }
 0x352   : > { %v8977_v59 = vpop.f32.mrf.mxu1 }
 0x354   : > { %v8981_v47 = vpop.f32.mrf.mxu1 }
 0x356   : > { %v8985_v32 = vpop.f32.mrf.mxu1 }
 0x358   : > { %v8989_v30 = vpop.f32.mrf.mxu1 }
 0x359   : > { %10072 = vst [vmem:[#allocation29_spill] sm:$0xff] %v8989_v30  ;;  %v1633_v30 = vsub.s32 %v1630_v6, %v10054_v55 }
 0x35a   : > { %v8993_v50 = vpop.f32.mrf.mxu1 }
 0x35b   : > { %10074 = vst [vmem:[#allocation33_spill] sm:$0xff] %v8993_v50  ;;  %v9537_v50 = vmov 0  }
 0x35c   : > { %v8997_v2 = vpop.f32.mrf.mxu1  ;;  %v1625_v51 = vsel %vm604_vm14, 1, %v9537_v50 }
 0x35d   : > { %10075 = vst [vmem:[#allocation24_spill] sm:$0xff] %v8997_v2 }
 0x35e   : > { %v9003_v58 = vpop.f32.mrf.mxu1 }
 0x35f   : > { %10076 = vst [vmem:[#allocation36_spill] sm:$0xff] %v9003_v58  ;;  %v2270_v58 = vadd.f32 %v2269_v20, %v10085_v45  ;;  %v10090_v45 = vld [vmem:[#allocation141_spill] sm:$0xff] }
 0x360   : > { %v2551_v20 = vadd.f32 %v8933_v7, %v10090_v45 }
 0x363   : > { %v8995_v53 = vpop.f32.mrf.mxu0 }
 0x365   : > { %v8999_v61 = vpop.f32.mrf.mxu0 }
 0x367   : > { %v9001_v0 = vpop.f32.mrf.mxu0 }
 0x369   : > { %v9005_v8 = vpop.f32.mrf.mxu0 }
 0x36b   : > { %v4042_v16 = vpop.f32.mrf.mxu1 }
 0x36d   : > { %v9007_v26 = vpop.f32.mrf.mxu1 }
 0x36f   : > { %v4049_v10 = vpop.f32.mrf.mxu1 }
 0x371   : > { %v9013_v33 = vpop.f32.mrf.mxu1 }
 0x3a3   : > { %v9009_v34 = vpop.f32.mrf.mxu0 }
 0x3a5   : > { %v9011_v38 = vpop.f32.mrf.mxu0 }
 0x3a7   : > { %v9015_v19 = vpop.f32.mrf.mxu0 }
 0x3a9   : > { %v9019_v15 = vpop.f32.mrf.mxu0 }
 0x3ab   : > { %v9017_v18 = vpop.f32.mrf.mxu1 }
 0x3ad   : > { %v9021_v48 = vpop.f32.mrf.mxu1 }
 0x3af   : > { %v9025_v60 = vpop.f32.mrf.mxu1 }
 0x3b0   : > { %10077 = vst [vmem:[#allocation30_spill] sm:$0xff] %v9025_v60 }
 0x3b1   : > { %v9031_v11 = vpop.f32.mrf.mxu1 }
 0x3b2   : > { %10080 = vst [vmem:[#allocation47_spill] sm:$0xff] %v9031_v11  ;;  %v10089_v11 = vld [vmem:[#allocation153_spill] sm:$0xff] }
 0x3b3   : > { %v2376_v21 = vadd.f32 %v10089_v11, %v2262_v42 }
 0x3b5   : > { %v2553_v14 = vadd.f32 %v8935_v56, %v2376_v21 }
 0x3e3   : > { %v9023_v17 = vpop.f32.mrf.mxu0 }
 0x3e5   : > { %v9027_v36 = vpop.f32.mrf.mxu0 }
 0x3e6   : > { %10078 = vst [vmem:[#allocation42_spill] sm:$0xff] %v9027_v36  ;;  %v10091_v36 = vld [vmem:[#allocation142_spill] sm:$0xff] }
 0x3e7   : > { %v9029_v3 = vpop.f32.mrf.mxu0  ;;  %v2558_v60 = vadd.f32 %v8939_v62, %v10091_v36 }
 0x3e8   : > { %10079 = vst [vmem:[#allocation34_spill] sm:$0xff] %v9029_v3 }
 0x3e9   : > { %v9033_v1 = vpop.f32.mrf.mxu0  ;;  %v2669_v42 = vadd.f32 %v8949_v44, %v2558_v60 }
 0x3ea   : > { %10081 = vst [vmem:[#allocation38_spill] sm:$0xff] %v9033_v1  ;;  %v1626_v1 = vsel %vm605_vm0, 1, %v9537_v50 }
 0x3eb   : > { %v9035_v5 = vpop.f32.mrf.mxu1  ;;  %v4698_v57 = vpop.f32.mrf.mxu0 }
 0x3ec   : > { %10082 = vst [vmem:[#allocation51_spill] sm:$0xff] %v9035_v5  ;;  %v2385_v5 = vadd.f32 %v8937_v49, %v2270_v58  ;;  %v2662_v49 = vadd.f32 %v8941_v28, %v2551_v20  ;;  %v2664_v58 = vadd.f32 %v8945_v22, %v2553_v14 }
 0x3ed   : > { %v9040_v2 = vpop.f32.mrf.mxu1  ;;  %v4700_v46 = vpop.f32.mrf.mxu0 }
 0x3ee   : > { %10086 = vst [vmem:[#allocation43_spill] sm:$0xff] %v9040_v2  ;;  %v1627_v2 = vcombine.low %v1625_v51, %v1626_v1  ;;  %v2560_v3 = vadd.f32 %v8943_v9, %v2385_v5  ;;  %v2783_v6 = vadd.f32 %v8947_v63, %v2662_v49  ;;  %v2785_v1 = vadd.f32 %v8951_v13, %v2664_v58  ;;  %v6427_v49 = vld [vmem:[%s8021_s9] sm:$0x3]  ;;  %s418_s9 = sand.u32 1, %s6496_s22  }
 0x3ef   : > { %v9050_v40 = vpop.f32.mrf.mxu1  ;;  %v4709_v37 = vpop.f32.mrf.mxu0  ;;  %v2794_v9 = vadd.f32 %v8955_v52, %v2669_v42  ;;  %v4043_v52 = vadd.f32 %v4042_v16, %v8995_v53  ;;  %vm1624_vm9 = vcmp.gt.f32.partialorder %v6427_v49, 0.0  ;;  %v10108_v49 = vld [vmem:[#allocation143_spill] sm:$0xff]  ;;  %s419_s12 = scalar_lea.vmem [#allocation2], %s418_s9 }
 0x3f0   : > { %v2671_v7 = vadd.f32 %v8953_v25, %v2560_v3  ;;  %v1634_v62 = vrot.slane %v1627_v2, %v1633_v30  ;;  %v3026_v28 = vadd.f32 %v8957_v41, %v2783_v6  ;;  %v3028_v22 = vadd.f32 %v8961_v12, %v2785_v1  ;;  %s5272_s25 = sshll.u32 %s419_s12, 4  ;;  %s5273_s25 = int_to_ptr.vmem [resolvable:$true] %s5272_s25 }
 0x3f1   : > { %v9059_v50 = vpop.f32.mrf.mxu1  ;;  %v4711_v11 = vpop.f32.mrf.mxu0  ;;  %v3033_v44 = vadd.f32 %v8965_v27, %v2794_v9  ;;  %v4050_v41 = vadd.f32 %v4049_v10, %v9001_v0  ;;  %v4045_v3 = vadd.f32 %v9007_v26, %v8999_v61  ;;  %v4052_v0 = vadd.f32 %v9013_v33, %v9005_v8  ;;  %v10097_v9 = vld [vmem:[#allocation18_spill] sm:$0xff] }
 0x3f2   : > { %v2796_v36 = vadd.f32 %v8959_v29, %v2671_v7  ;;  %v3170_v63 = vadd.f32 %v8963_v31, %v3026_v28  ;;  %v3172_v13 = vadd.f32 %v8967_v43, %v3028_v22  ;;  %v1641_v27 = vrot.slane %v1634_v62, %v1633_v30  ;;  %v10095_v7 = vld [vmem:[#allocation42_spill] sm:$0xff] }
 0x3f3   : > { %v4791_v56 = vpop.f32.mrf.mxu1  ;;  %v4875_v21 = vpop.f32.mrf.mxu0  ;;  %v3178_v29 = vadd.f32 %v8971_v35, %v3033_v44  ;;  %v4187_v31 = vadd.f32 %v9009_v34, %v4043_v52  ;;  %v4195_v34 = vadd.f32 %v9015_v19, %v4050_v41  ;;  %v4197_v19 = vadd.f32 %v9019_v15, %v4052_v0  ;;  %v10100_v15 = vld [vmem:[#allocation29_spill] sm:$0xff]  ;;  %v10103_v52 = vld [vmem:[#allocation38_spill] sm:$0xff] }
 0x3f4   : > { %v3035_v25 = vadd.f32 %v8969_v54, %v2796_v36  ;;  %v4792_v2 = vadd.f32 %v4791_v56, %v4698_v57  ;;  %v3284_v54 = vadd.f32 %v8973_v23, %v3170_v63  ;;  %v3286_v53 = vadd.f32 %v8977_v59, %v3172_v13  ;;  %v10098_v36 = vld [vmem:[#allocation47_spill] sm:$0xff]  ;;  %v10102_v63 = vld [vmem:[#allocation33_spill] sm:$0xff] }
 0x3f5   : > { %v4793_v5 = vpop.f32.mrf.mxu1  ;;  %v4877_v51 = vpop.f32.mrf.mxu0  ;;  %v3293_v35 = vadd.f32 %v8981_v47, %v3178_v29  ;;  %v4189_v23 = vadd.f32 %v9011_v38, %v4045_v3  ;;  %v4301_v57 = vadd.f32 %v9017_v18, %v4187_v31  ;;  %vm9092_vm10 = vcmp.ne.s32.totalorder %v1641_v27, 0  ;;  %v10101_v44 = vld [vmem:[#allocation43_spill] sm:$0xff] }
 0x3f6   : > { %v3180_v20 = vadd.f32 %v8975_v24, %v3035_v25  ;;  %v4794_v43 = vadd.f32 %v4793_v5, %v4700_v46  ;;  %v4876_v61 = vadd.f32 %v4875_v21, %v4792_v2  ;;  %v3461_v18 = vadd.f32 %v8979_v39, %v3284_v54  ;;  %v10096_v21 = vld [vmem:[#allocation51_spill] sm:$0xff]  ;;  %vm1643_vm11 = vmand %vm1624_vm9, %vm9092_vm10 }
 0x3f7   : > { %v4798_v60 = vpop.f32.mrf.mxu1  ;;  %v4883_v45 = vpop.f32.mrf.mxu0  ;;  %v4478_v8 = vadd.f32 %v9023_v17, %v4301_v57  ;;  %v3468_v17 = vadd.f32 %v10097_v9, %v3293_v35  ;;  %v4312_v5 = vadd.f32 %v10098_v36, %v4197_v19  ;;  %v10104_v3 = vmov 0   ;;  %v10106_v35 = vld [vmem:[#allocation24_spill] sm:$0xff] }
 0x3f8   : > { %v3295_v24 = vadd.f32 %v8985_v32, %v3180_v20  ;;  %v4799_v26 = vadd.f32 %v4798_v60, %v4709_v37  ;;  %v4303_v32 = vadd.f32 %v9021_v48, %v4189_v23  ;;  %v4878_v38 = vadd.f32 %v4877_v51, %v4794_v43  ;;  %v10099_v51 = vld [vmem:[#allocation34_spill] sm:$0xff]  ;;  %v10105_v43 = vld [vmem:[#allocation20_spill] sm:$0xff] }
 0x3f9   : > { %v4800_v12 = vpop.f32.mrf.mxu1  ;;  %v4885_v14 = vpop.f32.mrf.mxu0  ;;  %v3463_v37 = vadd.f32 %v8983_v4, %v3286_v53  ;;  %v4589_v6 = vadd.f32 %v10096_v21, %v4478_v8  ;;  %v3572_v22 = vadd.f32 %v10100_v15, %v3461_v18  ;;  %v4487_v2 = vadd.f32 %v10103_v52, %v4312_v5 }
 0x3fa   : > { %v4801_v46 = vadd.f32 %v4800_v12, %v4711_v11  ;;  %v10094_v11 = vld [vmem:[#allocation30_spill] sm:$0xff]  ;;  %v4480_v56 = vadd.f32 %v10095_v7, %v4303_v32  ;;  %v4884_v1 = vadd.f32 %v4883_v45, %v4799_v26  ;;  %v5167_v31 = vsel %vm1643_vm11, 1, %v10104_v3 }
 0x3fb   : > { %v4959_v16 = vpop.f32.mrf.mxu1  ;;  %v5046_v10 = vpop.f32.mrf.mxu0  ;;  %v4310_v58 = vadd.f32 %v10094_v11, %v4195_v34  ;;  %v3574_v13 = vadd.f32 %v10102_v63, %v3463_v37  ;;  %v4600_v12 = vadd.f32 %v4589_v6, %v3572_v22  ;;  %v3470_v53 = vadd.f32 %v10105_v43, %v3295_v24  ;;  %v10109_v37 = vld [vmem:[#allocation136_spill] sm:$0xff] }
 0x3fc   : > { %v4960_v33 = vadd.f32 %v4959_v16, %v4876_v61  ;;  %v4886_v28 = vadd.f32 %v4885_v14, %v4801_v46  ;;  %v4591_v25 = vadd.f32 %v10101_v44, %v4480_v56  ;;  %v3579_v0 = vadd.f32 %v10106_v35, %v3468_v17 }
 0x3fd   : > { %v4961_v30 = vpop.f32.mrf.mxu1  ;;  %v5048_v59 = vpop.f32.mrf.mxu0  ;;  %v4485_v39 = vadd.f32 %v10099_v51, %v4310_v58  ;;  %v4598_v16 = vadd.f32 %v9059_v50, %v4487_v2  ;;  %v5171_v47 = vrot.slane %v5167_v31, %v10108_v49  ;;  %v5175_v50 = vrot.slane %v5167_v31, %v10109_v37 }
 0x3fe   : > { %v4962_v62 = vadd.f32 %v4961_v30, %v4878_v38  ;;  %v5047_v60 = vadd.f32 %v5046_v10, %v4960_v33  ;;  %v4601_v23 = vadd.f32 %v4591_v25, %v3574_v13 }
 0x3ff   : > { %v4968_v42 = vpop.f32.mrf.mxu1  ;;  %v5053_v48 = vpop.f32.mrf.mxu0  ;;  %v4596_v29 = vadd.f32 %v9050_v40, %v4485_v39  ;;  %v10107_v40 = vld [vmem:[#allocation36_spill] sm:$0xff]  ;;  %vm9126_vm13 = vcmp.eq.s32.totalorder %v5171_v47, 1  ;;  %vm9132_vm15 = vcmp.eq.s32.totalorder %v5175_v50, 1  ;;  %v10117_v50 = vld [vmem:[#allocation5_spill] sm:$0xff] }
 0x400   : > { %v4969_v45 = vadd.f32 %v4968_v42, %v4884_v1  ;;  %v5049_v14 = vadd.f32 %v5048_v59, %v4962_v62  ;;  %v3581_v34 = vadd.f32 %v10107_v40, %v3470_v53  ;;  %vm5244_vm7 = vcmp.eq.s32.totalorder %v10117_v50, 1 }
 0x401   : > { %v4970_v4 = vpop.f32.mrf.mxu1  ;;  %v5055_v27 = vpop.f32.mrf.mxu0  ;;  %v4602_v46 = vadd.f32 %v4596_v29, %v3579_v0  ;;  %vm5241_vm8 = vcmp.eq.s32.totalorder %v10117_v50, 0  ;;  %vm5248_vm9 = vcmp.eq.s32.totalorder %v10117_v50, 2  ;;  %vm5252_vm10 = vcmp.eq.s32.totalorder %v10117_v50, 3 }
 0x402   : > { %v4971_v20 = vadd.f32 %v4970_v4, %v4886_v28  ;;  %v5054_v57 = vadd.f32 %v5053_v48, %v4969_v45  ;;  %v4603_v33 = vadd.f32 %v4598_v16, %v3581_v34 }
 0x403   : > { %v5127_v41 = vpop.f32.mrf.mxu1 }
 0x404   : > { %v5128_v54 = vadd.f32 %v5127_v41, %v5047_v60  ;;  %v5056_v30 = vadd.f32 %v5055_v27, %v4971_v20 }
 0x405   : > { %v5129_v10 = vpop.f32.mrf.mxu1 }
 0x406   : > { %v5139_v61 = vsub.f32 %v4600_v12, %v5128_v54  ;;  %v5130_v26 = vadd.f32 %v5129_v10, %v5049_v14  ;;  %v10116_v14 = vld [vmem:[#allocation135_spill] sm:$0xff] }
 0x407   : > { %v5134_v59 = vpop.f32.mrf.mxu1  ;;  %vm5208_vm5 = vcmp.lt.s32.totalorder %v10116_v14, 14  ;;  %vm5226_vm6 = vcmp.ge.s32.totalorder %v10116_v14, 14 }
 0x408   : > { %v5151_v32 = vmul.f32 0.5, %v5139_v61  ;;  %v5140_v8 = vsub.f32 %v4601_v23, %v5130_v26  ;;  %v5135_v38 = vadd.f32 %v5134_v59, %v5054_v57  ;;  %v5143_v24 = vand.u32 2147483647, %v5139_v61 }
 0x409   : > { %v5136_v18 = vpop.f32.mrf.mxu1 }
 0x40a   : > { %v5152_v19 = vmul.f32 0.5, %v5140_v8  ;;  %v5141_v11 = vsub.f32 %v4602_v46, %v5135_v38  ;;  %v5137_v58 = vadd.f32 %v5136_v18, %v5056_v30  ;;  %v5144_v42 = vand.u32 2147483647, %v5140_v8 }
 0x40b   : > { %vm9122_vm12 = vcmp.lt.f32.partialorder %v5143_v24, 1.0  ;;  %v5155_v56 = vmul.f32 %v5151_v32, %v5139_v61  ;;  %v5474_v21 = vadd.f32 -0.5, %v5143_v24 }
 0x40c   : > { %v5145_v1 = vand.u32 2147483647, %v5141_v11  ;;  %v5153_v62 = vmul.f32 0.5, %v5141_v11  ;;  %v5142_v48 = vsub.f32 %v4603_v33, %v5137_v58  ;;  %vm5148_vm14 = vcmp.lt.f32.partialorder %v5144_v42, 1.0 }
 0x40d   : > { %v5156_v9 = vmul.f32 %v5152_v19, %v5140_v8  ;;  %v5475_v17 = vadd.f32 -0.5, %v5144_v42  ;;  %v5163_v36 = vsel %vm9122_vm12, %v5155_v56, %v5474_v21 }
 0x40e   : > { %v5157_v51 = vmul.f32 %v5153_v62, %v5141_v11  ;;  %v5146_v39 = vand.u32 2147483647, %v5142_v48  ;;  %v5154_v28 = vmul.f32 0.5, %v5142_v48  ;;  %v5178_v15 = vsel %vm9126_vm13, %v5163_v36, 0.0 }
 0x40f   : > { %v5164_v4 = vsel %vm5148_vm14, %v5156_v9, %v5475_v17  ;;  %vm5149_vm0 = vcmp.lt.f32.partialorder %v5145_v1, 1.0  ;;  %v5476_v22 = vadd.f32 -0.5, %v5145_v1  ;;  %v5242_v11 = vstv %s6337_s17  ;;  %s5258_s17 = scalar_lea.sflag [#allocation3], %s418_s9 }
 0x410   : > { %v5158_v44 = vmul.f32 %v5154_v28, %v5142_v48  ;;  %v5179_v25 = vsel %vm9132_vm15, %v5164_v4, 0.0  ;;  %vm5150_vm2 = vcmp.lt.f32.partialorder %v5146_v39, 1.0  ;;  %v5477_v60 = vadd.f32 -0.5, %v5146_v39 }
 0x411   : > { %v5182_v45 = vadd.f32 %v5179_v25, %v5178_v15  ;;  %v5165_v63 = vsel %vm5149_vm0, %v5157_v51, %v5476_v22  ;;  %v5243_v42 = vsel %vm5241_vm8, %v5242_v11, 0.0 }
 0x412   : > { %v5166_v13 = vsel %vm5150_vm2, %v5158_v44, %v5477_v60  ;;  %v5180_v52 = vsel %vm9126_vm13, %v5165_v63, 0.0 }
 0x413   : > { %5183 = vadd.xlane.f32.xlu0 %v5182_v45  ;;  %v5181_v2 = vsel %vm9132_vm15, %v5166_v13, 0.0 }
 0x414   : > { %v5185_v29 = vadd.f32 %v5181_v2, %v5180_v52 }
 0x417   : > { %5186 = vadd.xlane.f32.xlu0 %v5185_v29 }
 0x49c   : > { %v5184_v20 = vpop.xlane.xlu0 %5183 }
 0x49d   : > { %v5190_v41 = vsel %vm5188_vm3, %v5184_v20, 0.0  ;;  %v5211_v27 = vsel %vm5205_vm4, %v5184_v20, 0.0 }
 0x49e   : > { %v5193_v12 = vsel %vm5192_vm1, %v5190_v41, 0.0  ;;  %v5213_v53 = vsel %vm5192_vm1, %v5211_v27, 0.0 }
 0x49f   : > { %5196 = vadd.xlane.f32.xlu1 %v5193_v12 }
 0x4a0   : > { %v5187_v54 = vpop.xlane.xlu0 %5186 }
 0x4a1   : > { %v5212_v3 = vsel %vm5208_vm5, %v5187_v54, 0.0  ;;  %v5228_v31 = vsel %vm5226_vm6, %v5187_v54, 0.0 }
 0x4a2   : > { %v5230_v43 = vsel %vm5192_vm1, %v5228_v31, 0.0  ;;  %v5214_v35 = vsel %vm5192_vm1, %v5212_v3, 0.0 }
 0x4a3   : > { %5232 = vadd.xlane.f32.xlu1 %v5230_v43  ;;  %v5215_v0 = vadd.f32 %v5214_v35, %v5213_v53 }
 0x4a5   : > { %5216 = vadd.xlane.f32.xlu0 %v5215_v0 }
 0x528   : > { %v5197_v16 = vpop.xlane.xlu1 %5196 }
 0x529   : > { %v5198_v55 = vrot.slane %v5197_v16, 4 }
 0x52b   : > { %v5199_v10 = vadd.f32 %v5198_v55, %v5197_v16 }
 0x52c   : > { %v5233_v23 = vpop.xlane.xlu1 %5232 }
 0x52d   : > { %v5200_v57 = vrot.slane %v5199_v10, 2  ;;  %v5234_v61 = vrot.slane %v5233_v23, 4 }
 0x52e   : > { %v5217_v26 = vpop.xlane.xlu0 %5216 }
 0x52f   : > { %v5235_v40 = vadd.f32 %v5234_v61, %v5233_v23  ;;  %v5218_v34 = vrot.slane %v5217_v26, 4  ;;  %v5201_v46 = vadd.f32 %v5200_v57, %v5199_v10 }
 0x531   : > { %v5236_v30 = vrot.slane %v5235_v40, 2  ;;  %v5219_v59 = vadd.f32 %v5218_v34, %v5217_v26  ;;  %v5202_v49 = vrot.slane %v5201_v46, 1 }
 0x533   : > { %v5237_v47 = vadd.f32 %v5236_v30, %v5235_v40  ;;  %v5220_v32 = vrot.slane %v5219_v59, 2  ;;  %v5203_v8 = vadd.f32 %v5202_v49, %v5201_v46 }
 0x535   : > { %v5221_v38 = vadd.f32 %v5220_v32, %v5219_v59  ;;  %6338 = vpush %v5203_v8  ;;  %v5238_v24 = vrot.slane %v5237_v47, 1 }
 0x537   : > { %v5222_v33 = vrot.slane %v5221_v38, 1  ;;  %v5239_v37 = vadd.f32 %v5238_v24, %v5237_v47 }
 0x539   : > { %v5223_v18 = vadd.f32 %v5222_v33, %v5221_v38 }
 0x53b   : > { %6340 = vpush %v5223_v18 }
 0x53c   : > { %6342 = vpush %v5239_v37 }
 0x566   : > { %s6339_s19 = spop %6338 }
 0x567   : > { %v5245_v19 = vstv %s6339_s19  ;;  %s6428_s19 = scalar_lea.vmem %s5273_s25, 16 }
 0x568   : > { %v5246_v58 = vsel %vm5244_vm7, %v5245_v19, 0.0  ;;  %p6429_p1 = scmp.ne.s32.totalorder %s5273_s25, %s6428_s19 }
 0x569   : > { %v5247_v7 = vadd.f32 %v5246_v58, %v5243_v42 }
 0x56a   : > { %p6430_p2 = pnand %p6429_p1, %p6613_p3 }
 0x56c   : > { %s6341_s18 = spop %6340  ;;  %p6431_p4 = pneg %p6430_p2 }
 0x56d   : > { %v5249_v56 = vstv %s6341_s18  ;;  %s6343_s29 = spop %6342  ;;  %s6432_s18 = sshll.u32 %s6526_s16, 4  ;;  %s6433_s18 = int_to_ptr.vmem [resolvable:$false] %s6432_s18 }
 0x56e   : > { %v5250_v21 = vsel %vm5248_vm9, %v5249_v56, 0.0  ;;  %v5253_v6 = vstv %s6343_s29  ;;  %s6434_s20 = scalar_lea.vmem %s6433_s18, 32  ;;  %p6435_p5 = scmp.lt.s32.totalorder %s5273_s25, %s6433_s18 }
 0x56f   : > { %v5251_v1 = vadd.f32 %v5250_v21, %v5247_v7  ;;  %v5254_v62 = vsel %vm5252_vm10, %v5253_v6, 0.0  ;;  %p6436_p6 = scmp.lt.s32.totalorder %s6434_s20, %s6428_s19 }
 0x571   : > { %v5255_v48 = vadd.f32 %v5254_v62, %v5251_v1  ;;  %p6437_p7 = por %p6436_p6, %p6435_p5 }
 0x573   : > { %5256 = vst [vmem:[%s419_s12] sm:$0x1] %v5255_v48  ;;  %p6438_p9 = pnand %p6437_p7, %p6431_p4 }
 0x575   : > { %6441 = shalt.err (!%p6438_p9)
}
 0x576   : > { %s6442_s29 = scalar_lea.hbm %s5270_s24, 16  ;;  %s6446_s12 = scalar_lea.hbm %s9204_s6, 64 }
 0x577   : > { %p6443_p10 = scmp.ne.s32.totalorder %s5270_s24, %s6442_s29  ;;  %p6447_p13 = scmp.lt.s32.totalorder %s5270_s24, %s9204_s6 }
 0x578   : > { %p6448_p0 = scmp.lt.s32.totalorder %s6446_s12, %s6442_s29 }
 0x579   : > { %p6444_p11 = pnand %p6443_p10, %p6613_p3 }
 0x57a   : > { %p6449_p1 = por %p6448_p0, %p6447_p13 }
 0x57b   : > { %p6445_p12 = pneg %p6444_p11 }
 0x57d   : > { %p6450_p2 = pnand %p6449_p1, %p6445_p12 }
 0x57f   : > { %6453 = shalt.err (!%p6450_p2)
}
 0x580   : > { %6344 = dma.vmem_to_hbm [thread:$0]  (%p6613_p3), %s5273_s25, 16, %s5270_s24, %s5258_s17  }
 0x581 PF: > { %p6350_p4 = scmp.ge.s32.totalorder %s6520_s28, 2  ;;  %s5284_s19 = sand.u32 1, %s6492_s21  }
 0x582   : > { %s5285_s16 = scalar_lea.sflag [#allocation3], %s5284_s19 }
 0x583   : > { %p6347_p5 = pnand %p6350_p4, %p6622_p8 }
 0x585   : > { %p6348_p6 = pneg %p6347_p5 }
 0x587   : > { %6487 = dma.done.wait (%p6348_p6), %s5285_s16, 16  }
 0x588   : > { %6489 = vsyncadd (%p6348_p6), %s5285_s16, 4294967280  ;;  %s19_s28 = sadd.s32 1, %s6520_s28   ;;  %s10118_s21 = smov %s6496_s22 }
 0x589   : > { %p16_p7 = scmp.ge.s32.totalorder %s19_s28, 6   ;;  %s10119_s22 = smov %s6500_s23 }
 0x58a   : > { %s10120_s23 = smov %s6631_s15  ;;  %s10121_s24 = smov %s6512_s26 }
 0x58b   : > { %s10122_s25 = smov %s6516_s27  ;;  %s10123_s26 = smov %s10126_s7 }
 0x58c   : > { %s10124_s27 = smov %s10130_s8  ;;  %18 = sbr.rel (!%p16_p7) target bundleno = 5 (0x5), region = 94 }
 0x591   :  { %5289 = vsyncpa [#allocation3], 1 }
 0x592   :  { %5291 = vsyncpa [#allocation3 + $0x1], 1 }

</bundles_post_ra>
